<compile_context>
chip_gen: v5e
topology: v5e:2x2
jax: 0.10.0
libtpu: 0.0.40
codegen_flags: <defaults>
</compile_context>

<pallas_src>
import functools
import math

import jax
import jax.numpy as jnp
from jax.experimental import pallas as pl
from jax.experimental.pallas import tpu as pltpu

_LANE = 128  # lane-dense padding target for the final logits


# ----------------------------------------------------------------------------
# Kernel factory (all sizes static).
# ----------------------------------------------------------------------------
def _make_res_bilstm_kernel(num_layers, T, B, D, H, NP, n_bufs):
    f32 = jnp.float32
    G = 4 * H  # gates per direction

    def kernel(*refs):
        it = iter(refs)
        x_ref = next(it)                                    # (T*B, D) time-major
        layers = []
        for l in range(num_layers):
            n_parts = 1 if l == 0 else 2
            w_ih_parts = [next(it) for _ in range(n_parts)]  # (D or H, 8H) each
            bias = next(it)                                  # (1, 8H) = b_ih+b_hh, both dirs
            w_hh_f = next(it)                                # (H, 4H)
            w_hh_b = next(it)                                # (H, 4H)
            layers.append((w_ih_parts, bias, w_hh_f, w_hh_b))
        w_fc1_f = next(it)                                   # (H, D)
        w_fc1_b = next(it)                                   # (H, D)
        b_fc1 = next(it)                                     # (1, D)
        w_fc = next(it)                                      # (D, NP) zero-padded
        b_fc = next(it)                                      # (1, NP) zero-padded
        out_ref = next(it)                                   # (B, NP)
        bufs = [next(it) for _ in range(n_bufs)]             # each (2, T*B, H)

        zeros = jnp.zeros((B, H), f32)

        def layer_inputs(l):
            if l == 0:
                return [x_ref[...]]                          # (T*B, D)
            prev = bufs[(l - 1) % n_bufs]
            return [prev[0], prev[1]]                        # fwd / bwd halves (T*B, H)

        def precompute_gates(l):
            # One matmul per input part covering all timesteps and BOTH
            # directions; biases folded in.  Result: (T*B, 8H).
            w_ih_parts, bias_r, w_hh_f_r, w_hh_b_r = layers[l]
            g = bias_r[...]
            for xp, wp_r in zip(layer_inputs(l), w_ih_parts):
                g = g + jnp.dot(xp, wp_r[...], preferred_element_type=f32)
            return g, w_hh_f_r[...], w_hh_b_r[...]

        def activate(g, c):
            # g: (B, 4H) pre-activation gates [i | f | g | o]; c: (B, H).
            sig = jax.nn.sigmoid(g)                          # one full-width EUP pass
            i_g = sig[:, 0:H]
            f_g = sig[:, H:2 * H]
            o_g = sig[:, 3 * H:4 * H]
            c_g = jnp.tanh(g[:, 2 * H:3 * H])
            c_new = f_g * c + i_g * c_g
            h_new = o_g * jnp.tanh(c_new)
            return h_new, c_new

        def cell(g_in, h, c, w_hh):
            g = g_in + jnp.dot(h, w_hh, preferred_element_type=f32)
            return activate(g, c)

        # Layers 0 .. L-2: full bidirectional sequences, kept in VMEM scratch.
        for l in range(num_layers - 1):
            g_pre, w_hh_f, w_hh_b = precompute_gates(l)      # weights hoisted
            out_buf = bufs[l % n_bufs]
            h, c = zeros, zeros
            for t in range(T):                               # forward direction
                h, c = cell(g_pre[t * B:(t + 1) * B, 0:G], h, c, w_hh_f)
                out_buf[0, pl.ds(t * B, B), :] = h
            h, c = zeros, zeros
            for t in range(T - 1, -1, -1):                   # backward direction
                h, c = cell(g_pre[t * B:(t + 1) * B, G:2 * G], h, c, w_hh_b)
                out_buf[1, pl.ds(t * B, B), :] = h

        # Last layer: only its t = T-1 output feeds fc1 / residual / fc.
        L = num_layers - 1
        g_pre, w_hh_f, _unused = precompute_gates(L)
        h, c = zeros, zeros
        for t in range(T):                                   # forward direction
            h, c = cell(g_pre[t * B:(t + 1) * B, 0:G], h, c, w_hh_f)
        h_fwd_last = h
        # Backward direction output at t=T-1 is its FIRST step from zero state:
        # the recurrent matmul contributes nothing, so it is pure activation.
        h_bwd_last, _ = activate(g_pre[(T - 1) * B:T * B, G:2 * G], zeros)

        # fc1 (row-split over fwd/bwd halves) + residual with x[:, -1, :] + fc.
        y = (jnp.dot(h_fwd_last, w_fc1_f[...], preferred_element_type=f32)
             + jnp.dot(h_bwd_last, w_fc1_b[...], preferred_element_type=f32)
             + b_fc1[...]
             + x_ref[pl.ds((T - 1) * B, B), :])
        logits = jnp.dot(y, w_fc[...], preferred_element_type=f32) + b_fc[...]
        out_ref[...] = logits.astype(out_ref.dtype)

    return kernel


# ----------------------------------------------------------------------------
# Parameters (mimic PyTorch default init; pre-transposed / concatenated /
# split / padded so the kernel never reshapes or concatenates).
# ----------------------------------------------------------------------------
def init_params(key, input_size, hidden_size, num_layers, num_classes,
                n_pad=_LANE):
    H = hidden_size
    k_lstm = 1.0 / math.sqrt(H)
    lstm = []
    for l in range(num_layers):
        in_dim = input_size if l == 0 else 2 * H
        w_ih_t, w_hh_t, biases = [], [], []
        for _d in range(2):
            key, k1, k2, k3, k4 = jax.random.split(key, 5)
            w_ih = jax.random.uniform(k1, (4 * H, in_dim), jnp.float32, -k_lstm, k_lstm)
            w_hh = jax.random.uniform(k2, (4 * H, H), jnp.float32, -k_lstm, k_lstm)
            b_ih = jax.random.uniform(k3, (4 * H,), jnp.float32, -k_lstm, k_lstm)
            b_hh = jax.random.uniform(k4, (4 * H,), jnp.float32, -k_lstm, k_lstm)
            w_ih_t.append(w_ih.T)                           # (in_dim, 4H), gates i|f|g|o
            w_hh_t.append(w_hh.T)                           # (H, 4H)
            biases.append((b_ih + b_hh).reshape(1, 4 * H))
        w_ih_cat = jnp.concatenate(w_ih_t, axis=1)          # (in_dim, 8H) fwd|bwd cols
        parts = [w_ih_cat] if l == 0 else [w_ih_cat[:H], w_ih_cat[H:]]
        lstm.append({"w_ih_parts": parts,
                     "bias": jnp.concatenate(biases, axis=1),   # (1, 8H)
                     "w_hh_f": w_hh_t[0],
                     "w_hh_b": w_hh_t[1]})

    key, k1, k2 = jax.random.split(key, 3)
    k_fc1 = 1.0 / math.sqrt(2 * H)
    w_fc1 = jax.random.uniform(k1, (input_size, 2 * H), jnp.float32, -k_fc1, k_fc1)
    b_fc1 = jax.random.uniform(k2, (input_size,), jnp.float32, -k_fc1, k_fc1)
    w_fc1_t = w_fc1.T                                        # (2H, input_size)

    key, k1, k2 = jax.random.split(key, 3)
    k_fc = 1.0 / math.sqrt(input_size)
    w_fc = jax.random.uniform(k1, (num_classes, input_size), jnp.float32, -k_fc, k_fc)
    b_fc = jax.random.uniform(k2, (num_classes,), jnp.float32, -k_fc, k_fc)
    w_fc_pad = jnp.zeros((input_size, n_pad), jnp.float32).at[:, :num_classes].set(w_fc.T)
    b_fc_pad = jnp.zeros((1, n_pad), jnp.float32).at[0, :num_classes].set(b_fc)

    return {"lstm": lstm,
            "w_fc1_f": w_fc1_t[:H], "w_fc1_b": w_fc1_t[H:],
            "b_fc1": b_fc1.reshape(1, input_size),
            "w_fc_pad": w_fc_pad, "b_fc_pad": b_fc_pad}


def _flatten_params(params):
    args = []
    for p in params["lstm"]:
        args.extend(p["w_ih_parts"])
        args.append(p["bias"])
        args.append(p["w_hh_f"])
        args.append(p["w_hh_b"])
    args.extend([params["w_fc1_f"], params["w_fc1_b"], params["b_fc1"],
                 params["w_fc_pad"], params["b_fc_pad"]])
    return args


# ----------------------------------------------------------------------------
# Fused forward pass.
# ----------------------------------------------------------------------------
@functools.partial(jax.jit, static_argnames=("num_classes",))
def res_bilstm_forward(x, params, *, num_classes):
    B, T, D = x.shape
    num_layers = len(params["lstm"])
    H = params["lstm"][0]["w_hh_f"].shape[0]
    NP = params["w_fc_pad"].shape[1]
    n_bufs = 1 if num_layers <= 2 else 2

    x_flat = jnp.swapaxes(x, 0, 1).reshape(T * B, D)         # (T*B, D) time-major
    args = [x_flat] + _flatten_params(params)

    # Rough scheduling hints for XLA.
    flops = 0
    for l in range(num_layers):
        in_dim = D if l == 0 else 2 * H
        flops += 2 * T * B * in_dim * 8 * H                  # batched input proj (both dirs)
        flops += 2 * 2 * T * B * H * 4 * H                   # recurrent matmuls
    flops += 2 * B * 2 * H * D + 2 * B * D * NP              # fc1 + fc
    transcendentals = 2 * num_layers * T * B * 6 * H
    bytes_accessed = sum(int(a.size) * 4 for a in args) + B * NP * 4

    out = pl.pallas_call(
        _make_res_bilstm_kernel(num_layers, T, B, D, H, NP, n_bufs),
        out_shape=jax.ShapeDtypeStruct((B, NP), jnp.float32),
        scratch_shapes=[pltpu.VMEM((2, T * B, H), jnp.float32)
                        for _ in range(n_bufs)],
        cost_estimate=pl.CostEstimate(flops=int(flops),
                                      transcendentals=int(transcendentals),
                                      bytes_accessed=int(bytes_accessed)),
    )(*args)
    return out[:, :num_classes]


# ----------------------------------------------------------------------------
# Pure-JAX reference (standard concatenated-weight LSTM formulation).
# ----------------------------------------------------------------------------
def reference_forward(x, params, num_classes):
    B, T, D = x.shape
    lstm = params["lstm"]
    H = lstm[0]["w_hh_f"].shape[0]
    layer_in = x
    for p in lstm:
        w_ih_cat = jnp.concatenate(p["w_ih_parts"], axis=0)  # (in_dim, 8H)
        outs = []
        for d in range(2):
            w_ih = w_ih_cat[:, d * 4 * H:(d + 1) * 4 * H]
            w_hh = p["w_hh_f"] if d == 0 else p["w_hh_b"]
            bias = p["bias"][:, d * 4 * H:(d + 1) * 4 * H]
            h = jnp.zeros((B, H), jnp.float32)
            c = jnp.zeros((B, H), jnp.float32)
            hs = [None] * T
            t_order = range(T) if d == 0 else range(T - 1, -1, -1)
            for t in t_order:
                g = layer_in[:, t, :] @ w_ih + h @ w_hh + bias
                i = jax.nn.sigmoid(g[:, :H])
                f = jax.nn.sigmoid(g[:, H:2 * H])
                gg = jnp.tanh(g[:, 2 * H:3 * H])
                o = jax.nn.sigmoid(g[:, 3 * H:])
                c = f * c + i * gg
                h = o * jnp.tanh(c)
                hs[t] = h
            outs.append(jnp.stack(hs, axis=1))               # (B, T, H)
        layer_in = jnp.concatenate(outs, axis=-1)            # (B, T, 2H)
    w_fc1 = jnp.concatenate([params["w_fc1_f"], params["w_fc1_b"]], axis=0)
    y = layer_in @ w_fc1 + params["b_fc1"] + x
    y_last = y[:, -1, :]
    logits = y_last @ params["w_fc_pad"] + params["b_fc_pad"]
    return logits[:, :num_classes]


if __name__ == "__main__":
    B, SEQ, INPUT_SIZE, HIDDEN, NUM_LAYERS, NUM_CLASSES = 2, 8, 32, 32, 2, 6

    key = jax.random.PRNGKey(0)
    kx, kp = jax.random.split(key)
    x = jax.random.normal(kx, (B, SEQ, INPUT_SIZE), jnp.float32)
    params = init_params(kp, INPUT_SIZE, HIDDEN, NUM_LAYERS, NUM_CLASSES)

    out = res_bilstm_forward(x, params, num_classes=NUM_CLASSES)
    out = jax.block_until_ready(out)

    assert out.shape == (B, NUM_CLASSES), out.shape
    assert out.dtype == jnp.float32
    assert bool(jnp.all(jnp.isfinite(out)))

    ref = reference_forward(x, params, NUM_CLASSES)
    max_err = float(jnp.max(jnp.abs(out - ref)))
    assert max_err < 5e-2, f"kernel vs reference mismatch: {max_err}"

    print("KERNEL_OK")
</pallas_src>

<mosaic_0001>
module attributes {stable_mosaic.version = 11 : i64} {
  func.func @kernel(%arg0: memref<16x32xf32, #tpu.memory_space<vmem>>, %arg1: memref<32x256xf32, #tpu.memory_space<vmem>>, %arg2: memref<1x256xf32, #tpu.memory_space<vmem>>, %arg3: memref<32x128xf32, #tpu.memory_space<vmem>>, %arg4: memref<32x128xf32, #tpu.memory_space<vmem>>, %arg5: memref<32x256xf32, #tpu.memory_space<vmem>>, %arg6: memref<32x256xf32, #tpu.memory_space<vmem>>, %arg7: memref<1x256xf32, #tpu.memory_space<vmem>>, %arg8: memref<32x128xf32, #tpu.memory_space<vmem>>, %arg9: memref<32x128xf32, #tpu.memory_space<vmem>>, %arg10: memref<32x32xf32, #tpu.memory_space<vmem>>, %arg11: memref<32x32xf32, #tpu.memory_space<vmem>>, %arg12: memref<1x32xf32, #tpu.memory_space<vmem>>, %arg13: memref<32x128xf32, #tpu.memory_space<vmem>>, %arg14: memref<1x128xf32, #tpu.memory_space<vmem>>, %arg15: memref<2x128xf32, #tpu.memory_space<vmem>>, %arg16: memref<2x16x32xf32, #tpu.memory_space<vmem>>) attributes {dimension_semantics = [], scalar_prefetch = 0 : i64, scratch_operands = 1 : i64, tpu.core_type = #tpu.core_type<tc>} {
    %cst = arith.constant 0.000000e+00 : f32
    %0 = vector.broadcast %cst : f32 to vector<2x32xf32>
    %c0 = arith.constant 0 : index
    %c0_0 = arith.constant 0 : index
    %1 = vector.load %arg2[%c0, %c0_0] : memref<1x256xf32, #tpu.memory_space<vmem>>, vector<1x256xf32>
    %c0_1 = arith.constant 0 : index
    %c0_2 = arith.constant 0 : index
    %2 = vector.load %arg0[%c0_1, %c0_2] : memref<16x32xf32, #tpu.memory_space<vmem>>, vector<16x32xf32>
    %c0_3 = arith.constant 0 : index
    %c0_4 = arith.constant 0 : index
    %3 = vector.load %arg1[%c0_3, %c0_4] : memref<32x256xf32, #tpu.memory_space<vmem>>, vector<32x256xf32>
    %cst_5 = arith.constant dense<0.000000e+00> : vector<16x256xf32>
    %4 = tpu.matmul %2, %3, %cst_5 {dimension_numbers = #tpu.dot_dimension_numbers<[1], [0], [0], [1], [0, 0, 1, 1], [], []>} : vector<16x32xf32>, vector<32x256xf32>, vector<16x256xf32> -> vector<16x256xf32>
    %5 = vector.broadcast %1 : vector<1x256xf32> to vector<16x256xf32>
    %6 = arith.addf %5, %4 : vector<16x256xf32>
    %c0_6 = arith.constant 0 : index
    %c0_7 = arith.constant 0 : index
    %7 = vector.load %arg3[%c0_6, %c0_7] : memref<32x128xf32, #tpu.memory_space<vmem>>, vector<32x128xf32>
    %c0_8 = arith.constant 0 : index
    %c0_9 = arith.constant 0 : index
    %8 = vector.load %arg4[%c0_8, %c0_9] : memref<32x128xf32, #tpu.memory_space<vmem>>, vector<32x128xf32>
    %9 = vector.extract_strided_slice %6 {offsets = [0, 0], sizes = [2, 128], strides = [1, 1]} : vector<16x256xf32> to vector<2x128xf32>
    %cst_10 = arith.constant dense<0.000000e+00> : vector<2x128xf32>
    %10 = tpu.matmul %0, %7, %cst_10 {dimension_numbers = #tpu.dot_dimension_numbers<[1], [0], [0], [1], [0, 0, 1, 1], [], []>} : vector<2x32xf32>, vector<32x128xf32>, vector<2x128xf32> -> vector<2x128xf32>
    %11 = arith.addf %9, %10 : vector<2x128xf32>
    %12 = arith.negf %11 : vector<2x128xf32>
    %13 = math.exp %12 : vector<2x128xf32>
    %cst_11 = arith.constant 1.000000e+00 : f32
    %14 = vector.broadcast %cst_11 : f32 to vector<2x128xf32>
    %15 = arith.addf %14, %13 : vector<2x128xf32>
    %16 = arith.divf %14, %15 : vector<2x128xf32>
    %17 = vector.extract_strided_slice %16 {offsets = [0, 0], sizes = [2, 32], strides = [1, 1]} : vector<2x128xf32> to vector<2x32xf32>
    %18 = vector.extract_strided_slice %16 {offsets = [0, 32], sizes = [2, 32], strides = [1, 1]} : vector<2x128xf32> to vector<2x32xf32>
    %19 = vector.extract_strided_slice %16 {offsets = [0, 96], sizes = [2, 32], strides = [1, 1]} : vector<2x128xf32> to vector<2x32xf32>
    %20 = vector.extract_strided_slice %11 {offsets = [0, 64], sizes = [2, 32], strides = [1, 1]} : vector<2x128xf32> to vector<2x32xf32>
    %21 = math.tanh %20 : vector<2x32xf32>
    %22 = arith.mulf %18, %0 : vector<2x32xf32>
    %23 = arith.mulf %17, %21 : vector<2x32xf32>
    %24 = arith.addf %22, %23 : vector<2x32xf32>
    %25 = math.tanh %24 : vector<2x32xf32>
    %26 = arith.mulf %19, %25 : vector<2x32xf32>
    %c0_12 = arith.constant 0 : index
    %c0_13 = arith.constant 0 : index
    %c0_14 = arith.constant 0 : index
    %27 = vector.load %arg16[%c0_12, %c0_13, %c0_14] : memref<2x16x32xf32, #tpu.memory_space<vmem>>, vector<1x2x32xf32>
    %28 = vector.shape_cast %27 : vector<1x2x32xf32> to vector<2x32xf32>
    %29 = vector.shape_cast %26 : vector<2x32xf32> to vector<1x2x32xf32>
    tpu.vector_store %arg16[%c0_12, %c0_13, %c0_14], %29 {strides = array<i32>} : memref<2x16x32xf32, #tpu.memory_space<vmem>>, vector<1x2x32xf32>,
    %30 = vector.extract_strided_slice %6 {offsets = [2, 0], sizes = [2, 128], strides = [1, 1]} : vector<16x256xf32> to vector<2x128xf32>
    %cst_15 = arith.constant dense<0.000000e+00> : vector<2x128xf32>
    %31 = tpu.matmul %26, %7, %cst_15 {dimension_numbers = #tpu.dot_dimension_numbers<[1], [0], [0], [1], [0, 0, 1, 1], [], []>} : vector<2x32xf32>, vector<32x128xf32>, vector<2x128xf32> -> vector<2x128xf32>
    %32 = arith.addf %30, %31 : vector<2x128xf32>
    %33 = arith.negf %32 : vector<2x128xf32>
    %34 = math.exp %33 : vector<2x128xf32>
    %cst_16 = arith.constant 1.000000e+00 : f32
    %35 = vector.broadcast %cst_16 : f32 to vector<2x128xf32>
    %36 = arith.addf %35, %34 : vector<2x128xf32>
    %37 = arith.divf %35, %36 : vector<2x128xf32>
    %38 = vector.extract_strided_slice %37 {offsets = [0, 0], sizes = [2, 32], strides = [1, 1]} : vector<2x128xf32> to vector<2x32xf32>
    %39 = vector.extract_strided_slice %37 {offsets = [0, 32], sizes = [2, 32], strides = [1, 1]} : vector<2x128xf32> to vector<2x32xf32>
    %40 = vector.extract_strided_slice %37 {offsets = [0, 96], sizes = [2, 32], strides = [1, 1]} : vector<2x128xf32> to vector<2x32xf32>
    %41 = vector.extract_strided_slice %32 {offsets = [0, 64], sizes = [2, 32], strides = [1, 1]} : vector<2x128xf32> to vector<2x32xf32>
    %42 = math.tanh %41 : vector<2x32xf32>
    %43 = arith.mulf %39, %24 : vector<2x32xf32>
    %44 = arith.mulf %38, %42 : vector<2x32xf32>
    %45 = arith.addf %43, %44 : vector<2x32xf32>
    %46 = math.tanh %45 : vector<2x32xf32>
    %47 = arith.mulf %40, %46 : vector<2x32xf32>
    %c0_17 = arith.constant 0 : index
    %c2 = arith.constant 2 : index
    %c0_18 = arith.constant 0 : index
    %48 = vector.load %arg16[%c0_17, %c2, %c0_18] : memref<2x16x32xf32, #tpu.memory_space<vmem>>, vector<1x2x32xf32>
    %49 = vector.shape_cast %48 : vector<1x2x32xf32> to vector<2x32xf32>
    %50 = vector.shape_cast %47 : vector<2x32xf32> to vector<1x2x32xf32>
    tpu.vector_store %arg16[%c0_17, %c2, %c0_18], %50 {strides = array<i32>} : memref<2x16x32xf32, #tpu.memory_space<vmem>>, vector<1x2x32xf32>,
    %51 = vector.extract_strided_slice %6 {offsets = [4, 0], sizes = [2, 128], strides = [1, 1]} : vector<16x256xf32> to vector<2x128xf32>
    %cst_19 = arith.constant dense<0.000000e+00> : vector<2x128xf32>
    %52 = tpu.matmul %47, %7, %cst_19 {dimension_numbers = #tpu.dot_dimension_numbers<[1], [0], [0], [1], [0, 0, 1, 1], [], []>} : vector<2x32xf32>, vector<32x128xf32>, vector<2x128xf32> -> vector<2x128xf32>
    %53 = arith.addf %51, %52 : vector<2x128xf32>
    %54 = arith.negf %53 : vector<2x128xf32>
    %55 = math.exp %54 : vector<2x128xf32>
    %cst_20 = arith.constant 1.000000e+00 : f32
    %56 = vector.broadcast %cst_20 : f32 to vector<2x128xf32>
    %57 = arith.addf %56, %55 : vector<2x128xf32>
    %58 = arith.divf %56, %57 : vector<2x128xf32>
    %59 = vector.extract_strided_slice %58 {offsets = [0, 0], sizes = [2, 32], strides = [1, 1]} : vector<2x128xf32> to vector<2x32xf32>
    %60 = vector.extract_strided_slice %58 {offsets = [0, 32], sizes = [2, 32], strides = [1, 1]} : vector<2x128xf32> to vector<2x32xf32>
    %61 = vector.extract_strided_slice %58 {offsets = [0, 96], sizes = [2, 32], strides = [1, 1]} : vector<2x128xf32> to vector<2x32xf32>
    %62 = vector.extract_strided_slice %53 {offsets = [0, 64], sizes = [2, 32], strides = [1, 1]} : vector<2x128xf32> to vector<2x32xf32>
    %63 = math.tanh %62 : vector<2x32xf32>
    %64 = arith.mulf %60, %45 : vector<2x32xf32>
    %65 = arith.mulf %59, %63 : vector<2x32xf32>
    %66 = arith.addf %64, %65 : vector<2x32xf32>
    %67 = math.tanh %66 : vector<2x32xf32>
    %68 = arith.mulf %61, %67 : vector<2x32xf32>
    %c0_21 = arith.constant 0 : index
    %c4 = arith.constant 4 : index
    %c0_22 = arith.constant 0 : index
    %69 = vector.load %arg16[%c0_21, %c4, %c0_22] : memref<2x16x32xf32, #tpu.memory_space<vmem>>, vector<1x2x32xf32>
    %70 = vector.shape_cast %69 : vector<1x2x32xf32> to vector<2x32xf32>
    %71 = vector.shape_cast %68 : vector<2x32xf32> to vector<1x2x32xf32>
    tpu.vector_store %arg16[%c0_21, %c4, %c0_22], %71 {strides = array<i32>} : memref<2x16x32xf32, #tpu.memory_space<vmem>>, vector<1x2x32xf32>,
    %72 = vector.extract_strided_slice %6 {offsets = [6, 0], sizes = [2, 128], strides = [1, 1]} : vector<16x256xf32> to vector<2x128xf32>
    %cst_23 = arith.constant dense<0.000000e+00> : vector<2x128xf32>
    %73 = tpu.matmul %68, %7, %cst_23 {dimension_numbers = #tpu.dot_dimension_numbers<[1], [0], [0], [1], [0, 0, 1, 1], [], []>} : vector<2x32xf32>, vector<32x128xf32>, vector<2x128xf32> -> vector<2x128xf32>
    %74 = arith.addf %72, %73 : vector<2x128xf32>
    %75 = arith.negf %74 : vector<2x128xf32>
    %76 = math.exp %75 : vector<2x128xf32>
    %cst_24 = arith.constant 1.000000e+00 : f32
    %77 = vector.broadcast %cst_24 : f32 to vector<2x128xf32>
    %78 = arith.addf %77, %76 : vector<2x128xf32>
    %79 = arith.divf %77, %78 : vector<2x128xf32>
    %80 = vector.extract_strided_slice %79 {offsets = [0, 0], sizes = [2, 32], strides = [1, 1]} : vector<2x128xf32> to vector<2x32xf32>
    %81 = vector.extract_strided_slice %79 {offsets = [0, 32], sizes = [2, 32], strides = [1, 1]} : vector<2x128xf32> to vector<2x32xf32>
    %82 = vector.extract_strided_slice %79 {offsets = [0, 96], sizes = [2, 32], strides = [1, 1]} : vector<2x128xf32> to vector<2x32xf32>
    %83 = vector.extract_strided_slice %74 {offsets = [0, 64], sizes = [2, 32], strides = [1, 1]} : vector<2x128xf32> to vector<2x32xf32>
    %84 = math.tanh %83 : vector<2x32xf32>
    %85 = arith.mulf %81, %66 : vector<2x32xf32>
    %86 = arith.mulf %80, %84 : vector<2x32xf32>
    %87 = arith.addf %85, %86 : vector<2x32xf32>
    %88 = math.tanh %87 : vector<2x32xf32>
    %89 = arith.mulf %82, %88 : vector<2x32xf32>
    %c0_25 = arith.constant 0 : index
    %c6 = arith.constant 6 : index
    %c0_26 = arith.constant 0 : index
    %90 = vector.load %arg16[%c0_25, %c6, %c0_26] : memref<2x16x32xf32, #tpu.memory_space<vmem>>, vector<1x2x32xf32>
    %91 = vector.shape_cast %90 : vector<1x2x32xf32> to vector<2x32xf32>
    %92 = vector.shape_cast %89 : vector<2x32xf32> to vector<1x2x32xf32>
    tpu.vector_store %arg16[%c0_25, %c6, %c0_26], %92 {strides = array<i32>} : memref<2x16x32xf32, #tpu.memory_space<vmem>>, vector<1x2x32xf32>,
    %93 = vector.extract_strided_slice %6 {offsets = [8, 0], sizes = [2, 128], strides = [1, 1]} : vector<16x256xf32> to vector<2x128xf32>
    %cst_27 = arith.constant dense<0.000000e+00> : vector<2x128xf32>
    %94 = tpu.matmul %89, %7, %cst_27 {dimension_numbers = #tpu.dot_dimension_numbers<[1], [0], [0], [1], [0, 0, 1, 1], [], []>} : vector<2x32xf32>, vector<32x128xf32>, vector<2x128xf32> -> vector<2x128xf32>
    %95 = arith.addf %93, %94 : vector<2x128xf32>
    %96 = arith.negf %95 : vector<2x128xf32>
    %97 = math.exp %96 : vector<2x128xf32>
    %cst_28 = arith.constant 1.000000e+00 : f32
    %98 = vector.broadcast %cst_28 : f32 to vector<2x128xf32>
    %99 = arith.addf %98, %97 : vector<2x128xf32>
    %100 = arith.divf %98, %99 : vector<2x128xf32>
    %101 = vector.extract_strided_slice %100 {offsets = [0, 0], sizes = [2, 32], strides = [1, 1]} : vector<2x128xf32> to vector<2x32xf32>
    %102 = vector.extract_strided_slice %100 {offsets = [0, 32], sizes = [2, 32], strides = [1, 1]} : vector<2x128xf32> to vector<2x32xf32>
    %103 = vector.extract_strided_slice %100 {offsets = [0, 96], sizes = [2, 32], strides = [1, 1]} : vector<2x128xf32> to vector<2x32xf32>
    %104 = vector.extract_strided_slice %95 {offsets = [0, 64], sizes = [2, 32], strides = [1, 1]} : vector<2x128xf32> to vector<2x32xf32>
    %105 = math.tanh %104 : vector<2x32xf32>
    %106 = arith.mulf %102, %87 : vector<2x32xf32>
    %107 = arith.mulf %101, %105 : vector<2x32xf32>
    %108 = arith.addf %106, %107 : vector<2x32xf32>
    %109 = math.tanh %108 : vector<2x32xf32>
    %110 = arith.mulf %103, %109 : vector<2x32xf32>
    %c0_29 = arith.constant 0 : index
    %c8 = arith.constant 8 : index
    %c0_30 = arith.constant 0 : index
    %111 = vector.load %arg16[%c0_29, %c8, %c0_30] : memref<2x16x32xf32, #tpu.memory_space<vmem>>, vector<1x2x32xf32>
    %112 = vector.shape_cast %111 : vector<1x2x32xf32> to vector<2x32xf32>
    %113 = vector.shape_cast %110 : vector<2x32xf32> to vector<1x2x32xf32>
    tpu.vector_store %arg16[%c0_29, %c8, %c0_30], %113 {strides = array<i32>} : memref<2x16x32xf32, #tpu.memory_space<vmem>>, vector<1x2x32xf32>,
    %114 = vector.extract_strided_slice %6 {offsets = [10, 0], sizes = [2, 128], strides = [1, 1]} : vector<16x256xf32> to vector<2x128xf32>
    %cst_31 = arith.constant dense<0.000000e+00> : vector<2x128xf32>
    %115 = tpu.matmul %110, %7, %cst_31 {dimension_numbers = #tpu.dot_dimension_numbers<[1], [0], [0], [1], [0, 0, 1, 1], [], []>} : vector<2x32xf32>, vector<32x128xf32>, vector<2x128xf32> -> vector<2x128xf32>
    %116 = arith.addf %114, %115 : vector<2x128xf32>
    %117 = arith.negf %116 : vector<2x128xf32>
    %118 = math.exp %117 : vector<2x128xf32>
    %cst_32 = arith.constant 1.000000e+00 : f32
    %119 = vector.broadcast %cst_32 : f32 to vector<2x128xf32>
    %120 = arith.addf %119, %118 : vector<2x128xf32>
    %121 = arith.divf %119, %120 : vector<2x128xf32>
    %122 = vector.extract_strided_slice %121 {offsets = [0, 0], sizes = [2, 32], strides = [1, 1]} : vector<2x128xf32> to vector<2x32xf32>
    %123 = vector.extract_strided_slice %121 {offsets = [0, 32], sizes = [2, 32], strides = [1, 1]} : vector<2x128xf32> to vector<2x32xf32>
    %124 = vector.extract_strided_slice %121 {offsets = [0, 96], sizes = [2, 32], strides = [1, 1]} : vector<2x128xf32> to vector<2x32xf32>
    %125 = vector.extract_strided_slice %116 {offsets = [0, 64], sizes = [2, 32], strides = [1, 1]} : vector<2x128xf32> to vector<2x32xf32>
    %126 = math.tanh %125 : vector<2x32xf32>
    %127 = arith.mulf %123, %108 : vector<2x32xf32>
    %128 = arith.mulf %122, %126 : vector<2x32xf32>
    %129 = arith.addf %127, %128 : vector<2x32xf32>
    %130 = math.tanh %129 : vector<2x32xf32>
    %131 = arith.mulf %124, %130 : vector<2x32xf32>
    %c0_33 = arith.constant 0 : index
    %c10 = arith.constant 10 : index
    %c0_34 = arith.constant 0 : index
    %132 = vector.load %arg16[%c0_33, %c10, %c0_34] : memref<2x16x32xf32, #tpu.memory_space<vmem>>, vector<1x2x32xf32>
    %133 = vector.shape_cast %132 : vector<1x2x32xf32> to vector<2x32xf32>
    %134 = vector.shape_cast %131 : vector<2x32xf32> to vector<1x2x32xf32>
    tpu.vector_store %arg16[%c0_33, %c10, %c0_34], %134 {strides = array<i32>} : memref<2x16x32xf32, #tpu.memory_space<vmem>>, vector<1x2x32xf32>,
    %135 = vector.extract_strided_slice %6 {offsets = [12, 0], sizes = [2, 128], strides = [1, 1]} : vector<16x256xf32> to vector<2x128xf32>
    %cst_35 = arith.constant dense<0.000000e+00> : vector<2x128xf32>
    %136 = tpu.matmul %131, %7, %cst_35 {dimension_numbers = #tpu.dot_dimension_numbers<[1], [0], [0], [1], [0, 0, 1, 1], [], []>} : vector<2x32xf32>, vector<32x128xf32>, vector<2x128xf32> -> vector<2x128xf32>
    %137 = arith.addf %135, %136 : vector<2x128xf32>
    %138 = arith.negf %137 : vector<2x128xf32>
    %139 = math.exp %138 : vector<2x128xf32>
    %cst_36 = arith.constant 1.000000e+00 : f32
    %140 = vector.broadcast %cst_36 : f32 to vector<2x128xf32>
    %141 = arith.addf %140, %139 : vector<2x128xf32>
    %142 = arith.divf %140, %141 : vector<2x128xf32>
    %143 = vector.extract_strided_slice %142 {offsets = [0, 0], sizes = [2, 32], strides = [1, 1]} : vector<2x128xf32> to vector<2x32xf32>
    %144 = vector.extract_strided_slice %142 {offsets = [0, 32], sizes = [2, 32], strides = [1, 1]} : vector<2x128xf32> to vector<2x32xf32>
    %145 = vector.extract_strided_slice %142 {offsets = [0, 96], sizes = [2, 32], strides = [1, 1]} : vector<2x128xf32> to vector<2x32xf32>
    %146 = vector.extract_strided_slice %137 {offsets = [0, 64], sizes = [2, 32], strides = [1, 1]} : vector<2x128xf32> to vector<2x32xf32>
    %147 = math.tanh %146 : vector<2x32xf32>
    %148 = arith.mulf %144, %129 : vector<2x32xf32>
    %149 = arith.mulf %143, %147 : vector<2x32xf32>
    %150 = arith.addf %148, %149 : vector<2x32xf32>
    %151 = math.tanh %150 : vector<2x32xf32>
    %152 = arith.mulf %145, %151 : vector<2x32xf32>
    %c0_37 = arith.constant 0 : index
    %c12 = arith.constant 12 : index
    %c0_38 = arith.constant 0 : index
    %153 = vector.load %arg16[%c0_37, %c12, %c0_38] : memref<2x16x32xf32, #tpu.memory_space<vmem>>, vector<1x2x32xf32>
    %154 = vector.shape_cast %153 : vector<1x2x32xf32> to vector<2x32xf32>
    %155 = vector.shape_cast %152 : vector<2x32xf32> to vector<1x2x32xf32>
    tpu.vector_store %arg16[%c0_37, %c12, %c0_38], %155 {strides = array<i32>} : memref<2x16x32xf32, #tpu.memory_space<vmem>>, vector<1x2x32xf32>,
    %156 = vector.extract_strided_slice %6 {offsets = [14, 0], sizes = [2, 128], strides = [1, 1]} : vector<16x256xf32> to vector<2x128xf32>
    %cst_39 = arith.constant dense<0.000000e+00> : vector<2x128xf32>
    %157 = tpu.matmul %152, %7, %cst_39 {dimension_numbers = #tpu.dot_dimension_numbers<[1], [0], [0], [1], [0, 0, 1, 1], [], []>} : vector<2x32xf32>, vector<32x128xf32>, vector<2x128xf32> -> vector<2x128xf32>
    %158 = arith.addf %156, %157 : vector<2x128xf32>
    %159 = arith.negf %158 : vector<2x128xf32>
    %160 = math.exp %159 : vector<2x128xf32>
    %cst_40 = arith.constant 1.000000e+00 : f32
    %161 = vector.broadcast %cst_40 : f32 to vector<2x128xf32>
    %162 = arith.addf %161, %160 : vector<2x128xf32>
    %163 = arith.divf %161, %162 : vector<2x128xf32>
    %164 = vector.extract_strided_slice %163 {offsets = [0, 0], sizes = [2, 32], strides = [1, 1]} : vector<2x128xf32> to vector<2x32xf32>
    %165 = vector.extract_strided_slice %163 {offsets = [0, 32], sizes = [2, 32], strides = [1, 1]} : vector<2x128xf32> to vector<2x32xf32>
    %166 = vector.extract_strided_slice %163 {offsets = [0, 96], sizes = [2, 32], strides = [1, 1]} : vector<2x128xf32> to vector<2x32xf32>
    %167 = vector.extract_strided_slice %158 {offsets = [0, 64], sizes = [2, 32], strides = [1, 1]} : vector<2x128xf32> to vector<2x32xf32>
    %168 = math.tanh %167 : vector<2x32xf32>
    %169 = arith.mulf %165, %150 : vector<2x32xf32>
    %170 = arith.mulf %164, %168 : vector<2x32xf32>
    %171 = arith.addf %169, %170 : vector<2x32xf32>
    %172 = math.tanh %171 : vector<2x32xf32>
    %173 = arith.mulf %166, %172 : vector<2x32xf32>
    %c0_41 = arith.constant 0 : index
    %c14 = arith.constant 14 : index
    %c0_42 = arith.constant 0 : index
    %174 = vector.load %arg16[%c0_41, %c14, %c0_42] : memref<2x16x32xf32, #tpu.memory_space<vmem>>, vector<1x2x32xf32>
    %175 = vector.shape_cast %174 : vector<1x2x32xf32> to vector<2x32xf32>
    %176 = vector.shape_cast %173 : vector<2x32xf32> to vector<1x2x32xf32>
    tpu.vector_store %arg16[%c0_41, %c14, %c0_42], %176 {strides = array<i32>} : memref<2x16x32xf32, #tpu.memory_space<vmem>>, vector<1x2x32xf32>,
    %177 = vector.extract_strided_slice %6 {offsets = [14, 128], sizes = [2, 128], strides = [1, 1]} : vector<16x256xf32> to vector<2x128xf32>
    %cst_43 = arith.constant dense<0.000000e+00> : vector<2x128xf32>
    %178 = tpu.matmul %0, %8, %cst_43 {dimension_numbers = #tpu.dot_dimension_numbers<[1], [0], [0], [1], [0, 0, 1, 1], [], []>} : vector<2x32xf32>, vector<32x128xf32>, vector<2x128xf32> -> vector<2x128xf32>
    %179 = arith.addf %177, %178 : vector<2x128xf32>
    %180 = arith.negf %179 : vector<2x128xf32>
    %181 = math.exp %180 : vector<2x128xf32>
    %cst_44 = arith.constant 1.000000e+00 : f32
    %182 = vector.broadcast %cst_44 : f32 to vector<2x128xf32>
    %183 = arith.addf %182, %181 : vector<2x128xf32>
    %184 = arith.divf %182, %183 : vector<2x128xf32>
    %185 = vector.extract_strided_slice %184 {offsets = [0, 0], sizes = [2, 32], strides = [1, 1]} : vector<2x128xf32> to vector<2x32xf32>
    %186 = vector.extract_strided_slice %184 {offsets = [0, 32], sizes = [2, 32], strides = [1, 1]} : vector<2x128xf32> to vector<2x32xf32>
    %187 = vector.extract_strided_slice %184 {offsets = [0, 96], sizes = [2, 32], strides = [1, 1]} : vector<2x128xf32> to vector<2x32xf32>
    %188 = vector.extract_strided_slice %179 {offsets = [0, 64], sizes = [2, 32], strides = [1, 1]} : vector<2x128xf32> to vector<2x32xf32>
    %189 = math.tanh %188 : vector<2x32xf32>
    %190 = arith.mulf %186, %0 : vector<2x32xf32>
    %191 = arith.mulf %185, %189 : vector<2x32xf32>
    %192 = arith.addf %190, %191 : vector<2x32xf32>
    %193 = math.tanh %192 : vector<2x32xf32>
    %194 = arith.mulf %187, %193 : vector<2x32xf32>
    %c1 = arith.constant 1 : index
    %c14_45 = arith.constant 14 : index
    %c0_46 = arith.constant 0 : index
    %195 = vector.load %arg16[%c1, %c14_45, %c0_46] : memref<2x16x32xf32, #tpu.memory_space<vmem>>, vector<1x2x32xf32>
    %196 = vector.shape_cast %195 : vector<1x2x32xf32> to vector<2x32xf32>
    %197 = vector.shape_cast %194 : vector<2x32xf32> to vector<1x2x32xf32>
    tpu.vector_store %arg16[%c1, %c14_45, %c0_46], %197 {strides = array<i32>} : memref<2x16x32xf32, #tpu.memory_space<vmem>>, vector<1x2x32xf32>,
    %198 = vector.extract_strided_slice %6 {offsets = [12, 128], sizes = [2, 128], strides = [1, 1]} : vector<16x256xf32> to vector<2x128xf32>
    %cst_47 = arith.constant dense<0.000000e+00> : vector<2x128xf32>
    %199 = tpu.matmul %194, %8, %cst_47 {dimension_numbers = #tpu.dot_dimension_numbers<[1], [0], [0], [1], [0, 0, 1, 1], [], []>} : vector<2x32xf32>, vector<32x128xf32>, vector<2x128xf32> -> vector<2x128xf32>
    %200 = arith.addf %198, %199 : vector<2x128xf32>
    %201 = arith.negf %200 : vector<2x128xf32>
    %202 = math.exp %201 : vector<2x128xf32>
    %cst_48 = arith.constant 1.000000e+00 : f32
    %203 = vector.broadcast %cst_48 : f32 to vector<2x128xf32>
    %204 = arith.addf %203, %202 : vector<2x128xf32>
    %205 = arith.divf %203, %204 : vector<2x128xf32>
    %206 = vector.extract_strided_slice %205 {offsets = [0, 0], sizes = [2, 32], strides = [1, 1]} : vector<2x128xf32> to vector<2x32xf32>
    %207 = vector.extract_strided_slice %205 {offsets = [0, 32], sizes = [2, 32], strides = [1, 1]} : vector<2x128xf32> to vector<2x32xf32>
    %208 = vector.extract_strided_slice %205 {offsets = [0, 96], sizes = [2, 32], strides = [1, 1]} : vector<2x128xf32> to vector<2x32xf32>
    %209 = vector.extract_strided_slice %200 {offsets = [0, 64], sizes = [2, 32], strides = [1, 1]} : vector<2x128xf32> to vector<2x32xf32>
    %210 = math.tanh %209 : vector<2x32xf32>
    %211 = arith.mulf %207, %192 : vector<2x32xf32>
    %212 = arith.mulf %206, %210 : vector<2x32xf32>
    %213 = arith.addf %211, %212 : vector<2x32xf32>
    %214 = math.tanh %213 : vector<2x32xf32>
    %215 = arith.mulf %208, %214 : vector<2x32xf32>
    %c1_49 = arith.constant 1 : index
    %c12_50 = arith.constant 12 : index
    %c0_51 = arith.constant 0 : index
    %216 = vector.load %arg16[%c1_49, %c12_50, %c0_51] : memref<2x16x32xf32, #tpu.memory_space<vmem>>, vector<1x2x32xf32>
    %217 = vector.shape_cast %216 : vector<1x2x32xf32> to vector<2x32xf32>
    %218 = vector.shape_cast %215 : vector<2x32xf32> to vector<1x2x32xf32>
    tpu.vector_store %arg16[%c1_49, %c12_50, %c0_51], %218 {strides = array<i32>} : memref<2x16x32xf32, #tpu.memory_space<vmem>>, vector<1x2x32xf32>,
    %219 = vector.extract_strided_slice %6 {offsets = [10, 128], sizes = [2, 128], strides = [1, 1]} : vector<16x256xf32> to vector<2x128xf32>
    %cst_52 = arith.constant dense<0.000000e+00> : vector<2x128xf32>
    %220 = tpu.matmul %215, %8, %cst_52 {dimension_numbers = #tpu.dot_dimension_numbers<[1], [0], [0], [1], [0, 0, 1, 1], [], []>} : vector<2x32xf32>, vector<32x128xf32>, vector<2x128xf32> -> vector<2x128xf32>
    %221 = arith.addf %219, %220 : vector<2x128xf32>
    %222 = arith.negf %221 : vector<2x128xf32>
    %223 = math.exp %222 : vector<2x128xf32>
    %cst_53 = arith.constant 1.000000e+00 : f32
    %224 = vector.broadcast %cst_53 : f32 to vector<2x128xf32>
    %225 = arith.addf %224, %223 : vector<2x128xf32>
    %226 = arith.divf %224, %225 : vector<2x128xf32>
    %227 = vector.extract_strided_slice %226 {offsets = [0, 0], sizes = [2, 32], strides = [1, 1]} : vector<2x128xf32> to vector<2x32xf32>
    %228 = vector.extract_strided_slice %226 {offsets = [0, 32], sizes = [2, 32], strides = [1, 1]} : vector<2x128xf32> to vector<2x32xf32>
    %229 = vector.extract_strided_slice %226 {offsets = [0, 96], sizes = [2, 32], strides = [1, 1]} : vector<2x128xf32> to vector<2x32xf32>
    %230 = vector.extract_strided_slice %221 {offsets = [0, 64], sizes = [2, 32], strides = [1, 1]} : vector<2x128xf32> to vector<2x32xf32>
    %231 = math.tanh %230 : vector<2x32xf32>
    %232 = arith.mulf %228, %213 : vector<2x32xf32>
    %233 = arith.mulf %227, %231 : vector<2x32xf32>
    %234 = arith.addf %232, %233 : vector<2x32xf32>
    %235 = math.tanh %234 : vector<2x32xf32>
    %236 = arith.mulf %229, %235 : vector<2x32xf32>
    %c1_54 = arith.constant 1 : index
    %c10_55 = arith.constant 10 : index
    %c0_56 = arith.constant 0 : index
    %237 = vector.load %arg16[%c1_54, %c10_55, %c0_56] : memref<2x16x32xf32, #tpu.memory_space<vmem>>, vector<1x2x32xf32>
    %238 = vector.shape_cast %237 : vector<1x2x32xf32> to vector<2x32xf32>
    %239 = vector.shape_cast %236 : vector<2x32xf32> to vector<1x2x32xf32>
    tpu.vector_store %arg16[%c1_54, %c10_55, %c0_56], %239 {strides = array<i32>} : memref<2x16x32xf32, #tpu.memory_space<vmem>>, vector<1x2x32xf32>,
    %240 = vector.extract_strided_slice %6 {offsets = [8, 128], sizes = [2, 128], strides = [1, 1]} : vector<16x256xf32> to vector<2x128xf32>
    %cst_57 = arith.constant dense<0.000000e+00> : vector<2x128xf32>
    %241 = tpu.matmul %236, %8, %cst_57 {dimension_numbers = #tpu.dot_dimension_numbers<[1], [0], [0], [1], [0, 0, 1, 1], [], []>} : vector<2x32xf32>, vector<32x128xf32>, vector<2x128xf32> -> vector<2x128xf32>
    %242 = arith.addf %240, %241 : vector<2x128xf32>
    %243 = arith.negf %242 : vector<2x128xf32>
    %244 = math.exp %243 : vector<2x128xf32>
    %cst_58 = arith.constant 1.000000e+00 : f32
    %245 = vector.broadcast %cst_58 : f32 to vector<2x128xf32>
    %246 = arith.addf %245, %244 : vector<2x128xf32>
    %247 = arith.divf %245, %246 : vector<2x128xf32>
    %248 = vector.extract_strided_slice %247 {offsets = [0, 0], sizes = [2, 32], strides = [1, 1]} : vector<2x128xf32> to vector<2x32xf32>
    %249 = vector.extract_strided_slice %247 {offsets = [0, 32], sizes = [2, 32], strides = [1, 1]} : vector<2x128xf32> to vector<2x32xf32>
    %250 = vector.extract_strided_slice %247 {offsets = [0, 96], sizes = [2, 32], strides = [1, 1]} : vector<2x128xf32> to vector<2x32xf32>
    %251 = vector.extract_strided_slice %242 {offsets = [0, 64], sizes = [2, 32], strides = [1, 1]} : vector<2x128xf32> to vector<2x32xf32>
    %252 = math.tanh %251 : vector<2x32xf32>
    %253 = arith.mulf %249, %234 : vector<2x32xf32>
    %254 = arith.mulf %248, %252 : vector<2x32xf32>
    %255 = arith.addf %253, %254 : vector<2x32xf32>
    %256 = math.tanh %255 : vector<2x32xf32>
    %257 = arith.mulf %250, %256 : vector<2x32xf32>
    %c1_59 = arith.constant 1 : index
    %c8_60 = arith.constant 8 : index
    %c0_61 = arith.constant 0 : index
    %258 = vector.load %arg16[%c1_59, %c8_60, %c0_61] : memref<2x16x32xf32, #tpu.memory_space<vmem>>, vector<1x2x32xf32>
    %259 = vector.shape_cast %258 : vector<1x2x32xf32> to vector<2x32xf32>
    %260 = vector.shape_cast %257 : vector<2x32xf32> to vector<1x2x32xf32>
    tpu.vector_store %arg16[%c1_59, %c8_60, %c0_61], %260 {strides = array<i32>} : memref<2x16x32xf32, #tpu.memory_space<vmem>>, vector<1x2x32xf32>,
    %261 = vector.extract_strided_slice %6 {offsets = [6, 128], sizes = [2, 128], strides = [1, 1]} : vector<16x256xf32> to vector<2x128xf32>
    %cst_62 = arith.constant dense<0.000000e+00> : vector<2x128xf32>
    %262 = tpu.matmul %257, %8, %cst_62 {dimension_numbers = #tpu.dot_dimension_numbers<[1], [0], [0], [1], [0, 0, 1, 1], [], []>} : vector<2x32xf32>, vector<32x128xf32>, vector<2x128xf32> -> vector<2x128xf32>
    %263 = arith.addf %261, %262 : vector<2x128xf32>
    %264 = arith.negf %263 : vector<2x128xf32>
    %265 = math.exp %264 : vector<2x128xf32>
    %cst_63 = arith.constant 1.000000e+00 : f32
    %266 = vector.broadcast %cst_63 : f32 to vector<2x128xf32>
    %267 = arith.addf %266, %265 : vector<2x128xf32>
    %268 = arith.divf %266, %267 : vector<2x128xf32>
    %269 = vector.extract_strided_slice %268 {offsets = [0, 0], sizes = [2, 32], strides = [1, 1]} : vector<2x128xf32> to vector<2x32xf32>
    %270 = vector.extract_strided_slice %268 {offsets = [0, 32], sizes = [2, 32], strides = [1, 1]} : vector<2x128xf32> to vector<2x32xf32>
    %271 = vector.extract_strided_slice %268 {offsets = [0, 96], sizes = [2, 32], strides = [1, 1]} : vector<2x128xf32> to vector<2x32xf32>
    %272 = vector.extract_strided_slice %263 {offsets = [0, 64], sizes = [2, 32], strides = [1, 1]} : vector<2x128xf32> to vector<2x32xf32>
    %273 = math.tanh %272 : vector<2x32xf32>
    %274 = arith.mulf %270, %255 : vector<2x32xf32>
    %275 = arith.mulf %269, %273 : vector<2x32xf32>
    %276 = arith.addf %274, %275 : vector<2x32xf32>
    %277 = math.tanh %276 : vector<2x32xf32>
    %278 = arith.mulf %271, %277 : vector<2x32xf32>
    %c1_64 = arith.constant 1 : index
    %c6_65 = arith.constant 6 : index
    %c0_66 = arith.constant 0 : index
    %279 = vector.load %arg16[%c1_64, %c6_65, %c0_66] : memref<2x16x32xf32, #tpu.memory_space<vmem>>, vector<1x2x32xf32>
    %280 = vector.shape_cast %279 : vector<1x2x32xf32> to vector<2x32xf32>
    %281 = vector.shape_cast %278 : vector<2x32xf32> to vector<1x2x32xf32>
    tpu.vector_store %arg16[%c1_64, %c6_65, %c0_66], %281 {strides = array<i32>} : memref<2x16x32xf32, #tpu.memory_space<vmem>>, vector<1x2x32xf32>,
    %282 = vector.extract_strided_slice %6 {offsets = [4, 128], sizes = [2, 128], strides = [1, 1]} : vector<16x256xf32> to vector<2x128xf32>
    %cst_67 = arith.constant dense<0.000000e+00> : vector<2x128xf32>
    %283 = tpu.matmul %278, %8, %cst_67 {dimension_numbers = #tpu.dot_dimension_numbers<[1], [0], [0], [1], [0, 0, 1, 1], [], []>} : vector<2x32xf32>, vector<32x128xf32>, vector<2x128xf32> -> vector<2x128xf32>
    %284 = arith.addf %282, %283 : vector<2x128xf32>
    %285 = arith.negf %284 : vector<2x128xf32>
    %286 = math.exp %285 : vector<2x128xf32>
    %cst_68 = arith.constant 1.000000e+00 : f32
    %287 = vector.broadcast %cst_68 : f32 to vector<2x128xf32>
    %288 = arith.addf %287, %286 : vector<2x128xf32>
    %289 = arith.divf %287, %288 : vector<2x128xf32>
    %290 = vector.extract_strided_slice %289 {offsets = [0, 0], sizes = [2, 32], strides = [1, 1]} : vector<2x128xf32> to vector<2x32xf32>
    %291 = vector.extract_strided_slice %289 {offsets = [0, 32], sizes = [2, 32], strides = [1, 1]} : vector<2x128xf32> to vector<2x32xf32>
    %292 = vector.extract_strided_slice %289 {offsets = [0, 96], sizes = [2, 32], strides = [1, 1]} : vector<2x128xf32> to vector<2x32xf32>
    %293 = vector.extract_strided_slice %284 {offsets = [0, 64], sizes = [2, 32], strides = [1, 1]} : vector<2x128xf32> to vector<2x32xf32>
    %294 = math.tanh %293 : vector<2x32xf32>
    %295 = arith.mulf %291, %276 : vector<2x32xf32>
    %296 = arith.mulf %290, %294 : vector<2x32xf32>
    %297 = arith.addf %295, %296 : vector<2x32xf32>
    %298 = math.tanh %297 : vector<2x32xf32>
    %299 = arith.mulf %292, %298 : vector<2x32xf32>
    %c1_69 = arith.constant 1 : index
    %c4_70 = arith.constant 4 : index
    %c0_71 = arith.constant 0 : index
    %300 = vector.load %arg16[%c1_69, %c4_70, %c0_71] : memref<2x16x32xf32, #tpu.memory_space<vmem>>, vector<1x2x32xf32>
    %301 = vector.shape_cast %300 : vector<1x2x32xf32> to vector<2x32xf32>
    %302 = vector.shape_cast %299 : vector<2x32xf32> to vector<1x2x32xf32>
    tpu.vector_store %arg16[%c1_69, %c4_70, %c0_71], %302 {strides = array<i32>} : memref<2x16x32xf32, #tpu.memory_space<vmem>>, vector<1x2x32xf32>,
    %303 = vector.extract_strided_slice %6 {offsets = [2, 128], sizes = [2, 128], strides = [1, 1]} : vector<16x256xf32> to vector<2x128xf32>
    %cst_72 = arith.constant dense<0.000000e+00> : vector<2x128xf32>
    %304 = tpu.matmul %299, %8, %cst_72 {dimension_numbers = #tpu.dot_dimension_numbers<[1], [0], [0], [1], [0, 0, 1, 1], [], []>} : vector<2x32xf32>, vector<32x128xf32>, vector<2x128xf32> -> vector<2x128xf32>
    %305 = arith.addf %303, %304 : vector<2x128xf32>
    %306 = arith.negf %305 : vector<2x128xf32>
    %307 = math.exp %306 : vector<2x128xf32>
    %cst_73 = arith.constant 1.000000e+00 : f32
    %308 = vector.broadcast %cst_73 : f32 to vector<2x128xf32>
    %309 = arith.addf %308, %307 : vector<2x128xf32>
    %310 = arith.divf %308, %309 : vector<2x128xf32>
    %311 = vector.extract_strided_slice %310 {offsets = [0, 0], sizes = [2, 32], strides = [1, 1]} : vector<2x128xf32> to vector<2x32xf32>
    %312 = vector.extract_strided_slice %310 {offsets = [0, 32], sizes = [2, 32], strides = [1, 1]} : vector<2x128xf32> to vector<2x32xf32>
    %313 = vector.extract_strided_slice %310 {offsets = [0, 96], sizes = [2, 32], strides = [1, 1]} : vector<2x128xf32> to vector<2x32xf32>
    %314 = vector.extract_strided_slice %305 {offsets = [0, 64], sizes = [2, 32], strides = [1, 1]} : vector<2x128xf32> to vector<2x32xf32>
    %315 = math.tanh %314 : vector<2x32xf32>
    %316 = arith.mulf %312, %297 : vector<2x32xf32>
    %317 = arith.mulf %311, %315 : vector<2x32xf32>
    %318 = arith.addf %316, %317 : vector<2x32xf32>
    %319 = math.tanh %318 : vector<2x32xf32>
    %320 = arith.mulf %313, %319 : vector<2x32xf32>
    %c1_74 = arith.constant 1 : index
    %c2_75 = arith.constant 2 : index
    %c0_76 = arith.constant 0 : index
    %321 = vector.load %arg16[%c1_74, %c2_75, %c0_76] : memref<2x16x32xf32, #tpu.memory_space<vmem>>, vector<1x2x32xf32>
    %322 = vector.shape_cast %321 : vector<1x2x32xf32> to vector<2x32xf32>
    %323 = vector.shape_cast %320 : vector<2x32xf32> to vector<1x2x32xf32>
    tpu.vector_store %arg16[%c1_74, %c2_75, %c0_76], %323 {strides = array<i32>} : memref<2x16x32xf32, #tpu.memory_space<vmem>>, vector<1x2x32xf32>,
    %324 = vector.extract_strided_slice %6 {offsets = [0, 128], sizes = [2, 128], strides = [1, 1]} : vector<16x256xf32> to vector<2x128xf32>
    %cst_77 = arith.constant dense<0.000000e+00> : vector<2x128xf32>
    %325 = tpu.matmul %320, %8, %cst_77 {dimension_numbers = #tpu.dot_dimension_numbers<[1], [0], [0], [1], [0, 0, 1, 1], [], []>} : vector<2x32xf32>, vector<32x128xf32>, vector<2x128xf32> -> vector<2x128xf32>
    %326 = arith.addf %324, %325 : vector<2x128xf32>
    %327 = arith.negf %326 : vector<2x128xf32>
    %328 = math.exp %327 : vector<2x128xf32>
    %cst_78 = arith.constant 1.000000e+00 : f32
    %329 = vector.broadcast %cst_78 : f32 to vector<2x128xf32>
    %330 = arith.addf %329, %328 : vector<2x128xf32>
    %331 = arith.divf %329, %330 : vector<2x128xf32>
    %332 = vector.extract_strided_slice %331 {offsets = [0, 0], sizes = [2, 32], strides = [1, 1]} : vector<2x128xf32> to vector<2x32xf32>
    %333 = vector.extract_strided_slice %331 {offsets = [0, 32], sizes = [2, 32], strides = [1, 1]} : vector<2x128xf32> to vector<2x32xf32>
    %334 = vector.extract_strided_slice %331 {offsets = [0, 96], sizes = [2, 32], strides = [1, 1]} : vector<2x128xf32> to vector<2x32xf32>
    %335 = vector.extract_strided_slice %326 {offsets = [0, 64], sizes = [2, 32], strides = [1, 1]} : vector<2x128xf32> to vector<2x32xf32>
    %336 = math.tanh %335 : vector<2x32xf32>
    %337 = arith.mulf %333, %318 : vector<2x32xf32>
    %338 = arith.mulf %332, %336 : vector<2x32xf32>
    %339 = arith.addf %337, %338 : vector<2x32xf32>
    %340 = math.tanh %339 : vector<2x32xf32>
    %341 = arith.mulf %334, %340 : vector<2x32xf32>
    %c1_79 = arith.constant 1 : index
    %c0_80 = arith.constant 0 : index
    %c0_81 = arith.constant 0 : index
    %342 = vector.load %arg16[%c1_79, %c0_80, %c0_81] : memref<2x16x32xf32, #tpu.memory_space<vmem>>, vector<1x2x32xf32>
    %343 = vector.shape_cast %342 : vector<1x2x32xf32> to vector<2x32xf32>
    %344 = vector.shape_cast %341 : vector<2x32xf32> to vector<1x2x32xf32>
    tpu.vector_store %arg16[%c1_79, %c0_80, %c0_81], %344 {strides = array<i32>} : memref<2x16x32xf32, #tpu.memory_space<vmem>>, vector<1x2x32xf32>,
    %c0_82 = arith.constant 0 : index
    %c0_83 = arith.constant 0 : index
    %345 = vector.load %arg7[%c0_82, %c0_83] : memref<1x256xf32, #tpu.memory_space<vmem>>, vector<1x256xf32>
    %c0_84 = arith.constant 0 : index
    %c0_85 = arith.constant 0 : index
    %c0_86 = arith.constant 0 : index
    %346 = vector.load %arg16[%c0_84, %c0_85, %c0_86] : memref<2x16x32xf32, #tpu.memory_space<vmem>>, vector<1x16x32xf32>
    %347 = vector.shape_cast %346 : vector<1x16x32xf32> to vector<16x32xf32>
    %c1_87 = arith.constant 1 : index
    %c0_88 = arith.constant 0 : index
    %c0_89 = arith.constant 0 : index
    %348 = vector.load %arg16[%c1_87, %c0_88, %c0_89] : memref<2x16x32xf32, #tpu.memory_space<vmem>>, vector<1x16x32xf32>
    %349 = vector.shape_cast %348 : vector<1x16x32xf32> to vector<16x32xf32>
    %c0_90 = arith.constant 0 : index
    %c0_91 = arith.constant 0 : index
    %350 = vector.load %arg5[%c0_90, %c0_91] : memref<32x256xf32, #tpu.memory_space<vmem>>, vector<32x256xf32>
    %cst_92 = arith.constant dense<0.000000e+00> : vector<16x256xf32>
    %351 = tpu.matmul %347, %350, %cst_92 {dimension_numbers = #tpu.dot_dimension_numbers<[1], [0], [0], [1], [0, 0, 1, 1], [], []>} : vector<16x32xf32>, vector<32x256xf32>, vector<16x256xf32> -> vector<16x256xf32>
    %352 = vector.broadcast %345 : vector<1x256xf32> to vector<16x256xf32>
    %353 = arith.addf %352, %351 : vector<16x256xf32>
    %c0_93 = arith.constant 0 : index
    %c0_94 = arith.constant 0 : index
    %354 = vector.load %arg6[%c0_93, %c0_94] : memref<32x256xf32, #tpu.memory_space<vmem>>, vector<32x256xf32>
    %cst_95 = arith.constant dense<0.000000e+00> : vector<16x256xf32>
    %355 = tpu.matmul %349, %354, %cst_95 {dimension_numbers = #tpu.dot_dimension_numbers<[1], [0], [0], [1], [0, 0, 1, 1], [], []>} : vector<16x32xf32>, vector<32x256xf32>, vector<16x256xf32> -> vector<16x256xf32>
    %356 = arith.addf %353, %355 : vector<16x256xf32>
    %c0_96 = arith.constant 0 : index
    %c0_97 = arith.constant 0 : index
    %357 = vector.load %arg8[%c0_96, %c0_97] : memref<32x128xf32, #tpu.memory_space<vmem>>, vector<32x128xf32>
    %358 = vector.extract_strided_slice %356 {offsets = [0, 0], sizes = [2, 128], strides = [1, 1]} : vector<16x256xf32> to vector<2x128xf32>
    %cst_98 = arith.constant dense<0.000000e+00> : vector<2x128xf32>
    %359 = tpu.matmul %0, %357, %cst_98 {dimension_numbers = #tpu.dot_dimension_numbers<[1], [0], [0], [1], [0, 0, 1, 1], [], []>} : vector<2x32xf32>, vector<32x128xf32>, vector<2x128xf32> -> vector<2x128xf32>
    %360 = arith.addf %358, %359 : vector<2x128xf32>
    %361 = arith.negf %360 : vector<2x128xf32>
    %362 = math.exp %361 : vector<2x128xf32>
    %cst_99 = arith.constant 1.000000e+00 : f32
    %363 = vector.broadcast %cst_99 : f32 to vector<2x128xf32>
    %364 = arith.addf %363, %362 : vector<2x128xf32>
    %365 = arith.divf %363, %364 : vector<2x128xf32>
    %366 = vector.extract_strided_slice %365 {offsets = [0, 0], sizes = [2, 32], strides = [1, 1]} : vector<2x128xf32> to vector<2x32xf32>
    %367 = vector.extract_strided_slice %365 {offsets = [0, 32], sizes = [2, 32], strides = [1, 1]} : vector<2x128xf32> to vector<2x32xf32>
    %368 = vector.extract_strided_slice %365 {offsets = [0, 96], sizes = [2, 32], strides = [1, 1]} : vector<2x128xf32> to vector<2x32xf32>
    %369 = vector.extract_strided_slice %360 {offsets = [0, 64], sizes = [2, 32], strides = [1, 1]} : vector<2x128xf32> to vector<2x32xf32>
    %370 = math.tanh %369 : vector<2x32xf32>
    %371 = arith.mulf %367, %0 : vector<2x32xf32>
    %372 = arith.mulf %366, %370 : vector<2x32xf32>
    %373 = arith.addf %371, %372 : vector<2x32xf32>
    %374 = math.tanh %373 : vector<2x32xf32>
    %375 = arith.mulf %368, %374 : vector<2x32xf32>
    %376 = vector.extract_strided_slice %356 {offsets = [2, 0], sizes = [2, 128], strides = [1, 1]} : vector<16x256xf32> to vector<2x128xf32>
    %cst_100 = arith.constant dense<0.000000e+00> : vector<2x128xf32>
    %377 = tpu.matmul %375, %357, %cst_100 {dimension_numbers = #tpu.dot_dimension_numbers<[1], [0], [0], [1], [0, 0, 1, 1], [], []>} : vector<2x32xf32>, vector<32x128xf32>, vector<2x128xf32> -> vector<2x128xf32>
    %378 = arith.addf %376, %377 : vector<2x128xf32>
    %379 = arith.negf %378 : vector<2x128xf32>
    %380 = math.exp %379 : vector<2x128xf32>
    %cst_101 = arith.constant 1.000000e+00 : f32
    %381 = vector.broadcast %cst_101 : f32 to vector<2x128xf32>
    %382 = arith.addf %381, %380 : vector<2x128xf32>
    %383 = arith.divf %381, %382 : vector<2x128xf32>
    %384 = vector.extract_strided_slice %383 {offsets = [0, 0], sizes = [2, 32], strides = [1, 1]} : vector<2x128xf32> to vector<2x32xf32>
    %385 = vector.extract_strided_slice %383 {offsets = [0, 32], sizes = [2, 32], strides = [1, 1]} : vector<2x128xf32> to vector<2x32xf32>
    %386 = vector.extract_strided_slice %383 {offsets = [0, 96], sizes = [2, 32], strides = [1, 1]} : vector<2x128xf32> to vector<2x32xf32>
    %387 = vector.extract_strided_slice %378 {offsets = [0, 64], sizes = [2, 32], strides = [1, 1]} : vector<2x128xf32> to vector<2x32xf32>
    %388 = math.tanh %387 : vector<2x32xf32>
    %389 = arith.mulf %385, %373 : vector<2x32xf32>
    %390 = arith.mulf %384, %388 : vector<2x32xf32>
    %391 = arith.addf %389, %390 : vector<2x32xf32>
    %392 = math.tanh %391 : vector<2x32xf32>
    %393 = arith.mulf %386, %392 : vector<2x32xf32>
    %394 = vector.extract_strided_slice %356 {offsets = [4, 0], sizes = [2, 128], strides = [1, 1]} : vector<16x256xf32> to vector<2x128xf32>
    %cst_102 = arith.constant dense<0.000000e+00> : vector<2x128xf32>
    %395 = tpu.matmul %393, %357, %cst_102 {dimension_numbers = #tpu.dot_dimension_numbers<[1], [0], [0], [1], [0, 0, 1, 1], [], []>} : vector<2x32xf32>, vector<32x128xf32>, vector<2x128xf32> -> vector<2x128xf32>
    %396 = arith.addf %394, %395 : vector<2x128xf32>
    %397 = arith.negf %396 : vector<2x128xf32>
    %398 = math.exp %397 : vector<2x128xf32>
    %cst_103 = arith.constant 1.000000e+00 : f32
    %399 = vector.broadcast %cst_103 : f32 to vector<2x128xf32>
    %400 = arith.addf %399, %398 : vector<2x128xf32>
    %401 = arith.divf %399, %400 : vector<2x128xf32>
    %402 = vector.extract_strided_slice %401 {offsets = [0, 0], sizes = [2, 32], strides = [1, 1]} : vector<2x128xf32> to vector<2x32xf32>
    %403 = vector.extract_strided_slice %401 {offsets = [0, 32], sizes = [2, 32], strides = [1, 1]} : vector<2x128xf32> to vector<2x32xf32>
    %404 = vector.extract_strided_slice %401 {offsets = [0, 96], sizes = [2, 32], strides = [1, 1]} : vector<2x128xf32> to vector<2x32xf32>
    %405 = vector.extract_strided_slice %396 {offsets = [0, 64], sizes = [2, 32], strides = [1, 1]} : vector<2x128xf32> to vector<2x32xf32>
    %406 = math.tanh %405 : vector<2x32xf32>
    %407 = arith.mulf %403, %391 : vector<2x32xf32>
    %408 = arith.mulf %402, %406 : vector<2x32xf32>
    %409 = arith.addf %407, %408 : vector<2x32xf32>
    %410 = math.tanh %409 : vector<2x32xf32>
    %411 = arith.mulf %404, %410 : vector<2x32xf32>
    %412 = vector.extract_strided_slice %356 {offsets = [6, 0], sizes = [2, 128], strides = [1, 1]} : vector<16x256xf32> to vector<2x128xf32>
    %cst_104 = arith.constant dense<0.000000e+00> : vector<2x128xf32>
    %413 = tpu.matmul %411, %357, %cst_104 {dimension_numbers = #tpu.dot_dimension_numbers<[1], [0], [0], [1], [0, 0, 1, 1], [], []>} : vector<2x32xf32>, vector<32x128xf32>, vector<2x128xf32> -> vector<2x128xf32>
    %414 = arith.addf %412, %413 : vector<2x128xf32>
    %415 = arith.negf %414 : vector<2x128xf32>
    %416 = math.exp %415 : vector<2x128xf32>
    %cst_105 = arith.constant 1.000000e+00 : f32
    %417 = vector.broadcast %cst_105 : f32 to vector<2x128xf32>
    %418 = arith.addf %417, %416 : vector<2x128xf32>
    %419 = arith.divf %417, %418 : vector<2x128xf32>
    %420 = vector.extract_strided_slice %419 {offsets = [0, 0], sizes = [2, 32], strides = [1, 1]} : vector<2x128xf32> to vector<2x32xf32>
    %421 = vector.extract_strided_slice %419 {offsets = [0, 32], sizes = [2, 32], strides = [1, 1]} : vector<2x128xf32> to vector<2x32xf32>
    %422 = vector.extract_strided_slice %419 {offsets = [0, 96], sizes = [2, 32], strides = [1, 1]} : vector<2x128xf32> to vector<2x32xf32>
    %423 = vector.extract_strided_slice %414 {offsets = [0, 64], sizes = [2, 32], strides = [1, 1]} : vector<2x128xf32> to vector<2x32xf32>
    %424 = math.tanh %423 : vector<2x32xf32>
    %425 = arith.mulf %421, %409 : vector<2x32xf32>
    %426 = arith.mulf %420, %424 : vector<2x32xf32>
    %427 = arith.addf %425, %426 : vector<2x32xf32>
    %428 = math.tanh %427 : vector<2x32xf32>
    %429 = arith.mulf %422, %428 : vector<2x32xf32>
    %430 = vector.extract_strided_slice %356 {offsets = [8, 0], sizes = [2, 128], strides = [1, 1]} : vector<16x256xf32> to vector<2x128xf32>
    %cst_106 = arith.constant dense<0.000000e+00> : vector<2x128xf32>
    %431 = tpu.matmul %429, %357, %cst_106 {dimension_numbers = #tpu.dot_dimension_numbers<[1], [0], [0], [1], [0, 0, 1, 1], [], []>} : vector<2x32xf32>, vector<32x128xf32>, vector<2x128xf32> -> vector<2x128xf32>
    %432 = arith.addf %430, %431 : vector<2x128xf32>
    %433 = arith.negf %432 : vector<2x128xf32>
    %434 = math.exp %433 : vector<2x128xf32>
    %cst_107 = arith.constant 1.000000e+00 : f32
    %435 = vector.broadcast %cst_107 : f32 to vector<2x128xf32>
    %436 = arith.addf %435, %434 : vector<2x128xf32>
    %437 = arith.divf %435, %436 : vector<2x128xf32>
    %438 = vector.extract_strided_slice %437 {offsets = [0, 0], sizes = [2, 32], strides = [1, 1]} : vector<2x128xf32> to vector<2x32xf32>
    %439 = vector.extract_strided_slice %437 {offsets = [0, 32], sizes = [2, 32], strides = [1, 1]} : vector<2x128xf32> to vector<2x32xf32>
    %440 = vector.extract_strided_slice %437 {offsets = [0, 96], sizes = [2, 32], strides = [1, 1]} : vector<2x128xf32> to vector<2x32xf32>
    %441 = vector.extract_strided_slice %432 {offsets = [0, 64], sizes = [2, 32], strides = [1, 1]} : vector<2x128xf32> to vector<2x32xf32>
    %442 = math.tanh %441 : vector<2x32xf32>
    %443 = arith.mulf %439, %427 : vector<2x32xf32>
    %444 = arith.mulf %438, %442 : vector<2x32xf32>
    %445 = arith.addf %443, %444 : vector<2x32xf32>
    %446 = math.tanh %445 : vector<2x32xf32>
    %447 = arith.mulf %440, %446 : vector<2x32xf32>
    %448 = vector.extract_strided_slice %356 {offsets = [10, 0], sizes = [2, 128], strides = [1, 1]} : vector<16x256xf32> to vector<2x128xf32>
    %cst_108 = arith.constant dense<0.000000e+00> : vector<2x128xf32>
    %449 = tpu.matmul %447, %357, %cst_108 {dimension_numbers = #tpu.dot_dimension_numbers<[1], [0], [0], [1], [0, 0, 1, 1], [], []>} : vector<2x32xf32>, vector<32x128xf32>, vector<2x128xf32> -> vector<2x128xf32>
    %450 = arith.addf %448, %449 : vector<2x128xf32>
    %451 = arith.negf %450 : vector<2x128xf32>
    %452 = math.exp %451 : vector<2x128xf32>
    %cst_109 = arith.constant 1.000000e+00 : f32
    %453 = vector.broadcast %cst_109 : f32 to vector<2x128xf32>
    %454 = arith.addf %453, %452 : vector<2x128xf32>
    %455 = arith.divf %453, %454 : vector<2x128xf32>
    %456 = vector.extract_strided_slice %455 {offsets = [0, 0], sizes = [2, 32], strides = [1, 1]} : vector<2x128xf32> to vector<2x32xf32>
    %457 = vector.extract_strided_slice %455 {offsets = [0, 32], sizes = [2, 32], strides = [1, 1]} : vector<2x128xf32> to vector<2x32xf32>
    %458 = vector.extract_strided_slice %455 {offsets = [0, 96], sizes = [2, 32], strides = [1, 1]} : vector<2x128xf32> to vector<2x32xf32>
    %459 = vector.extract_strided_slice %450 {offsets = [0, 64], sizes = [2, 32], strides = [1, 1]} : vector<2x128xf32> to vector<2x32xf32>
    %460 = math.tanh %459 : vector<2x32xf32>
    %461 = arith.mulf %457, %445 : vector<2x32xf32>
    %462 = arith.mulf %456, %460 : vector<2x32xf32>
    %463 = arith.addf %461, %462 : vector<2x32xf32>
    %464 = math.tanh %463 : vector<2x32xf32>
    %465 = arith.mulf %458, %464 : vector<2x32xf32>
    %466 = vector.extract_strided_slice %356 {offsets = [12, 0], sizes = [2, 128], strides = [1, 1]} : vector<16x256xf32> to vector<2x128xf32>
    %cst_110 = arith.constant dense<0.000000e+00> : vector<2x128xf32>
    %467 = tpu.matmul %465, %357, %cst_110 {dimension_numbers = #tpu.dot_dimension_numbers<[1], [0], [0], [1], [0, 0, 1, 1], [], []>} : vector<2x32xf32>, vector<32x128xf32>, vector<2x128xf32> -> vector<2x128xf32>
    %468 = arith.addf %466, %467 : vector<2x128xf32>
    %469 = arith.negf %468 : vector<2x128xf32>
    %470 = math.exp %469 : vector<2x128xf32>
    %cst_111 = arith.constant 1.000000e+00 : f32
    %471 = vector.broadcast %cst_111 : f32 to vector<2x128xf32>
    %472 = arith.addf %471, %470 : vector<2x128xf32>
    %473 = arith.divf %471, %472 : vector<2x128xf32>
    %474 = vector.extract_strided_slice %473 {offsets = [0, 0], sizes = [2, 32], strides = [1, 1]} : vector<2x128xf32> to vector<2x32xf32>
    %475 = vector.extract_strided_slice %473 {offsets = [0, 32], sizes = [2, 32], strides = [1, 1]} : vector<2x128xf32> to vector<2x32xf32>
    %476 = vector.extract_strided_slice %473 {offsets = [0, 96], sizes = [2, 32], strides = [1, 1]} : vector<2x128xf32> to vector<2x32xf32>
    %477 = vector.extract_strided_slice %468 {offsets = [0, 64], sizes = [2, 32], strides = [1, 1]} : vector<2x128xf32> to vector<2x32xf32>
    %478 = math.tanh %477 : vector<2x32xf32>
    %479 = arith.mulf %475, %463 : vector<2x32xf32>
    %480 = arith.mulf %474, %478 : vector<2x32xf32>
    %481 = arith.addf %479, %480 : vector<2x32xf32>
    %482 = math.tanh %481 : vector<2x32xf32>
    %483 = arith.mulf %476, %482 : vector<2x32xf32>
    %484 = vector.extract_strided_slice %356 {offsets = [14, 0], sizes = [2, 128], strides = [1, 1]} : vector<16x256xf32> to vector<2x128xf32>
    %cst_112 = arith.constant dense<0.000000e+00> : vector<2x128xf32>
    %485 = tpu.matmul %483, %357, %cst_112 {dimension_numbers = #tpu.dot_dimension_numbers<[1], [0], [0], [1], [0, 0, 1, 1], [], []>} : vector<2x32xf32>, vector<32x128xf32>, vector<2x128xf32> -> vector<2x128xf32>
    %486 = arith.addf %484, %485 : vector<2x128xf32>
    %487 = arith.negf %486 : vector<2x128xf32>
    %488 = math.exp %487 : vector<2x128xf32>
    %cst_113 = arith.constant 1.000000e+00 : f32
    %489 = vector.broadcast %cst_113 : f32 to vector<2x128xf32>
    %490 = arith.addf %489, %488 : vector<2x128xf32>
    %491 = arith.divf %489, %490 : vector<2x128xf32>
    %492 = vector.extract_strided_slice %491 {offsets = [0, 0], sizes = [2, 32], strides = [1, 1]} : vector<2x128xf32> to vector<2x32xf32>
    %493 = vector.extract_strided_slice %491 {offsets = [0, 32], sizes = [2, 32], strides = [1, 1]} : vector<2x128xf32> to vector<2x32xf32>
    %494 = vector.extract_strided_slice %491 {offsets = [0, 96], sizes = [2, 32], strides = [1, 1]} : vector<2x128xf32> to vector<2x32xf32>
    %495 = vector.extract_strided_slice %486 {offsets = [0, 64], sizes = [2, 32], strides = [1, 1]} : vector<2x128xf32> to vector<2x32xf32>
    %496 = math.tanh %495 : vector<2x32xf32>
    %497 = arith.mulf %493, %481 : vector<2x32xf32>
    %498 = arith.mulf %492, %496 : vector<2x32xf32>
    %499 = arith.addf %497, %498 : vector<2x32xf32>
    %500 = math.tanh %499 : vector<2x32xf32>
    %501 = arith.mulf %494, %500 : vector<2x32xf32>
    %502 = vector.extract_strided_slice %356 {offsets = [14, 128], sizes = [2, 128], strides = [1, 1]} : vector<16x256xf32> to vector<2x128xf32>
    %503 = arith.negf %502 : vector<2x128xf32>
    %504 = math.exp %503 : vector<2x128xf32>
    %cst_114 = arith.constant 1.000000e+00 : f32
    %505 = vector.broadcast %cst_114 : f32 to vector<2x128xf32>
    %506 = arith.addf %505, %504 : vector<2x128xf32>
    %507 = arith.divf %505, %506 : vector<2x128xf32>
    %508 = vector.extract_strided_slice %507 {offsets = [0, 0], sizes = [2, 32], strides = [1, 1]} : vector<2x128xf32> to vector<2x32xf32>
    %509 = vector.extract_strided_slice %507 {offsets = [0, 32], sizes = [2, 32], strides = [1, 1]} : vector<2x128xf32> to vector<2x32xf32>
    %510 = vector.extract_strided_slice %507 {offsets = [0, 96], sizes = [2, 32], strides = [1, 1]} : vector<2x128xf32> to vector<2x32xf32>
    %511 = vector.extract_strided_slice %502 {offsets = [0, 64], sizes = [2, 32], strides = [1, 1]} : vector<2x128xf32> to vector<2x32xf32>
    %512 = math.tanh %511 : vector<2x32xf32>
    %513 = arith.mulf %509, %0 : vector<2x32xf32>
    %514 = arith.mulf %508, %512 : vector<2x32xf32>
    %515 = arith.addf %513, %514 : vector<2x32xf32>
    %516 = math.tanh %515 : vector<2x32xf32>
    %517 = arith.mulf %510, %516 : vector<2x32xf32>
    %c0_115 = arith.constant 0 : index
    %c0_116 = arith.constant 0 : index
    %518 = vector.load %arg10[%c0_115, %c0_116] : memref<32x32xf32, #tpu.memory_space<vmem>>, vector<32x32xf32>
    %cst_117 = arith.constant dense<0.000000e+00> : vector<2x32xf32>
    %519 = tpu.matmul %501, %518, %cst_117 {dimension_numbers = #tpu.dot_dimension_numbers<[1], [0], [0], [1], [0, 0, 1, 1], [], []>} : vector<2x32xf32>, vector<32x32xf32>, vector<2x32xf32> -> vector<2x32xf32>
    %c0_118 = arith.constant 0 : index
    %c0_119 = arith.constant 0 : index
    %520 = vector.load %arg11[%c0_118, %c0_119] : memref<32x32xf32, #tpu.memory_space<vmem>>, vector<32x32xf32>
    %cst_120 = arith.constant dense<0.000000e+00> : vector<2x32xf32>
    %521 = tpu.matmul %517, %520, %cst_120 {dimension_numbers = #tpu.dot_dimension_numbers<[1], [0], [0], [1], [0, 0, 1, 1], [], []>} : vector<2x32xf32>, vector<32x32xf32>, vector<2x32xf32> -> vector<2x32xf32>
    %522 = arith.addf %519, %521 : vector<2x32xf32>
    %c0_121 = arith.constant 0 : index
    %c0_122 = arith.constant 0 : index
    %523 = vector.load %arg12[%c0_121, %c0_122] : memref<1x32xf32, #tpu.memory_space<vmem>>, vector<1x32xf32>
    %524 = vector.broadcast %523 : vector<1x32xf32> to vector<2x32xf32>
    %525 = arith.addf %522, %524 : vector<2x32xf32>
    %c14_123 = arith.constant 14 : index
    %c0_124 = arith.constant 0 : index
    %526 = vector.load %arg0[%c14_123, %c0_124] : memref<16x32xf32, #tpu.memory_space<vmem>>, vector<2x32xf32>
    %527 = arith.addf %525, %526 : vector<2x32xf32>
    %c0_125 = arith.constant 0 : index
    %c0_126 = arith.constant 0 : index
    %528 = vector.load %arg13[%c0_125, %c0_126] : memref<32x128xf32, #tpu.memory_space<vmem>>, vector<32x128xf32>
    %cst_127 = arith.constant dense<0.000000e+00> : vector<2x128xf32>
    %529 = tpu.matmul %527, %528, %cst_127 {dimension_numbers = #tpu.dot_dimension_numbers<[1], [0], [0], [1], [0, 0, 1, 1], [], []>} : vector<2x32xf32>, vector<32x128xf32>, vector<2x128xf32> -> vector<2x128xf32>
    %c0_128 = arith.constant 0 : index
    %c0_129 = arith.constant 0 : index
    %530 = vector.load %arg14[%c0_128, %c0_129] : memref<1x128xf32, #tpu.memory_space<vmem>>, vector<1x128xf32>
    %531 = vector.broadcast %530 : vector<1x128xf32> to vector<2x128xf32>
    %532 = arith.addf %529, %531 : vector<2x128xf32>
    %c0_130 = arith.constant 0 : index
    %c0_131 = arith.constant 0 : index
    %533 = vector.load %arg15[%c0_130, %c0_131] : memref<2x128xf32, #tpu.memory_space<vmem>>, vector<2x128xf32>
    tpu.vector_store %arg15[%c0_130, %c0_131], %532 {strides = array<i32>} : memref<2x128xf32, #tpu.memory_space<vmem>>, vector<2x128xf32>,
    return
  }
}

</mosaic_0001>

<bundles_post_ra>
// kernel: res_bilstm_forward.1
= control target key start
LH: loop header
LB: loop body
LE: loop exit
PB: predicated region body
PF: predicated region fallthrough
CT: control target
= control target key end

     0   :  { %20 = vsyncpa [#allocation4], 0  ;;  %s3376_s0 = inlined_call_operand.vmem [shape: f32[16,32], index: 0, kind: input, shape index: {}]   ;;  %s3377_s1 = inlined_call_operand.hbm [shape: f32[32,256], index: 1, kind: input, shape index: {}]   ;;  %s3378_s2 = inlined_call_operand.vmem [shape: f32[1,256], index: 2, kind: input, shape index: {}]   ;;  %s3379_s3 = inlined_call_operand.vmem [shape: f32[32,128], index: 3, kind: input, shape index: {}]   ;;  %s3380_s4 = inlined_call_operand.hbm [shape: f32[32,128], index: 4, kind: input, shape index: {}]   ;;  %s3381_s5 = inlined_call_operand.hbm [shape: f32[32,256], index: 5, kind: input, shape index: {}]   ;;  %s3382_s6 = inlined_call_operand.hbm [shape: f32[32,256], index: 6, kind: input, shape index: {}]   ;;  %s3383_s7 = inlined_call_operand.vmem [shape: f32[1,256], index: 7, kind: input, shape index: {}]   ;;  %s3384_s8 = inlined_call_operand.hbm [shape: f32[32,128], index: 8, kind: input, shape index: {}]   ;;  %s3385_s9 = inlined_call_operand.hbm [shape: f32[32,128], index: 9, kind: input, shape index: {}]   ;;  %s3386_s10 = inlined_call_operand.hbm [shape: f32[32,32], index: 10, kind: input, shape index: {}]   ;;  %s3387_s11 = inlined_call_operand.hbm [shape: f32[32,32], index: 11, kind: input, shape index: {}]   ;;  %s3388_s12 = inlined_call_operand.vmem [shape: f32[1,32], index: 12, kind: input, shape index: {}]   ;;  %s3389_s13 = inlined_call_operand.hbm [shape: f32[32,128], index: 13, kind: input, shape index: {}]   ;;  %s3390_s14 = inlined_call_operand.vmem [shape: f32[1,128], index: 14, kind: input, shape index: {}]   ;;  %s3391_s15 = inlined_call_operand.hbm [shape: f32[2,128], index: 15, kind: output, shape index: {}]  }
   0x1   :  { %21 = vsyncpa [#allocation7], 0 }
   0x2   :  { %22 = vsyncpa [#allocation10], 0 }
   0x3   :  { %23 = vsyncpa [#allocation13], 0 }
   0x4   :  { %24 = vsyncpa [#allocation16], 0  ;;  %s49_s20 = sshll.u32 %s3380_s4, 4  ;;  %s50_s20 = int_to_ptr.hbm [resolvable:$true] %s49_s20 }
   0x5   :  { %25 = vsyncpa [#allocation5], 0  ;;  %s2797_s21 = smov [#allocation6]   ;;  %s3392_s23 = smov 128  }
   0x6   :  { %s51_s22 = sshll.u32 %s2797_s21, 4  ;;  %s2799_s24 = smov 8   ;;  %s52_s22 = int_to_ptr.vmem [resolvable:$true] %s51_s22 }
   0x7   :  { %57 = dma.hbm_to_vmem [thread:$0]  %s50_s20, 512, %s52_s22, [#allocation7], %s3392_s23, %s3392_s23, %s2799_s24  }
   0x8   :  { %s75_s27 = sshll.u32 %s3382_s6, 4  ;;  %s2800_s28 = smov [#allocation9]   ;;  %s76_s27 = int_to_ptr.hbm [resolvable:$true] %s75_s27 }
   0x9   :  { %s77_s29 = sshll.u32 %s2800_s28, 4  ;;  %s103_s16 = sshll.u32 %s3385_s9, 4  ;;  %s78_s29 = int_to_ptr.vmem [resolvable:$true] %s77_s29  ;;  %s104_s16 = int_to_ptr.hbm [resolvable:$true] %s103_s16 }
   0xa   :  { %s2801_s17 = smov 256   ;;  %s2802_s18 = smov 16  }
   0xb   :  { %83 = dma.hbm_to_vmem [thread:$0]  %s76_s27, 1024, %s78_s29, [#allocation10], %s2801_s17, %s2801_s17, %s2802_s18  }
   0xc   :  { %s129_s20 = sshll.u32 %s3387_s11, 4  ;;  %s2803_s22 = smov [#allocation12]   ;;  %s130_s20 = int_to_ptr.hbm [resolvable:$true] %s129_s20 }
   0xd   :  { %s105_s23 = sshll.u32 %s2803_s22, 4  ;;  %s3394_s6 = smov 128   ;;  %s106_s23 = int_to_ptr.vmem [resolvable:$true] %s105_s23 }
   0xe   :  { %111 = dma.hbm_to_vmem [thread:$0]  %s104_s16, 512, %s106_s23, [#allocation13], %s3394_s6, %s3394_s6, %s2799_s24  }
   0xf   :  { %s2804_s25 = smov [#allocation15]   ;;  %s32_s30 = sshll.u32 %s3377_s1, 4  ;;  %s33_s30 = int_to_ptr.hbm [resolvable:$true] %s32_s30 }
  0x10   :  { %s131_s26 = sshll.u32 %s2804_s25, 4  ;;  %s62_s29 = sshll.u32 %s3381_s5, 4  ;;  %s132_s26 = int_to_ptr.vmem [resolvable:$true] %s131_s26  ;;  %s63_s29 = int_to_ptr.hbm [resolvable:$true] %s62_s29 }
  0x11   :  { %137 = dma.hbm_to_vmem [thread:$0]  %s130_s20, 512, %s132_s26, [#allocation16], %s3394_s6, %s3394_s6, %s2799_s24  }
  0x12   :  { %s2805_s4 = smov [#allocation3]   ;;  %s2806_s23 = smov [#allocation8]  }
  0x13   :  { %s34_s19 = sshll.u32 %s2805_s4, 4  ;;  %s64_s16 = sshll.u32 %s2806_s23, 4  ;;  %s35_s19 = int_to_ptr.vmem [resolvable:$true] %s34_s19  ;;  %s65_s16 = int_to_ptr.vmem [resolvable:$true] %s64_s16 }
  0x14   :  { %40 = dma.hbm_to_vmem [thread:$0]  %s33_s30, 1024, %s35_s19, [#allocation4], %s2801_s17, %s2801_s17, %s2802_s18  }
  0x15   :  { %s90_s1 = sshll.u32 %s3384_s8, 4  ;;  %s116_s26 = sshll.u32 %s3386_s10, 4  ;;  %s91_s1 = int_to_ptr.hbm [resolvable:$true] %s90_s1  ;;  %s117_s26 = int_to_ptr.hbm [resolvable:$true] %s116_s26 }
  0x16   :  { %70 = dma.hbm_to_vmem [thread:$0]  %s63_s29, 1024, %s65_s16, [#allocation7], %s2801_s17, %s2801_s17, %s2802_s18  }
  0x17   :  { %s2807_s9 = smov [#allocation11]   ;;  %s2808_s28 = smov [#allocation14]  }
  0x18   :  { %s92_s5 = sshll.u32 %s2807_s9, 4  ;;  %s118_s30 = sshll.u32 %s2808_s28, 4  ;;  %s93_s5 = int_to_ptr.vmem [resolvable:$true] %s92_s5  ;;  %s119_s30 = int_to_ptr.vmem [resolvable:$true] %s118_s30 }
  0x19   :  { %98 = dma.hbm_to_vmem [thread:$0]  %s91_s1, 512, %s93_s5, [#allocation10], %s3394_s6, %s3394_s6, %s2799_s24  }
  0x1a   :  { %s144_s8 = sshll.u32 %s3389_s13, 4  ;;  %s2809_s10 = smov [#allocation17]   ;;  %s145_s8 = int_to_ptr.hbm [resolvable:$true] %s144_s8 }
  0x1b   :  { %124 = dma.hbm_to_vmem [thread:$0]  %s117_s26, 512, %s119_s30, [#allocation13], %s3394_s6, %s3394_s6, %s2799_s24  }
  0x1c   :  { %s146_s17 = sshll.u32 %s2809_s10, 4  ;;  %s147_s17 = int_to_ptr.vmem [resolvable:$true] %s146_s17 }
  0x1d   :  { %152 = dma.hbm_to_vmem [thread:$0]  %s145_s8, 512, %s147_s17, [#allocation16], %s3394_s6, %s3394_s6, %s2799_s24  }
  0x1e   :  { %2785 = dma.done.wait [#allocation4], 1024  }
  0x1f   :  { %2786 = vsyncadd [#allocation4], 4294966272 }
  0x20   :  { %2787 = dma.done.wait [#allocation7], 1536  }
  0x21   :  { %2788 = vsyncadd [#allocation7], 4294965760 }
  0x22   :  { %2789 = dma.done.wait [#allocation10], 1536  }
  0x23   :  { %2790 = vsyncadd [#allocation10], 4294965760 }
  0x24   :  { %2791 = dma.done.wait [#allocation13], 1024  }
  0x25   :  { %2792 = vsyncadd [#allocation13], 4294966272 }
  0x26   :  { %2793 = dma.done.wait [#allocation16], 1024  }
  0x27   :  { %2794 = vsyncadd [#allocation16], 4294966272  ;;  %v2942_v0 = vld [vmem:[%s3379_s3 + $0x18] sm:$0xff]  ;;  %v2947_v1 = vld [vmem:[%s3379_s3 + $0x10] sm:$0xff]  ;;  %vm202_vm0 = vcmask 261120   ;;  %v2810_v9 = vmov 0.0  }
  0x28   :  { %v200_v2 = vld [vmem:[#allocation3 + $0x30] sm:$0xff]  ;;  %287 = vmatpush.msra.mxu2 %v2942_v0  ;;  %v198_v3 = vld [vmem:[#allocation3 + $0x20] sm:$0xff]  ;;  %v2953_v4 = vld [vmem:[%s3379_s3 + $0x8] sm:$0xff]  ;;  %353 = vmatpush.msra.mxu3 %v2942_v0  ;;  %s2811_s1 = smov 64   ;;  %vm337_vm5 = vcmask 254976   ;;  %s2813_s8 = smov [#allocation18]  }
  0x29   :  { %221 = vmatpush.msra.mxu0 %v200_v2  ;;  %v196_v5 = vld [vmem:[#allocation3 + $0x10] sm:$0xff]  ;;  %v2960_v6 = vld [vmem:[%s3379_s3] sm:$0xff]  ;;  %s2249_s10 = sshll.u32 %s2813_s8, 4  ;;  %s2250_s10 = int_to_ptr.vmem [resolvable:$true] %s2249_s10 }
  0x2a   :  { %288 = vmatpush.msra.mxu2 %v2947_v1  ;;  %v194_v7 = vld [vmem:[#allocation3] sm:$0xff]  ;;  %354 = vmatpush.msra.mxu3 %v2947_v1 }
  0x2b   :  { %222 = vmatpush.msra.mxu0 %v198_v3  ;;  %v2967_v8 = vld [vmem:[%s3376_s0] sm:$0xff] }
  0x2c   :  { %289 = vmatpush.msra.mxu2 %v2953_v4  ;;  %355 = vmatpush.msra.mxu3 %v2953_v4  ;;  %v2994_v10 = vld [vmem:[%s3378_s2] sm:$0x3]  ;;  %s2812_s2 = smov 32  }
  0x2d   :  { %223 = vmatpush.msra.mxu0 %v196_v5  ;;  %v256_v11 = vperm.slane %v2994_v10, 0 }
  0x2e   :  { %290 = vmatpush.msra.mxu2 %v2960_v6  ;;  %356 = vmatpush.msra.mxu3 %v2960_v6 }
  0x2f   :  { %224 = vmatpush.msra.mxu0 %v194_v7  ;;  %291 = vmatmul.f32.vlgmr.msra.gmra.mxu2 %v2810_v9 }
  0x30   :  { %2265 = vmatmul.msk.f32.vlgmr.msra.gmra.mxu0 %vm202_vm0, %v2967_v8  ;;  %428 = vmatpush.msrb.mxu2 %v2942_v0 }
  0x31   :  { %503 = vmatpush.msrb.mxu3 %v2942_v0  ;;  %578 = vmatpush.msrb.mxu0 %v2942_v0 }
  0x32   :  { %429 = vmatpush.msrb.mxu2 %v2947_v1 }
  0x33   :  { %504 = vmatpush.msrb.mxu3 %v2947_v1  ;;  %579 = vmatpush.msrb.mxu0 %v2947_v1 }
  0x34   :  { %430 = vmatpush.msrb.mxu2 %v2953_v4 }
  0x35   :  { %505 = vmatpush.msrb.mxu3 %v2953_v4  ;;  %580 = vmatpush.msrb.mxu0 %v2953_v4 }
  0x36   :  { %431 = vmatpush.msrb.mxu2 %v2960_v6 }
  0x37   :  { %506 = vmatpush.msrb.mxu3 %v2960_v6  ;;  %581 = vmatpush.msrb.mxu0 %v2960_v6 }
  0x38   :  { %720 = vmatpush.msra.mxu2 %v2942_v0 }
  0x3a   :  { %721 = vmatpush.msra.mxu2 %v2947_v1 }
  0x3c   :  { %722 = vmatpush.msra.mxu2 %v2953_v4 }
  0x3e   :  { %723 = vmatpush.msra.mxu2 %v2960_v6 }
  0xad   :  { %v226_v12 = vpop.f32.mrf.mxu0 }
  0xae   :  { %v2999_v13 = vadd.f32 %v256_v11, %v226_v12 }
  0xb2   :  { %v292_v14 = vpop.f32.mrf.mxu2 }
  0xb3   :  { %v295_v15 = vadd.f32 %v292_v14, %v2999_v13 }
  0xb5   :  { %2345 = vtanh.f32 %v295_v15  ;;  %v2269_v17 = vmul.f32 -1.442695, %v295_v15 }
  0xb7   :  { %2347 = vpow2.f32 %v2269_v17 }
  0xbb   :  { %v2346_v16 = vpop.eup %2345 }
  0xbc   :  { %318 = vrot.lane.b32.xlu0 %v2346_v16, %s2811_s1 }
  0xbd   :  { %v2348_v18 = vpop.eup %2347 }
  0xbe   :  { %v299_v19 = vadd.f32 1.0, %v2348_v18 }
  0xc0   :  { %2349 = vrcp.f32 %v299_v19  ;;  %v311_v25 = vand.u32 2147483648, %v299_v19  ;;  %vm305_vm2 = vweird.f32 %v299_v19  ;;  %v309_v26 = vand.u32 2147483647, %v299_v19 }
  0xc2   :  { %v312_v28 = vor.u32 1.1754944e-38, %v311_v25  ;;  %vm310_vm4 = vcmp.eq.f32.partialorder %v309_v26, 8.507059e+37 }
  0xc6   :  { %v2350_v20 = vpop.eup %2349 }
  0xc7   :  { %v301_v21 = vmul.f32 %v2350_v20, %v299_v19  ;;  %vm306_vm1 = vweird.f32 %v2350_v20 }
  0xc8   :  { %vm307_vm3 = vmor %vm305_vm2, %vm306_vm1 }
  0xc9   :  { %v302_v22 = vsub.f32 1.0, %v301_v21 }
  0xcb   :  { %v303_v23 = vmul.f32 %v2350_v20, %v302_v22 }
  0xcd   :  { %v304_v24 = vadd.f32 %v2350_v20, %v303_v23 }
  0xcf   :  { %v308_v27 = vsel %vm307_vm3, %v2350_v20, %v304_v24 }
  0xd0   :  { %v313_v30 = vsel %vm310_vm4, %v312_v28, %v308_v27 }
  0xd1   :  { %v316_v32 = vmul.f32 0.0, %v313_v30 }
 0x12e   :  { %v319_v29 = vpop.permute.xlu0 %318 }
 0x12f   :  { %v321_v31 = vmul.f32 %v319_v29, %v313_v30 }
 0x131   :  { %323 = vrot.lane.b32.xlu0 %v321_v31, %s2812_s2 }
 0x1a3   :  { %v324_v33 = vpop.permute.xlu0 %323 }
 0x1a4   :  { %v326_v34 = vadd.f32 %v324_v33, %v316_v32 }
 0x1a6   :  { %2351 = vtanh.f32 %v326_v34  ;;  %v386_v58 = vrot.slane %v326_v34, 6 }
 0x1ac   :  { %v2352_v35 = vpop.eup %2351 }
 0x1ad   :  { %329 = vrot.lane.b32.xlu1 %v2352_v35, %s2811_s1 }
 0x21f   :  { %v330_v36 = vpop.permute.xlu1 %329 }
 0x220   :  { %v332_v37 = vmul.f32 %v330_v36, %v313_v30 }
 0x222   :  { %334 = vrot.lane.b32.xlu1 %v332_v37, %s2812_s2 }
 0x294   :  { %v335_v38 = vpop.permute.xlu1 %334 }
 0x295   :  { %338 = vst.msk [vmem:[#allocation2] sm:$0x3] %vm337_vm5, %v335_v38  ;;  %2270 = vmatmul.msk.f32.vlgmr.msra.gmra.mxu3 %vm202_vm0, %v335_v38 }
 0x296   :  { %794 = vmatpush.msra.mxu3 %v2942_v0 }
 0x298   :  { %795 = vmatpush.msra.mxu3 %v2947_v1 }
 0x29a   :  { %796 = vmatpush.msra.mxu3 %v2953_v4 }
 0x29c   :  { %797 = vmatpush.msra.mxu3 %v2960_v6 }
 0x318   :  { %v358_v39 = vpop.f32.mrf.mxu3 }
 0x319   :  { %v362_v40 = vrot.slane %v358_v39, 6 }
 0x31b   :  { %v364_v41 = vadd.f32 %v362_v40, %v2999_v13 }
 0x31d   :  { %2353 = vtanh.f32 %v364_v41  ;;  %v2271_v43 = vmul.f32 -1.442695, %v364_v41 }
 0x31f   :  { %2355 = vpow2.f32 %v2271_v43 }
 0x323   :  { %v2354_v42 = vpop.eup %2353 }
 0x324   :  { %390 = vrot.lane.b32.xlu2 %v2354_v42, %s2811_s1 }
 0x325   :  { %v2356_v44 = vpop.eup %2355 }
 0x326   :  { %v368_v45 = vadd.f32 1.0, %v2356_v44 }
 0x328   :  { %2357 = vrcp.f32 %v368_v45  ;;  %v380_v51 = vand.u32 2147483648, %v368_v45  ;;  %vm374_vm7 = vweird.f32 %v368_v45  ;;  %v378_v52 = vand.u32 2147483647, %v368_v45 }
 0x32a   :  { %v381_v54 = vor.u32 1.1754944e-38, %v380_v51  ;;  %vm379_vm9 = vcmp.eq.f32.partialorder %v378_v52, 8.507059e+37 }
 0x32e   :  { %v2358_v46 = vpop.eup %2357 }
 0x32f   :  { %v370_v47 = vmul.f32 %v2358_v46, %v368_v45  ;;  %vm375_vm6 = vweird.f32 %v2358_v46 }
 0x330   :  { %vm376_vm8 = vmor %vm374_vm7, %vm375_vm6 }
 0x331   :  { %v371_v48 = vsub.f32 1.0, %v370_v47 }
 0x333   :  { %v372_v49 = vmul.f32 %v2358_v46, %v371_v48 }
 0x335   :  { %v373_v50 = vadd.f32 %v2358_v46, %v372_v49 }
 0x337   :  { %v377_v53 = vsel %vm376_vm8, %v2358_v46, %v373_v50 }
 0x338   :  { %v382_v56 = vsel %vm379_vm9, %v381_v54, %v377_v53 }
 0x339   :  { %v388_v59 = vmul.f32 %v386_v58, %v382_v56 }
 0x37e   :  { %v391_v55 = vpop.permute.xlu2 %390 }
 0x37f   :  { %v393_v57 = vmul.f32 %v391_v55, %v382_v56 }
 0x381   :  { %395 = vrot.lane.b32.xlu2 %v393_v57, %s2812_s2 }
 0x3db   :  { %v396_v60 = vpop.permute.xlu2 %395 }
 0x3dc   :  { %v398_v61 = vadd.f32 %v396_v60, %v388_v59 }
 0x3de   :  { %2359 = vtanh.f32 %v398_v61  ;;  %v461_v31 = vrot.slane %v398_v61, 6 }
 0x3e4   :  { %v2360_v62 = vpop.eup %2359 }
 0x3e5   :  { %401 = vrot.lane.b32.xlu0 %v2360_v62, %s2811_s1 }
 0x457   :  { %v402_v63 = vpop.permute.xlu0 %401 }
 0x458   :  { %v3016_v2 = vmul.f32 %v402_v63, %v382_v56  ;;  %v193_v63 = vld [vmem:[%s3376_s0 + $0x8] sm:$0xff] }
 0x459   :  { %2266 = vmatmul.msk.f32.gmra.mxu0 %vm202_vm0, %v193_v63 }
 0x45a   :  { %v411_v3 = vrot.slane %v3016_v2, 2 }
 0x45c   :  { %412 = vrot.lane.b32.xlu1 %v411_v3, %s2812_s2  ;;  %v201_v3 = vld [vmem:[#allocation3 + $0x38] sm:$0xff] }
 0x45d   :  { %244 = vmatpush.msra.mxu1 %v201_v3 }
 0x4ce   :  { %v413_v5 = vpop.permute.xlu1 %412 }
 0x4cf   :  { %2272 = vmatmul.msk.f32.vlgmr.msrb.gmra.mxu2 %vm202_vm0, %v413_v5  ;;  %v199_v5 = vld [vmem:[#allocation3 + $0x28] sm:$0xff] }
 0x4d0   :  { %245 = vmatpush.msra.mxu1 %v199_v5 }
 0x552   :  { %v433_v7 = vpop.f32.mrf.mxu2 }
 0x553   :  { %v437_v12 = vrot.slane %v433_v7, 4  ;;  %v197_v7 = vld [vmem:[#allocation3 + $0x18] sm:$0xff] }
 0x554   :  { %246 = vmatpush.msra.mxu1 %v197_v7 }
 0x555   :  { %v439_v14 = vadd.f32 %v437_v12, %v2999_v13  ;;  %v195_v12 = vld [vmem:[#allocation3 + $0x8] sm:$0xff] }
 0x556   :  { %247 = vmatpush.msra.mxu1 %v195_v12 }
 0x557   :  { %2361 = vtanh.f32 %v439_v14  ;;  %v2273_v16 = vmul.f32 -1.442695, %v439_v14  ;;  %2267 = vmatmul.msk.f32.vlgmr.msra.gmra.mxu1 %vm202_vm0, %v2967_v8  ;;  %v3054_v8 = vld [vmem:[#allocation6 + $0x10] sm:$0xff] }
 0x558   :  { %646 = vmatpush.msrb.mxu1 %v2942_v0  ;;  %v3058_v0 = vld [vmem:[#allocation6 + $0x8] sm:$0xff] }
 0x559   :  { %2363 = vpow2.f32 %v2273_v16 }
 0x55a   :  { %647 = vmatpush.msrb.mxu1 %v2947_v1  ;;  %v3064_v1 = vld [vmem:[#allocation6] sm:$0xff] }
 0x55c   :  { %648 = vmatpush.msrb.mxu1 %v2953_v4 }
 0x55d   :  { %v2362_v15 = vpop.eup %2361 }
 0x55e   :  { %465 = vrot.lane.b32.xlu2 %v2362_v15, %s2811_s1  ;;  %649 = vmatpush.msrb.mxu1 %v2960_v6  ;;  %v229_v6 = vpop.f32.mrf.mxu0 }
 0x55f   :  { %v2364_v17 = vpop.eup %2363  ;;  %2268 = vmatmul.msk.f32.gmra.mxu1 %vm202_vm0, %v193_v63 }
 0x560   :  { %v443_v18 = vadd.f32 1.0, %v2364_v17  ;;  %v3052_v17 = vld [vmem:[#allocation6 + $0x18] sm:$0xff] }
 0x561   :  { %863 = vmatpush.msra.mxu0 %v3052_v17  ;;  %935 = vmatpush.msra.mxu1 %v3052_v17 }
 0x562   :  { %2365 = vrcp.f32 %v443_v18  ;;  %v455_v24 = vand.u32 2147483648, %v443_v18  ;;  %vm449_vm11 = vweird.f32 %v443_v18  ;;  %v453_v25 = vand.u32 2147483647, %v443_v18  ;;  %1009 = vmatpush.msrb.mxu2 %v3052_v17 }
 0x563   :  { %864 = vmatpush.msra.mxu0 %v3054_v8  ;;  %936 = vmatpush.msra.mxu1 %v3054_v8 }
 0x564   :  { %v456_v27 = vor.u32 1.1754944e-38, %v455_v24  ;;  %vm454_vm13 = vcmp.eq.f32.partialorder %v453_v25, 8.507059e+37  ;;  %1010 = vmatpush.msrb.mxu2 %v3054_v8 }
 0x565   :  { %865 = vmatpush.msra.mxu0 %v3058_v0  ;;  %937 = vmatpush.msra.mxu1 %v3058_v0 }
 0x566   :  { %1011 = vmatpush.msrb.mxu2 %v3058_v0 }
 0x567   :  { %866 = vmatpush.msra.mxu0 %v3064_v1  ;;  %938 = vmatpush.msra.mxu1 %v3064_v1 }
 0x568   :  { %v2366_v19 = vpop.eup %2365  ;;  %1012 = vmatpush.msrb.mxu2 %v3064_v1 }
 0x569   :  { %v445_v20 = vmul.f32 %v2366_v19, %v443_v18  ;;  %vm450_vm10 = vweird.f32 %v2366_v19 }
 0x56a   :  { %vm451_vm12 = vmor %vm449_vm11, %vm450_vm10 }
 0x56b   :  { %v446_v21 = vsub.f32 1.0, %v445_v20 }
 0x56d   :  { %v447_v22 = vmul.f32 %v2366_v19, %v446_v21 }
 0x56f   :  { %v448_v23 = vadd.f32 %v2366_v19, %v447_v22  ;;  %v257_v22 = vperm.slane %v2994_v10, 1 }
 0x571   :  { %v452_v26 = vsel %vm451_vm12, %v2366_v19, %v448_v23  ;;  %v3086_v19 = vadd.f32 %v256_v11, %v229_v6 }
 0x572   :  { %v457_v29 = vsel %vm454_vm13, %v456_v27, %v452_v26 }
 0x573   :  { %v463_v32 = vmul.f32 %v461_v31, %v457_v29 }
 0x5b8   :  { %v466_v28 = vpop.permute.xlu2 %465 }
 0x5b9   :  { %v468_v30 = vmul.f32 %v466_v28, %v457_v29 }
 0x5bb   :  { %470 = vrot.lane.b32.xlu0 %v468_v30, %s2812_s2 }
 0x5d4   :  { %v3082_v18 = vpop.f32.mrf.mxu1 }
 0x5dc   :  { %v252_v23 = vpop.f32.mrf.mxu1 }
 0x5dd   :  { %v3092_v24 = vadd.f32 %v257_v22, %v252_v23 }
 0x62d   :  { %v471_v33 = vpop.permute.xlu0 %470 }
 0x62e   :  { %v473_v34 = vadd.f32 %v471_v33, %v463_v32 }
 0x630   :  { %2367 = vtanh.f32 %v473_v34  ;;  %v536_v58 = vrot.slane %v473_v34, 6 }
 0x636   :  { %v2368_v35 = vpop.eup %2367 }
 0x637   :  { %476 = vrot.lane.b32.xlu1 %v2368_v35, %s2811_s1 }
 0x6a9   :  { %v477_v36 = vpop.permute.xlu1 %476 }
 0x6aa   :  { %v3025_v37 = vmul.f32 %v477_v36, %v457_v29 }
 0x6ac   :  { %v486_v38 = vrot.slane %v3025_v37, 4 }
 0x6ae   :  { %487 = vrot.lane.b32.xlu2 %v486_v38, %s2812_s2 }
 0x708   :  { %v488_v39 = vpop.permute.xlu2 %487 }
 0x709   :  { %2274 = vmatmul.msk.f32.vlgmr.msrb.gmra.mxu3 %vm202_vm0, %v488_v39 }
 0x70a   :  { %1083 = vmatpush.msrb.mxu3 %v3052_v17 }
 0x70c   :  { %1084 = vmatpush.msrb.mxu3 %v3054_v8 }
 0x70e   :  { %1085 = vmatpush.msrb.mxu3 %v3058_v0 }
 0x710   :  { %1086 = vmatpush.msrb.mxu3 %v3064_v1 }
 0x78c   :  { %v508_v40 = vpop.f32.mrf.mxu3 }
 0x78d   :  { %v512_v41 = vrot.slane %v508_v40, 2 }
 0x78f   :  { %v514_v42 = vadd.f32 %v512_v41, %v2999_v13 }
 0x791   :  { %2369 = vtanh.f32 %v514_v42  ;;  %v2275_v44 = vmul.f32 -1.442695, %v514_v42 }
 0x793   :  { %2371 = vpow2.f32 %v2275_v44 }
 0x797   :  { %v2370_v43 = vpop.eup %2369 }
 0x798   :  { %540 = vrot.lane.b32.xlu0 %v2370_v43, %s2811_s1 }
 0x799   :  { %v2372_v45 = vpop.eup %2371 }
 0x79a   :  { %v518_v46 = vadd.f32 1.0, %v2372_v45 }
 0x79c   :  { %2373 = vrcp.f32 %v518_v46  ;;  %v530_v52 = vand.u32 2147483648, %v518_v46  ;;  %vm524_vm15 = vweird.f32 %v518_v46  ;;  %v528_v53 = vand.u32 2147483647, %v518_v46 }
 0x79e   :  { %v531_v54 = vor.u32 1.1754944e-38, %v530_v52  ;;  %vm529_vm2 = vcmp.eq.f32.partialorder %v528_v53, 8.507059e+37 }
 0x7a2   :  { %v2374_v47 = vpop.eup %2373 }
 0x7a3   :  { %v520_v48 = vmul.f32 %v2374_v47, %v518_v46  ;;  %vm525_vm14 = vweird.f32 %v2374_v47 }
 0x7a4   :  { %vm526_vm1 = vmor %vm524_vm15, %vm525_vm14 }
 0x7a5   :  { %v521_v49 = vsub.f32 1.0, %v520_v48 }
 0x7a7   :  { %v522_v50 = vmul.f32 %v2374_v47, %v521_v49 }
 0x7a9   :  { %v523_v51 = vadd.f32 %v2374_v47, %v522_v50 }
 0x7ab   :  { %v527_v13 = vsel %vm526_vm1, %v2374_v47, %v523_v51 }
 0x7ac   :  { %v532_v56 = vsel %vm529_vm2, %v531_v54, %v527_v13 }
 0x7ad   :  { %v538_v59 = vmul.f32 %v536_v58, %v532_v56 }
 0x80a   :  { %v541_v55 = vpop.permute.xlu0 %540 }
 0x80b   :  { %v543_v57 = vmul.f32 %v541_v55, %v532_v56 }
 0x80d   :  { %545 = vrot.lane.b32.xlu1 %v543_v57, %s2812_s2 }
 0x87f   :  { %v546_v60 = vpop.permute.xlu1 %545 }
 0x880   :  { %v3033_v61 = vadd.f32 %v546_v60, %v538_v59 }
 0x882   :  { %2375 = vtanh.f32 %v3033_v61  ;;  %v608_v3 = vrot.slane %v3033_v61, 6 }
 0x888   :  { %v2376_v62 = vpop.eup %2375 }
 0x889   :  { %551 = vrot.lane.b32.xlu2 %v2376_v62, %s2811_s1 }
 0x8e3   :  { %v552_v14 = vpop.permute.xlu2 %551 }
 0x8e4   :  { %v3048_v15 = vmul.f32 %v552_v14, %v532_v56 }
 0x8e6   :  { %v561_v16 = vrot.slane %v3048_v15, 6 }
 0x8e8   :  { %562 = vrot.lane.b32.xlu0 %v561_v16, %s2812_s2 }
 0x95a   :  { %v563_v4 = vpop.permute.xlu0 %562 }
 0x95b   :  { %2276 = vmatmul.msk.f32.vlgmr.msrb.gmra.mxu0 %vm202_vm0, %v563_v4 }
 0x95c   :  { %1151 = vmatpush.msrb.mxu0 %v3052_v17 }
 0x95e   :  { %1152 = vmatpush.msrb.mxu0 %v3054_v8 }
 0x960   :  { %1153 = vmatpush.msrb.mxu0 %v3058_v0 }
 0x962   :  { %1154 = vmatpush.msrb.mxu0 %v3064_v1 }
 0x963   :  { %867 = vmatmul.f32.vlgmr.msra.gmra.mxu0 %v2810_v9 }
 0x9d8   :  { %v583_v20 = vpop.f32.mrf.mxu0 }
 0x9d9   :  { %v586_v21 = vadd.f32 %v583_v20, %v3086_v19 }
 0x9db   :  { %2377 = vtanh.f32 %v586_v21  ;;  %v2277_v32 = vmul.f32 -1.442695, %v586_v21 }
 0x9e0   :  { %v868_v25 = vpop.f32.mrf.mxu0 }
 0x9e1   :  { %v2378_v26 = vpop.eup %2377  ;;  %v872_v27 = vrot.slane %v868_v25, 2 }
 0x9e2   :  { %612 = vrot.lane.b32.xlu1 %v2378_v26, %s2811_s1 }
 0x9e3   :  { %v874_v28 = vadd.f32 %v872_v27, %v3092_v24 }
 0x9e5   :  { %2379 = vtanh.f32 %v874_v28  ;;  %v2284_v29 = vmul.f32 -1.442695, %v874_v28 }
 0x9e7   :  { %2381 = vpow2.f32 %v2284_v29 }
 0x9eb   :  { %v2380_v11 = vpop.eup %2379 }
 0x9ec   :  { %897 = vrot.lane.b32.xlu2 %v2380_v11, %s2811_s1 }
 0x9ed   :  { %v2382_v30 = vpop.eup %2381 }
 0x9ee   :  { %v878_v31 = vadd.f32 1.0, %v2382_v30 }
 0x9f0   :  { %2383 = vrcp.f32 %v878_v31  ;;  %vm884_vm3 = vweird.f32 %v878_v31  ;;  %v890_v41 = vand.u32 2147483648, %v878_v31  ;;  %v888_v43 = vand.u32 2147483647, %v878_v31 }
 0x9f1   :  { %2385 = vpow2.f32 %v2277_v32 }
 0x9f2   :  { %v891_v45 = vor.u32 1.1754944e-38, %v890_v41  ;;  %vm889_vm7 = vcmp.eq.f32.partialorder %v888_v43, 8.507059e+37 }
 0x9f6   :  { %v2384_v33 = vpop.eup %2383 }
 0x9f7   :  { %v2386_v34 = vpop.eup %2385  ;;  %v880_v35 = vmul.f32 %v2384_v33, %v878_v31  ;;  %vm885_vm4 = vweird.f32 %v2384_v33 }
 0x9f8   :  { %v590_v36 = vadd.f32 1.0, %v2386_v34  ;;  %vm886_vm6 = vmor %vm884_vm3, %vm885_vm4 }
 0x9f9   :  { %v881_v38 = vsub.f32 1.0, %v880_v35 }
 0x9fa   :  { %2387 = vrcp.f32 %v590_v36  ;;  %v602_v53 = vand.u32 2147483648, %v590_v36  ;;  %vm596_vm9 = vweird.f32 %v590_v36  ;;  %v600_v13 = vand.u32 2147483647, %v590_v36 }
 0x9fb   :  { %v882_v39 = vmul.f32 %v2384_v33, %v881_v38 }
 0x9fc   :  { %v603_v55 = vor.u32 1.1754944e-38, %v602_v53  ;;  %vm601_vm11 = vcmp.eq.f32.partialorder %v600_v13, 8.507059e+37 }
 0x9fd   :  { %v883_v42 = vadd.f32 %v2384_v33, %v882_v39 }
 0x9ff   :  { %v887_v46 = vsel %vm886_vm6, %v2384_v33, %v883_v42 }
 0xa00   :  { %v2388_v40 = vpop.eup %2387  ;;  %v892_v49 = vsel %vm889_vm7, %v891_v45, %v887_v46 }
 0xa01   :  { %v592_v44 = vmul.f32 %v2388_v40, %v590_v36  ;;  %vm597_vm8 = vweird.f32 %v2388_v40  ;;  %v895_v59 = vmul.f32 0.0, %v892_v49 }
 0xa02   :  { %vm598_vm10 = vmor %vm596_vm9, %vm597_vm8 }
 0xa03   :  { %v593_v47 = vsub.f32 1.0, %v592_v44 }
 0xa05   :  { %v594_v51 = vmul.f32 %v2388_v40, %v593_v47 }
 0xa07   :  { %v595_v52 = vadd.f32 %v2388_v40, %v594_v51 }
 0xa09   :  { %v599_v54 = vsel %vm598_vm10, %v2388_v40, %v595_v52 }
 0xa0a   :  { %v604_v57 = vsel %vm601_vm11, %v603_v55, %v599_v54 }
 0xa0b   :  { %v610_v5 = vmul.f32 %v608_v3, %v604_v57 }
 0xa46   :  { %v898_v48 = vpop.permute.xlu2 %897 }
 0xa47   :  { %v900_v50 = vmul.f32 %v898_v48, %v892_v49 }
 0xa49   :  { %902 = vrot.lane.b32.xlu1 %v900_v50, %s2812_s2 }
 0xa54   :  { %v613_v56 = vpop.permute.xlu1 %612 }
 0xa55   :  { %v615_v58 = vmul.f32 %v613_v56, %v604_v57 }
 0xa57   :  { %617 = vrot.lane.b32.xlu0 %v615_v58, %s2812_s2 }
 0xabb   :  { %v903_v60 = vpop.permute.xlu1 %902 }
 0xabc   :  { %v3099_v62 = vadd.f32 %v903_v60, %v895_v59 }
 0xabe   :  { %2389 = vtanh.f32 %v3099_v62 }
 0xac4   :  { %v2390_v63 = vpop.eup %2389 }
 0xac5   :  { %908 = vrot.lane.b32.xlu0 %v2390_v63, %s2811_s1 }
 0xac9   :  { %v618_v7 = vpop.permute.xlu0 %617 }
 0xaca   :  { %v3104_v12 = vadd.f32 %v618_v7, %v610_v5 }
 0xacc   :  { %2391 = vtanh.f32 %v3104_v12  ;;  %v679_v3 = vrot.slane %v3104_v12, 6 }
 0xad2   :  { %v2392_v14 = vpop.eup %2391 }
 0xad3   :  { %623 = vrot.lane.b32.xlu2 %v2392_v14, %s2811_s1 }
 0xb2d   :  { %v624_v16 = vpop.permute.xlu2 %623 }
 0xb2e   :  { %v626_v4 = vmul.f32 %v624_v16, %v604_v57 }
 0xb30   :  { %628 = vrot.lane.b32.xlu1 %v626_v4, %s2812_s2  ;;  %v968_v4 = vrot.slane %v3099_v62, 2 }
 0xb37   :  { %v909_v6 = vpop.permute.xlu0 %908 }
 0xb38   :  { %v3109_v20 = vmul.f32 %v909_v6, %v892_v49 }
 0xb3a   :  { %v918_v21 = vrot.slane %v3109_v20, 6 }
 0xb3c   :  { %919 = vrot.lane.b32.xlu2 %v918_v21, %s2812_s2 }
 0xb96   :  { %v920_v23 = vpop.permute.xlu2 %919 }
 0xba2   :  { %v629_v61 = vpop.permute.xlu1 %628 }
 0xba3   :  { %631 = vst.msk [vmem:[#allocation2 + $0x8] sm:$0x3] %vm337_vm5, %v629_v61  ;;  %2278 = vmatmul.msk.f32.vlgmr.msrb.gmra.mxu1 %vm202_vm0, %v629_v61 }
 0xba4   :  { %1225 = vmatpush.msrb.mxu1 %v3052_v17 }
 0xba6   :  { %1226 = vmatpush.msrb.mxu1 %v3054_v8 }
 0xba8   :  { %1227 = vmatpush.msrb.mxu1 %v3058_v0 }
 0xbaa   :  { %1228 = vmatpush.msrb.mxu1 %v3064_v1 }
 0xbab   :  { %2285 = vmatmul.msk.f32.vlgmr.msra.gmra.mxu1 %vm202_vm0, %v920_v23 }
 0xc20   :  { %v651_v25 = vpop.f32.mrf.mxu1 }
 0xc21   :  { %v655_v26 = vrot.slane %v651_v25, 6 }
 0xc23   :  { %v657_v27 = vadd.f32 %v655_v26, %v3086_v19 }
 0xc25   :  { %2393 = vtanh.f32 %v657_v27  ;;  %v2279_v32 = vmul.f32 -1.442695, %v657_v27 }
 0xc28   :  { %v940_v28 = vpop.f32.mrf.mxu1 }
 0xc29   :  { %v944_v11 = vrot.slane %v940_v28, 4 }
 0xc2b   :  { %v2394_v29 = vpop.eup %2393  ;;  %v946_v30 = vadd.f32 %v944_v11, %v3092_v24 }
 0xc2c   :  { %683 = vrot.lane.b32.xlu0 %v2394_v29, %s2811_s1 }
 0xc2d   :  { %2395 = vtanh.f32 %v946_v30  ;;  %v2286_v33 = vmul.f32 -1.442695, %v946_v30 }
 0xc2e   :  { %2397 = vpow2.f32 %v2279_v32 }
 0xc2f   :  { %2399 = vpow2.f32 %v2286_v33 }
 0xc33   :  { %v2396_v31 = vpop.eup %2395 }
 0xc34   :  { %972 = vrot.lane.b32.xlu1 %v2396_v31, %s2811_s1  ;;  %v2398_v34 = vpop.eup %2397 }
 0xc35   :  { %v661_v35 = vadd.f32 1.0, %v2398_v34  ;;  %v2400_v36 = vpop.eup %2399 }
 0xc36   :  { %v950_v38 = vadd.f32 1.0, %v2400_v36 }
 0xc37   :  { %2401 = vrcp.f32 %v661_v35  ;;  %v673_v47 = vand.u32 2147483648, %v661_v35  ;;  %vm667_vm13 = vweird.f32 %v661_v35  ;;  %v671_v48 = vand.u32 2147483647, %v661_v35 }
 0xc38   :  { %2403 = vrcp.f32 %v950_v38  ;;  %v962_v55 = vand.u32 2147483648, %v950_v38  ;;  %vm956_vm2 = vweird.f32 %v950_v38  ;;  %v960_v56 = vand.u32 2147483647, %v950_v38 }
 0xc39   :  { %v674_v51 = vor.u32 1.1754944e-38, %v673_v47  ;;  %vm672_vm15 = vcmp.eq.f32.partialorder %v671_v48, 8.507059e+37 }
 0xc3a   :  { %v963_v58 = vor.u32 1.1754944e-38, %v962_v55  ;;  %vm961_vm4 = vcmp.eq.f32.partialorder %v960_v56, 8.507059e+37 }
 0xc3d   :  { %v2402_v39 = vpop.eup %2401 }
 0xc3e   :  { %v663_v40 = vmul.f32 %v2402_v39, %v661_v35  ;;  %v2404_v42 = vpop.eup %2403  ;;  %vm668_vm12 = vweird.f32 %v2402_v39 }
 0xc3f   :  { %v952_v44 = vmul.f32 %v2404_v42, %v950_v38  ;;  %vm669_vm14 = vmor %vm667_vm13, %vm668_vm12  ;;  %vm957_vm1 = vweird.f32 %v2404_v42 }
 0xc40   :  { %v664_v41 = vsub.f32 1.0, %v663_v40  ;;  %vm958_vm3 = vmor %vm956_vm2, %vm957_vm1 }
 0xc41   :  { %v953_v46 = vsub.f32 1.0, %v952_v44 }
 0xc42   :  { %v665_v43 = vmul.f32 %v2402_v39, %v664_v41 }
 0xc43   :  { %v954_v50 = vmul.f32 %v2404_v42, %v953_v46 }
 0xc44   :  { %v666_v45 = vadd.f32 %v2402_v39, %v665_v43 }
 0xc45   :  { %v955_v54 = vadd.f32 %v2404_v42, %v954_v50 }
 0xc46   :  { %v670_v49 = vsel %vm669_vm14, %v2402_v39, %v666_v45 }
 0xc47   :  { %v675_v53 = vsel %vm672_vm15, %v674_v51, %v670_v49  ;;  %v959_v57 = vsel %vm958_vm3, %v2404_v42, %v955_v54 }
 0xc48   :  { %v964_v60 = vsel %vm961_vm4, %v963_v58, %v959_v57  ;;  %v681_v5 = vmul.f32 %v679_v3, %v675_v53 }
 0xc49   :  { %v970_v6 = vmul.f32 %v968_v4, %v964_v60 }
 0xc9e   :  { %v684_v52 = vpop.permute.xlu0 %683 }
 0xc9f   :  { %v686_v13 = vmul.f32 %v684_v52, %v675_v53 }
 0xca1   :  { %688 = vrot.lane.b32.xlu2 %v686_v13, %s2812_s2 }
 0xca6   :  { %v973_v59 = vpop.permute.xlu1 %972 }
 0xca7   :  { %v975_v63 = vmul.f32 %v973_v59, %v964_v60 }
 0xca9   :  { %977 = vrot.lane.b32.xlu0 %v975_v63, %s2812_s2 }
 0xcfb   :  { %v689_v7 = vpop.permute.xlu2 %688 }
 0xcfc   :  { %v3127_v14 = vadd.f32 %v689_v7, %v681_v5 }
 0xcfe   :  { %2405 = vtanh.f32 %v3127_v14 }
 0xd04   :  { %v2406_v16 = vpop.eup %2405 }
 0xd05   :  { %694 = vrot.lane.b32.xlu1 %v2406_v16, %s2811_s1 }
 0xd1b   :  { %v978_v21 = vpop.permute.xlu0 %977 }
 0xd1c   :  { %v3132_v61 = vadd.f32 %v978_v21, %v970_v6  ;;  %v753_v21 = vrot.slane %v3127_v14, 6 }
 0xd1e   :  { %2407 = vtanh.f32 %v3132_v61 }
 0xd24   :  { %v2408_v23 = vpop.eup %2407 }
 0xd25   :  { %983 = vrot.lane.b32.xlu2 %v2408_v23, %s2811_s1 }
 0xd77   :  { %v695_v12 = vpop.permute.xlu1 %694 }
 0xd78   :  { %v3136_v25 = vmul.f32 %v695_v12, %v675_v53 }
 0xd7a   :  { %v703_v26 = vrot.slane %v3136_v25, 2 }
 0xd7c   :  { %704 = vrot.lane.b32.xlu0 %v703_v26, %s2812_s2 }
 0xd7f   :  { %v984_v27 = vpop.permute.xlu2 %983 }
 0xd80   :  { %v3140_v28 = vmul.f32 %v984_v27, %v964_v60  ;;  %v1042_v27 = vrot.slane %v3132_v61, 2 }
 0xd82   :  { %v992_v62 = vrot.slane %v3140_v28, 4 }
 0xd84   :  { %993 = vrot.lane.b32.xlu1 %v992_v62, %s2812_s2 }
 0xdee   :  { %v705_v11 = vpop.permute.xlu0 %704 }
 0xdef   :  { %2280 = vmatmul.msk.f32.vlgmr.msra.gmra.mxu2 %vm202_vm0, %v705_v11 }
 0xdf0   :  { %1299 = vmatpush.msra.mxu2 %v3052_v17 }
 0xdf2   :  { %1300 = vmatpush.msra.mxu2 %v3054_v8 }
 0xdf4   :  { %1301 = vmatpush.msra.mxu2 %v3058_v0 }
 0xdf6   :  { %v994_v29 = vpop.permute.xlu1 %993  ;;  %1302 = vmatpush.msra.mxu2 %v3064_v1 }
 0xdf7   :  { %2287 = vmatmul.msk.f32.vlgmr.msrb.gmra.mxu2 %vm202_vm0, %v994_v29 }
 0xe72   :  { %v725_v30 = vpop.f32.mrf.mxu2 }
 0xe73   :  { %v729_v31 = vrot.slane %v725_v30, 4 }
 0xe75   :  { %v731_v32 = vadd.f32 %v729_v31, %v3086_v19 }
 0xe77   :  { %2409 = vtanh.f32 %v731_v32  ;;  %v2281_v39 = vmul.f32 -1.442695, %v731_v32 }
 0xe7a   :  { %v1014_v33 = vpop.f32.mrf.mxu2 }
 0xe7b   :  { %v1018_v34 = vrot.slane %v1014_v33, 6 }
 0xe7d   :  { %v2410_v35 = vpop.eup %2409  ;;  %v1020_v36 = vadd.f32 %v1018_v34, %v3092_v24 }
 0xe7e   :  { %757 = vrot.lane.b32.xlu2 %v2410_v35, %s2811_s1 }
 0xe7f   :  { %2411 = vtanh.f32 %v1020_v36  ;;  %v2288_v45 = vmul.f32 -1.442695, %v1020_v36 }
 0xe80   :  { %2413 = vpow2.f32 %v2281_v39 }
 0xe85   :  { %v2412_v38 = vpop.eup %2411 }
 0xe86   :  { %1046 = vrot.lane.b32.xlu0 %v2412_v38, %s2811_s1  ;;  %v2414_v40 = vpop.eup %2413 }
 0xe87   :  { %v735_v41 = vadd.f32 1.0, %v2414_v40 }
 0xe89   :  { %2415 = vrcp.f32 %v735_v41  ;;  %v747_v48 = vand.u32 2147483648, %v735_v41  ;;  %vm741_vm7 = vweird.f32 %v735_v41  ;;  %v745_v49 = vand.u32 2147483647, %v735_v41 }
 0xe8a   :  { %2417 = vpow2.f32 %v2288_v45 }
 0xe8b   :  { %v748_v52 = vor.u32 1.1754944e-38, %v747_v48  ;;  %vm746_vm9 = vcmp.eq.f32.partialorder %v745_v49, 8.507059e+37 }
 0xe8f   :  { %v2416_v42 = vpop.eup %2415 }
 0xe90   :  { %v737_v43 = vmul.f32 %v2416_v42, %v735_v41  ;;  %vm742_vm6 = vweird.f32 %v2416_v42  ;;  %v2418_v50 = vpop.eup %2417 }
 0xe91   :  { %vm743_vm8 = vmor %vm741_vm7, %vm742_vm6  ;;  %v1024_v53 = vadd.f32 1.0, %v2418_v50 }
 0xe92   :  { %v738_v44 = vsub.f32 1.0, %v737_v43 }
 0xe93   :  { %2419 = vrcp.f32 %v1024_v53  ;;  %v1036_v63 = vand.u32 2147483648, %v1024_v53  ;;  %vm1030_vm11 = vweird.f32 %v1024_v53  ;;  %v1034_v3 = vand.u32 2147483647, %v1024_v53 }
 0xe94   :  { %v739_v46 = vmul.f32 %v2416_v42, %v738_v44 }
 0xe95   :  { %v1037_v7 = vor.u32 1.1754944e-38, %v1036_v63  ;;  %vm1035_vm13 = vcmp.eq.f32.partialorder %v1034_v3, 8.507059e+37  ;;  %v3189_v63 = vadd.f32 %v257_v22, %v3082_v18 }
 0xe96   :  { %v740_v47 = vadd.f32 %v2416_v42, %v739_v46 }
 0xe98   :  { %v744_v51 = vsel %vm743_vm8, %v2416_v42, %v740_v47 }
 0xe99   :  { %v749_v13 = vsel %vm746_vm9, %v748_v52, %v744_v51  ;;  %v2420_v56 = vpop.eup %2419 }
 0xe9a   :  { %v1026_v57 = vmul.f32 %v2420_v56, %v1024_v53  ;;  %vm1031_vm10 = vweird.f32 %v2420_v56  ;;  %v755_v23 = vmul.f32 %v753_v21, %v749_v13 }
 0xe9b   :  { %vm1032_vm12 = vmor %vm1030_vm11, %vm1031_vm10 }
 0xe9c   :  { %v1027_v58 = vsub.f32 1.0, %v1026_v57 }
 0xe9e   :  { %v1028_v59 = vmul.f32 %v2420_v56, %v1027_v58 }
 0xea0   :  { %v1029_v60 = vadd.f32 %v2420_v56, %v1028_v59 }
 0xea2   :  { %v1033_v5 = vsel %vm1032_vm12, %v2420_v56, %v1029_v60 }
 0xea3   :  { %v1038_v4 = vsel %vm1035_vm13, %v1037_v7, %v1033_v5 }
 0xea4   :  { %v1044_v62 = vmul.f32 %v1042_v27, %v1038_v4 }
 0xed8   :  { %v758_v54 = vpop.permute.xlu2 %757 }
 0xed9   :  { %v760_v55 = vmul.f32 %v758_v54, %v749_v13 }
 0xedb   :  { %762 = vrot.lane.b32.xlu1 %v760_v55, %s2812_s2 }
 0xef8   :  { %v1047_v16 = vpop.permute.xlu0 %1046 }
 0xef9   :  { %v1049_v6 = vmul.f32 %v1047_v16, %v1038_v4 }
 0xefb   :  { %1051 = vrot.lane.b32.xlu2 %v1049_v6, %s2812_s2 }
 0xf4d   :  { %v763_v12 = vpop.permute.xlu1 %762 }
 0xf4e   :  { %v3157_v26 = vadd.f32 %v763_v12, %v755_v23 }
 0xf50   :  { %2421 = vtanh.f32 %v3157_v26 }
 0xf55   :  { %v1052_v11 = vpop.permute.xlu2 %1051 }
 0xf56   :  { %v2422_v29 = vpop.eup %2421  ;;  %v1054_v30 = vadd.f32 %v1052_v11, %v1044_v62 }
 0xf57   :  { %768 = vrot.lane.b32.xlu0 %v2422_v29, %s2811_s1 }
 0xf58   :  { %2423 = vtanh.f32 %v1054_v30  ;;  %v1113_v53 = vrot.slane %v1054_v30, 2 }
 0xf5e   :  { %v2424_v31 = vpop.eup %2423 }
 0xf5f   :  { %1057 = vrot.lane.b32.xlu1 %v2424_v31, %s2811_s1 }
 0xfc9   :  { %v769_v32 = vpop.permute.xlu0 %768 }
 0xfca   :  { %v3163_v14 = vmul.f32 %v769_v32, %v749_v13 }
 0xfcc   :  { %v777_v33 = vrot.slane %v3163_v14, 4 }
 0xfce   :  { %778 = vrot.lane.b32.xlu2 %v777_v33, %s2812_s2 }
 0xfd1   :  { %v1058_v34 = vpop.permute.xlu1 %1057 }
 0xfd2   :  { %v3167_v35 = vmul.f32 %v1058_v34, %v1038_v4 }
 0xfd4   :  { %v1066_v61 = vrot.slane %v3167_v35, 2 }
 0xfd6   :  { %1067 = vrot.lane.b32.xlu0 %v1066_v61, %s2812_s2 }
0x1028   :  { %v779_v36 = vpop.permute.xlu2 %778 }
0x1029   :  { %2282 = vmatmul.msk.f32.vlgmr.msra.gmra.mxu3 %vm202_vm0, %v779_v36 }
0x102a   :  { %1373 = vmatpush.msra.mxu3 %v3052_v17 }
0x102c   :  { %1374 = vmatpush.msra.mxu3 %v3054_v8 }
0x102e   :  { %1375 = vmatpush.msra.mxu3 %v3058_v0 }
0x1030   :  { %1376 = vmatpush.msra.mxu3 %v3064_v1 }
0x1048   :  { %v1068_v38 = vpop.permute.xlu0 %1067 }
0x1049   :  { %2289 = vmatmul.msk.f32.vlgmr.msrb.gmra.mxu3 %vm202_vm0, %v1068_v38 }
0x10ac   :  { %v3177_v39 = vpop.f32.mrf.mxu3 }
0x10cc   :  { %v1088_v40 = vpop.f32.mrf.mxu3 }
0x10cd   :  { %v1091_v41 = vadd.f32 %v1088_v40, %v3092_v24 }
0x10cf   :  { %2425 = vtanh.f32 %v1091_v41  ;;  %v2290_v43 = vmul.f32 -1.442695, %v1091_v41 }
0x10d1   :  { %2427 = vpow2.f32 %v2290_v43 }
0x10d5   :  { %v2426_v42 = vpop.eup %2425 }
0x10d6   :  { %1117 = vrot.lane.b32.xlu1 %v2426_v42, %s2811_s1 }
0x10d7   :  { %v2428_v17 = vpop.eup %2427 }
0x10d8   :  { %v1095_v8 = vadd.f32 1.0, %v2428_v17 }
0x10da   :  { %2429 = vrcp.f32 %v1095_v8  ;;  %v1107_v47 = vand.u32 2147483648, %v1095_v8  ;;  %vm1101_vm15 = vweird.f32 %v1095_v8  ;;  %v1105_v48 = vand.u32 2147483647, %v1095_v8 }
0x10dc   :  { %v1108_v49 = vor.u32 1.1754944e-38, %v1107_v47  ;;  %vm1106_vm2 = vcmp.eq.f32.partialorder %v1105_v48, 8.507059e+37 }
0x10e0   :  { %v2430_v0 = vpop.eup %2429 }
0x10e1   :  { %v1097_v44 = vmul.f32 %v2430_v0, %v1095_v8  ;;  %vm1102_vm14 = vweird.f32 %v2430_v0 }
0x10e2   :  { %vm1103_vm1 = vmor %vm1101_vm15, %vm1102_vm14 }
0x10e3   :  { %v1098_v1 = vsub.f32 1.0, %v1097_v44 }
0x10e5   :  { %v1099_v45 = vmul.f32 %v2430_v0, %v1098_v1 }
0x10e7   :  { %v1100_v46 = vadd.f32 %v2430_v0, %v1099_v45 }
0x10e9   :  { %v1104_v24 = vsel %vm1103_vm1, %v2430_v0, %v1100_v46 }
0x10ea   :  { %v1109_v51 = vsel %vm1106_vm2, %v1108_v49, %v1104_v24 }
0x10eb   :  { %v1115_v13 = vmul.f32 %v1113_v53, %v1109_v51 }
0x1148   :  { %v1118_v50 = vpop.permute.xlu1 %1117 }
0x1149   :  { %v1120_v52 = vmul.f32 %v1118_v50, %v1109_v51 }
0x114b   :  { %1122 = vrot.lane.b32.xlu2 %v1120_v52, %s2812_s2 }
0x11a5   :  { %v1123_v54 = vpop.permute.xlu2 %1122 }
0x11a6   :  { %v1125_v55 = vadd.f32 %v1123_v54, %v1115_v13 }
0x11a8   :  { %2431 = vtanh.f32 %v1125_v55  ;;  %v1184_v32 = vrot.slane %v1125_v55, 2 }
0x11ae   :  { %v2432_v56 = vpop.eup %2431 }
0x11af   :  { %1128 = vrot.lane.b32.xlu0 %v2432_v56, %s2811_s1 }
0x1221   :  { %v1129_v57 = vpop.permute.xlu0 %1128 }
0x1222   :  { %v1131_v58 = vmul.f32 %v1129_v57, %v1109_v51 }
0x1224   :  { %1133 = vrot.lane.b32.xlu1 %v1131_v58, %s2812_s2 }
0x1296   :  { %v1134_v59 = vpop.permute.xlu1 %1133 }
0x1297   :  { %1136 = vst.msk [vmem:[#allocation2 + $0x18] sm:$0x3] %vm337_vm5, %v1134_v59  ;;  %2291 = vmatmul.msk.f32.vlgmr.msrb.gmra.mxu0 %vm202_vm0, %v1134_v59 }
0x1314   :  { %v1156_v60 = vpop.f32.mrf.mxu0 }
0x1315   :  { %v1160_v3 = vrot.slane %v1156_v60, 2 }
0x1317   :  { %v1162_v5 = vadd.f32 %v1160_v3, %v3189_v63 }
0x1319   :  { %2433 = vtanh.f32 %v1162_v5  ;;  %v2292_v16 = vmul.f32 -1.442695, %v1162_v5 }
0x131b   :  { %2435 = vpow2.f32 %v2292_v16 }
0x131f   :  { %v2434_v7 = vpop.eup %2433 }
0x1320   :  { %1188 = vrot.lane.b32.xlu2 %v2434_v7, %s2811_s1 }
0x1321   :  { %v2436_v4 = vpop.eup %2435 }
0x1322   :  { %v1166_v6 = vadd.f32 1.0, %v2436_v4 }
0x1324   :  { %2437 = vrcp.f32 %v1166_v6  ;;  %v1178_v10 = vand.u32 2147483648, %v1166_v6  ;;  %vm1172_vm4 = vweird.f32 %v1166_v6  ;;  %v1176_v18 = vand.u32 2147483647, %v1166_v6 }
0x1326   :  { %v1179_v11 = vor.u32 1.1754944e-38, %v1178_v10  ;;  %vm1177_vm7 = vcmp.eq.f32.partialorder %v1176_v18, 8.507059e+37 }
0x132a   :  { %v2438_v21 = vpop.eup %2437 }
0x132b   :  { %v1168_v23 = vmul.f32 %v2438_v21, %v1166_v6  ;;  %vm1173_vm3 = vweird.f32 %v2438_v21 }
0x132c   :  { %vm1174_vm6 = vmor %vm1172_vm4, %vm1173_vm3 }
0x132d   :  { %v1169_v12 = vsub.f32 1.0, %v1168_v23 }
0x132f   :  { %v1170_v27 = vmul.f32 %v2438_v21, %v1169_v12 }
0x1331   :  { %v1171_v62 = vadd.f32 %v2438_v21, %v1170_v27 }
0x1333   :  { %v1175_v22 = vsel %vm1174_vm6, %v2438_v21, %v1171_v62 }
0x1334   :  { %v1180_v30 = vsel %vm1177_vm7, %v1179_v11, %v1175_v22 }
0x1335   :  { %v1186_v33 = vmul.f32 %v1184_v32, %v1180_v30  ;;  %v803_v32 = vrot.slane %v3177_v39, 2 }
0x137a   :  { %v1189_v29 = vpop.permute.xlu2 %1188 }
0x137b   :  { %v1191_v31 = vmul.f32 %v1189_v29, %v1180_v30 }
0x137d   :  { %1193 = vrot.lane.b32.xlu0 %v1191_v31, %s2812_s2 }
0x13ef   :  { %v1194_v34 = vpop.permute.xlu0 %1193 }
0x13f0   :  { %v1196_v61 = vadd.f32 %v1194_v34, %v1186_v33 }
0x13f2   :  { %2439 = vtanh.f32 %v1196_v61  ;;  %v1258_v56 = vrot.slane %v1196_v61, 2  ;;  %v805_v61 = vadd.f32 %v803_v32, %v3086_v19 }
0x13f4   :  { %v2283_v19 = vmul.f32 -1.442695, %v805_v61 }
0x13f8   :  { %v2440_v36 = vpop.eup %2439 }
0x13f9   :  { %1199 = vrot.lane.b32.xlu1 %v2440_v36, %s2811_s1 }
0x146b   :  { %v1200_v38 = vpop.permute.xlu1 %1199 }
0x146c   :  { %v3195_v40 = vmul.f32 %v1200_v38, %v1180_v30 }
0x146e   :  { %v1208_v41 = vrot.slane %v3195_v40, 6 }
0x1470   :  { %1209 = vrot.lane.b32.xlu2 %v1208_v41, %s2812_s2 }
0x14ca   :  { %v1210_v42 = vpop.permute.xlu2 %1209 }
0x14cb   :  { %2293 = vmatmul.msk.f32.vlgmr.msrb.gmra.mxu1 %vm202_vm0, %v1210_v42 }
0x1548   :  { %v1230_v43 = vpop.f32.mrf.mxu1 }
0x1549   :  { %v1234_v17 = vrot.slane %v1230_v43, 4 }
0x154b   :  { %v1236_v8 = vadd.f32 %v1234_v17, %v3189_v63 }
0x154d   :  { %2441 = vtanh.f32 %v1236_v8  ;;  %v2294_v44 = vmul.f32 -1.442695, %v1236_v8 }
0x154f   :  { %2443 = vpow2.f32 %v2294_v44 }
0x1553   :  { %v2442_v0 = vpop.eup %2441 }
0x1554   :  { %1262 = vrot.lane.b32.xlu0 %v2442_v0, %s2811_s1 }
0x1555   :  { %v2444_v1 = vpop.eup %2443 }
0x1556   :  { %v1240_v45 = vadd.f32 1.0, %v2444_v1 }
0x1558   :  { %2445 = vrcp.f32 %v1240_v45  ;;  %v1252_v50 = vand.u32 2147483648, %v1240_v45  ;;  %vm1246_vm9 = vweird.f32 %v1240_v45  ;;  %v1250_v51 = vand.u32 2147483647, %v1240_v45 }
0x155a   :  { %v1253_v53 = vor.u32 1.1754944e-38, %v1252_v50  ;;  %vm1251_vm11 = vcmp.eq.f32.partialorder %v1250_v51, 8.507059e+37 }
0x155e   :  { %v2446_v46 = vpop.eup %2445 }
0x155f   :  { %v1242_v47 = vmul.f32 %v2446_v46, %v1240_v45  ;;  %vm1247_vm8 = vweird.f32 %v2446_v46 }
0x1560   :  { %vm1248_vm10 = vmor %vm1246_vm9, %vm1247_vm8 }
0x1561   :  { %v1243_v48 = vsub.f32 1.0, %v1242_v47 }
0x1563   :  { %v1244_v24 = vmul.f32 %v2446_v46, %v1243_v48 }
0x1565   :  { %v1245_v49 = vadd.f32 %v2446_v46, %v1244_v24 }
0x1567   :  { %v1249_v52 = vsel %vm1248_vm10, %v2446_v46, %v1245_v49  ;;  %vm484_vm10 = vcmask 259076  }
0x1568   :  { %v1254_v54 = vsel %vm1251_vm11, %v1253_v53, %v1249_v52  ;;  %vm409_vm11 = vcmask 257026  }
0x1569   :  { %v1260_v57 = vmul.f32 %v1258_v56, %v1254_v54 }
0x15c6   :  { %v1263_v13 = vpop.permute.xlu0 %1262 }
0x15c7   :  { %v1265_v55 = vmul.f32 %v1263_v13, %v1254_v54 }
0x15c9   :  { %1267 = vrot.lane.b32.xlu1 %v1265_v55, %s2812_s2 }
0x163b   :  { %v1268_v58 = vpop.permute.xlu1 %1267 }
0x163c   :  { %v1270_v59 = vadd.f32 %v1268_v58, %v1260_v57 }
0x163e   :  { %2447 = vtanh.f32 %v1270_v59  ;;  %v1332_v43 = vrot.slane %v1270_v59, 2 }
0x1644   :  { %v2448_v60 = vpop.eup %2447 }
0x1645   :  { %1273 = vrot.lane.b32.xlu2 %v2448_v60, %s2811_s1 }
0x169f   :  { %v1274_v3 = vpop.permute.xlu2 %1273 }
0x16a0   :  { %v3204_v5 = vmul.f32 %v1274_v3, %v1254_v54  ;;  %v827_v3 = vrot.slane %v3157_v26, 6 }
0x16a2   :  { %v1282_v7 = vrot.slane %v3204_v5, 4 }
0x16a4   :  { %1283 = vrot.lane.b32.xlu0 %v1282_v7, %s2812_s2 }
0x1716   :  { %v1284_v16 = vpop.permute.xlu0 %1283 }
0x1717   :  { %2295 = vmatmul.msk.f32.vlgmr.msra.gmra.mxu2 %vm202_vm0, %v1284_v16 }
0x179a   :  { %v1304_v4 = vpop.f32.mrf.mxu2 }
0x179b   :  { %v1308_v6 = vrot.slane %v1304_v4, 6 }
0x179d   :  { %v1310_v21 = vadd.f32 %v1308_v6, %v3189_v63 }
0x179f   :  { %2449 = vtanh.f32 %v1310_v21  ;;  %v2296_v12 = vmul.f32 -1.442695, %v1310_v21 }
0x17a1   :  { %2451 = vpow2.f32 %v2296_v12 }
0x17a5   :  { %v2450_v23 = vpop.eup %2449 }
0x17a6   :  { %1336 = vrot.lane.b32.xlu1 %v2450_v23, %s2811_s1 }
0x17a7   :  { %v2452_v27 = vpop.eup %2451 }
0x17a8   :  { %v1314_v62 = vadd.f32 1.0, %v2452_v27 }
0x17aa   :  { %2453 = vrcp.f32 %v1314_v62  ;;  %v1326_v30 = vand.u32 2147483648, %v1314_v62  ;;  %vm1320_vm13 = vweird.f32 %v1314_v62  ;;  %v1324_v31 = vand.u32 2147483647, %v1314_v62 }
0x17ab   :  { %2455 = vtanh.f32 %v805_v61 }
0x17ac   :  { %v1327_v34 = vor.u32 1.1754944e-38, %v1326_v30  ;;  %vm1325_vm15 = vcmp.eq.f32.partialorder %v1324_v31, 8.507059e+37 }
0x17b0   :  { %v2454_v10 = vpop.eup %2453 }
0x17b1   :  { %v1316_v18 = vmul.f32 %v2454_v10, %v1314_v62  ;;  %vm1321_vm12 = vweird.f32 %v2454_v10  ;;  %v2456_v42 = vpop.eup %2455 }
0x17b2   :  { %vm1322_vm14 = vmor %vm1320_vm13, %vm1321_vm12  ;;  %vm559_vm12 = vcmask 261126  }
0x17b3   :  { %v1317_v22 = vsub.f32 1.0, %v1316_v18 }
0x17b5   :  { %v1318_v11 = vmul.f32 %v2454_v10, %v1317_v22 }
0x17b7   :  { %v1319_v29 = vadd.f32 %v2454_v10, %v1318_v11 }
0x17b9   :  { %v1323_v33 = vsel %vm1322_vm14, %v2454_v10, %v1319_v29 }
0x17ba   :  { %v1328_v38 = vsel %vm1325_vm15, %v1327_v34, %v1323_v33 }
0x17bb   :  { %v1334_v17 = vmul.f32 %v1332_v43, %v1328_v38 }
0x1818   :  { %v1337_v36 = vpop.permute.xlu1 %1336 }
0x1819   :  { %v1339_v41 = vmul.f32 %v1337_v36, %v1328_v38 }
0x181b   :  { %1341 = vrot.lane.b32.xlu2 %v1339_v41, %s2812_s2 }
0x1823   :  { %831 = vrot.lane.b32.xlu2 %v2456_v42, %s2811_s1 }
0x1875   :  { %v1342_v8 = vpop.permute.xlu2 %1341 }
0x1876   :  { %v3215_v0 = vadd.f32 %v1342_v8, %v1334_v17  ;;  %v1438_v17 = vld [vmem:[#allocation8 + $0x30] sm:$0xff]  ;;  %v1439_v8 = vld [vmem:[#allocation8 + $0x38] sm:$0xff] }
0x1877   :  { %1458 = vmatpush.msra.mxu0 %v1438_v17  ;;  %1481 = vmatpush.msra.mxu1 %v1439_v8 }
0x1878   :  { %2457 = vtanh.f32 %v3215_v0  ;;  %v1403_v61 = vrot.slane %v3215_v0, 2  ;;  %v1436_v0 = vld [vmem:[#allocation8 + $0x20] sm:$0xff] }
0x1879   :  { %2459 = vpow2.f32 %v2283_v19  ;;  %v1434_v19 = vld [vmem:[#allocation8 + $0x10] sm:$0xff]  ;;  %1459 = vmatpush.msra.mxu0 %v1436_v0 }
0x187b   :  { %1460 = vmatpush.msra.mxu0 %v1434_v19 }
0x187d   :  { %v832_v54 = vpop.permute.xlu2 %831 }
0x187e   :  { %v2458_v39 = vpop.eup %2457 }
0x187f   :  { %1347 = vrot.lane.b32.xlu0 %v2458_v39, %s2811_s1  ;;  %v2460_v44 = vpop.eup %2459  ;;  %v1437_v39 = vld [vmem:[#allocation8 + $0x28] sm:$0xff] }
0x1880   :  { %v809_v1 = vadd.f32 1.0, %v2460_v44  ;;  %v1435_v44 = vld [vmem:[#allocation8 + $0x18] sm:$0xff]  ;;  %1482 = vmatpush.msra.mxu1 %v1437_v39 }
0x1882   :  { %2461 = vrcp.f32 %v809_v1  ;;  %v821_v52 = vand.u32 2147483648, %v809_v1  ;;  %vm815_vm2 = vweird.f32 %v809_v1  ;;  %v819_v53 = vand.u32 2147483647, %v809_v1  ;;  %1483 = vmatpush.msra.mxu1 %v1435_v44 }
0x1884   :  { %v822_v55 = vor.u32 1.1754944e-38, %v821_v52  ;;  %vm820_vm4 = vcmp.eq.f32.partialorder %v819_v53, 8.507059e+37  ;;  %v1564_v52 = vld [vmem:[#allocation11 + $0x18] sm:$0xff] }
0x1885   :  { %v1506_v53 = vld [vmem:[#allocation9 + $0x38] sm:$0xff] }
0x1886   :  { %1548 = vmatpush.msrb.mxu3 %v1506_v53 }
0x1888   :  { %v2462_v45 = vpop.eup %2461 }
0x1889   :  { %v811_v46 = vmul.f32 %v2462_v45, %v809_v1  ;;  %vm816_vm1 = vweird.f32 %v2462_v45  ;;  %v1433_v1 = vld [vmem:[#allocation8 + $0x8] sm:$0xff] }
0x188a   :  { %vm817_vm3 = vmor %vm815_vm2, %vm816_vm1  ;;  %1484 = vmatpush.msra.mxu1 %v1433_v1 }
0x188b   :  { %v812_v47 = vsub.f32 1.0, %v811_v46 }
0x188c   :  { %1640 = vmatpush.msrb.mxu1 %v1564_v52 }
0x188d   :  { %v813_v48 = vmul.f32 %v2462_v45, %v812_v47 }
0x188f   :  { %v814_v50 = vadd.f32 %v2462_v45, %v813_v48 }
0x1891   :  { %v818_v13 = vsel %vm817_vm3, %v2462_v45, %v814_v50 }
0x1892   :  { %v3223_v56 = vsel %vm820_vm4, %v822_v55, %v818_v13  ;;  %v1503_v13 = vld [vmem:[#allocation9 + $0x20] sm:$0xff]  ;;  %v1501_v55 = vld [vmem:[#allocation9 + $0x10] sm:$0xff] }
0x1893   :  { %v834_v57 = vmul.f32 %v832_v54, %v3223_v56  ;;  %v829_v16 = vmul.f32 %v827_v3, %v3223_v56  ;;  %v1504_v54 = vld [vmem:[#allocation9 + $0x28] sm:$0xff]  ;;  %v1561_v3 = vld [vmem:[#allocation11] sm:$0xff] }
0x1894   :  { %1549 = vmatpush.msrb.mxu3 %v1504_v54 }
0x18f1   :  { %v1348_v24 = vpop.permute.xlu0 %1347 }
0x18f2   :  { %v3219_v49 = vmul.f32 %v1348_v24, %v1328_v38 }
0x18f4   :  { %v1356_v51 = vrot.slane %v3219_v49, 2 }
0x18f6   :  { %1357 = vrot.lane.b32.xlu1 %v1356_v51, %s2812_s2  ;;  %v1505_v51 = vld [vmem:[#allocation9 + $0x30] sm:$0xff] }
0x18f7   :  { %1525 = vmatpush.msrb.mxu2 %v1505_v51 }
0x18f9   :  { %1526 = vmatpush.msrb.mxu2 %v1503_v13 }
0x18fb   :  { %1527 = vmatpush.msrb.mxu2 %v1501_v55 }
0x18fe   :  { %836 = vrot.lane.b32.xlu1 %v834_v57, %s2812_s2  ;;  %v1502_v57 = vld [vmem:[#allocation9 + $0x18] sm:$0xff] }
0x18ff   :  { %1550 = vmatpush.msrb.mxu3 %v1502_v57 }
0x1968   :  { %v1358_v58 = vpop.permute.xlu1 %1357 }
0x1969   :  { %2297 = vmatmul.msk.f32.vlgmr.msra.gmra.mxu3 %vm202_vm0, %v1358_v58  ;;  %v1499_v58 = vld [vmem:[#allocation9] sm:$0xff] }
0x196a   :  { %1528 = vmatpush.msrb.mxu2 %v1499_v58 }
0x196c   :  { %1710 = vmatpush.msra.mxu2 %v1564_v52 }
0x1970   :  { %v837_v7 = vpop.permute.xlu1 %836 }
0x1971   :  { %v839_v4 = vadd.f32 %v837_v7, %v829_v16 }
0x19ec   :  { %v1378_v59 = vpop.f32.mrf.mxu3 }
0x19ed   :  { %v1381_v60 = vadd.f32 %v1378_v59, %v3189_v63  ;;  %v1500_v59 = vld [vmem:[#allocation9 + $0x8] sm:$0xff] }
0x19ee   :  { %1551 = vmatpush.msrb.mxu3 %v1500_v59 }
0x19ef   :  { %2463 = vtanh.f32 %v1381_v60  ;;  %v2298_v26 = vmul.f32 -1.442695, %v1381_v60  ;;  %v1562_v60 = vld [vmem:[#allocation11 + $0x8] sm:$0xff] }
0x19f0   :  { %2465 = vtanh.f32 %v839_v4  ;;  %1780 = vmatpush.msra.mxu3 %v1564_v52 }
0x19f1   :  { %2467 = vpow2.f32 %v2298_v26 }
0x19f5   :  { %v2464_v6 = vpop.eup %2463 }
0x19f6   :  { %1407 = vrot.lane.b32.xlu0 %v2464_v6, %s2811_s1  ;;  %v2466_v21 = vpop.eup %2465  ;;  %v3275_v6 = vld [vmem:[%s3383_s7] sm:$0x3] }
0x19f7   :  { %v2468_v63 = vpop.eup %2467 }
0x19f8   :  { %v1385_v23 = vadd.f32 1.0, %v2468_v63 }
0x19fa   :  { %2469 = vrcp.f32 %v1385_v23  ;;  %v1397_v22 = vand.u32 2147483648, %v1385_v23  ;;  %vm1391_vm7 = vweird.f32 %v1385_v23 }
0x19fe   :  { %842 = vrot.lane.b32.xlu0 %v2466_v21, %s2811_s1  ;;  %v1492_v21 = vperm.slane %v3275_v6, 0 }
0x1a00   :  { %v2470_v12 = vpop.eup %2469 }
0x1a01   :  { %v1387_v27 = vmul.f32 %v2470_v12, %v1385_v23  ;;  %vm1392_vm6 = vweird.f32 %v2470_v12 }
0x1a02   :  { %vm1393_vm8 = vmor %vm1391_vm7, %vm1392_vm6 }
0x1a03   :  { %v1388_v62 = vsub.f32 1.0, %v1387_v27 }
0x1a05   :  { %v1389_v10 = vmul.f32 %v2470_v12, %v1388_v62 }
0x1a06   :  { %481 = vrot.lane.b32.xlu0 %v3025_v37, %s2812_s2  ;;  %v1395_v37 = vand.u32 2147483647, %v1385_v23 }
0x1a07   :  { %v1390_v18 = vadd.f32 %v2470_v12, %v1389_v10 }
0x1a08   :  { %vm1396_vm9 = vcmp.eq.f32.partialorder %v1395_v37, 8.507059e+37 }
0x1a09   :  { %v1394_v11 = vsel %vm1393_vm8, %v2470_v12, %v1390_v18 }
0x1a0e   :  { %773 = vrot.lane.b32.xlu0 %v3163_v14, %s2812_s2  ;;  %v1398_v14 = vor.u32 1.1754944e-38, %v1397_v22 }
0x1a16   :  { %1278 = vrot.lane.b32.xlu0 %v3204_v5, %s2812_s2  ;;  %v1399_v5 = vsel %vm1396_vm9, %v1398_v14, %v1394_v11 }
0x1a17   :  { %v1405_v36 = vmul.f32 %v1403_v61, %v1399_v5 }
0x1a68   :  { %v1408_v29 = vpop.permute.xlu0 %1407 }
0x1a69   :  { %v1410_v30 = vmul.f32 %v1408_v29, %v1399_v5 }
0x1a6b   :  { %1412 = vrot.lane.b32.xlu2 %v1410_v30, %s2812_s2 }
0x1a70   :  { %v843_v31 = vpop.permute.xlu0 %842 }
0x1a73   :  { %406 = vrot.lane.b32.xlu2 %v3016_v2, %s2812_s2 }
0x1a78   :  { %v482_v32 = vpop.permute.xlu0 %481 }
0x1a79   :  { %485 = vst.msk [vmem:[#allocation2] sm:$0x30] %vm484_vm10, %v482_v32 }
0x1a7b   :  { %699 = vrot.lane.b32.xlu2 %v3136_v25, %s2812_s2 }
0x1a80   :  { %v774_v33 = vpop.permute.xlu0 %773 }
0x1a81   :  { %776 = vst.msk [vmem:[#allocation2 + $0x8] sm:$0x30] %vm484_vm10, %v774_v33 }
0x1a83   :  { %1204 = vrot.lane.b32.xlu2 %v3195_v40, %s2812_s2  ;;  %v845_v40 = vmul.f32 %v843_v31, %v3223_v56  ;;  %v1563_v56 = vld [vmem:[#allocation11 + $0x10] sm:$0xff] }
0x1a84   :  { %1641 = vmatpush.msrb.mxu1 %v1563_v56  ;;  %1711 = vmatpush.msra.mxu2 %v1563_v56 }
0x1a85   :  { %1781 = vmatpush.msra.mxu3 %v1563_v56 }
0x1a86   :  { %1642 = vmatpush.msrb.mxu1 %v1562_v60  ;;  %1712 = vmatpush.msra.mxu2 %v1562_v60 }
0x1a87   :  { %1782 = vmatpush.msra.mxu3 %v1562_v60 }
0x1a88   :  { %v1279_v34 = vpop.permute.xlu0 %1278  ;;  %1643 = vmatpush.msrb.mxu1 %v1561_v3  ;;  %1713 = vmatpush.msra.mxu2 %v1561_v3 }
0x1a89   :  { %1281 = vst.msk [vmem:[#allocation2 + $0x10] sm:$0x30] %vm484_vm10, %v1279_v34  ;;  %1783 = vmatpush.msra.mxu3 %v1561_v3 }
0x1ac5   :  { %v1413_v2 = vpop.permute.xlu2 %1412 }
0x1ac6   :  { %v1415_v38 = vadd.f32 %v1413_v2, %v1405_v36 }
0x1ac8   :  { %2471 = vtanh.f32 %v1415_v38 }
0x1acd   :  { %v407_v41 = vpop.permute.xlu2 %406 }
0x1ace   :  { %v2472_v42 = vpop.eup %2471  ;;  %410 = vst.msk [vmem:[#allocation2] sm:$0xc] %vm409_vm11, %v407_v41 }
0x1acf   :  { %1418 = vrot.lane.b32.xlu1 %v2472_v42, %s2811_s1 }
0x1ad5   :  { %v700_v25 = vpop.permute.xlu2 %699 }
0x1ad6   :  { %702 = vst.msk [vmem:[#allocation2 + $0x8] sm:$0xc] %vm409_vm11, %v700_v25 }
0x1ad7   :  { %556 = vrot.lane.b32.xlu1 %v3048_v15, %s2812_s2  ;;  %v1432_v15 = vld [vmem:[#allocation8] sm:$0xff] }
0x1ad8   :  { %1461 = vmatpush.msra.mxu0 %v1432_v15 }
0x1ada   :  { %1577 = vmatpush.msrb.mxu0 %v1564_v52 }
0x1adc   :  { %1578 = vmatpush.msrb.mxu0 %v1563_v56 }
0x1add   :  { %v1205_v43 = vpop.permute.xlu2 %1204 }
0x1ade   :  { %1207 = vst.msk [vmem:[#allocation2 + $0x10] sm:$0xc0] %vm559_vm12, %v1205_v43  ;;  %1579 = vmatpush.msrb.mxu0 %v1562_v60 }
0x1adf   :  { %847 = vrot.lane.b32.xlu1 %v845_v40, %s2812_s2 }
0x1ae0   :  { %1580 = vmatpush.msrb.mxu0 %v1561_v3 }
0x1ae7   :  { %1352 = vrot.lane.b32.xlu1 %v3219_v49, %s2812_s2 }
0x1b41   :  { %v1419_v45 = vpop.permute.xlu1 %1418 }
0x1b42   :  { %v1421_v46 = vmul.f32 %v1419_v45, %v1399_v5 }
0x1b44   :  { %1423 = vrot.lane.b32.xlu2 %v1421_v46, %s2812_s2 }
0x1b49   :  { %v557_v47 = vpop.permute.xlu1 %556 }
0x1b4a   :  { %560 = vst.msk [vmem:[#allocation2] sm:$0xc0] %vm559_vm12, %v557_v47 }
0x1b51   :  { %v848_v48 = vpop.permute.xlu1 %847  ;;  %v1428_v24 = vld [vmem:[#allocation2] sm:$0xff] }
0x1b52   :  { %850 = vst.msk [vmem:[#allocation2 + $0x8] sm:$0xc0] %vm559_vm12, %v848_v48  ;;  %2299 = vmatmul.msk.f32.vlgmr.msra.gmra.mxu0 %vm202_vm0, %v1428_v24  ;;  %2301 = vmatmul.msk.f32.vlgmr.msra.gmra.mxu1 %vm202_vm0, %v1428_v24 }
0x1b53   :  { %1850 = vmatpush.msra.mxu0 %v1564_v52  ;;  %1916 = vmatpush.msra.mxu1 %v1564_v52 }
0x1b55   :  { %1851 = vmatpush.msra.mxu0 %v1563_v56  ;;  %1917 = vmatpush.msra.mxu1 %v1563_v56 }
0x1b57   :  { %1852 = vmatpush.msra.mxu0 %v1562_v60  ;;  %1918 = vmatpush.msra.mxu1 %v1562_v60 }
0x1b59   :  { %v1353_v49 = vpop.permute.xlu1 %1352  ;;  %v1429_v50 = vld [vmem:[#allocation2 + $0x8] sm:$0xff]  ;;  %1853 = vmatpush.msra.mxu0 %v1561_v3  ;;  %1919 = vmatpush.msra.mxu1 %v1561_v3 }
0x1b5a   :  { %1355 = vst.msk [vmem:[#allocation2 + $0x10] sm:$0xc] %vm409_vm11, %v1353_v49  ;;  %2300 = vmatmul.msk.f32.gmra.mxu0 %vm202_vm0, %v1429_v50  ;;  %2302 = vmatmul.msk.f32.gmra.mxu1 %vm202_vm0, %v1429_v50 }
0x1b62   :  { %1581 = vmatmul.f32.vlgmr.msrb.gmra.mxu0 %v2810_v9 }
0x1b9e   :  { %v1424_v7 = vpop.permute.xlu2 %1423 }
0x1b9f   :  { %1426 = vst.msk [vmem:[#allocation2 + $0x10] sm:$0x3] %vm337_vm5, %v1424_v7 }
0x1ba6   :  { %v1430_v16 = vld [vmem:[#allocation2 + $0x10] sm:$0xff] }
0x1ba7   :  { %2303 = vmatmul.msk.f32.vlgmr.msrb.gmra.mxu2 %vm202_vm0, %v1430_v16  ;;  %2305 = vmatmul.msk.f32.vlgmr.msrb.gmra.mxu3 %vm202_vm0, %v1430_v16 }
0x1ba8   :  { %1986 = vmatpush.msrb.mxu2 %v1564_v52  ;;  %2056 = vmatpush.msrb.mxu3 %v1564_v52 }
0x1baa   :  { %1987 = vmatpush.msrb.mxu2 %v1563_v56  ;;  %2057 = vmatpush.msrb.mxu3 %v1563_v56 }
0x1bac   :  { %1988 = vmatpush.msrb.mxu2 %v1562_v60  ;;  %2058 = vmatpush.msrb.mxu3 %v1562_v60 }
0x1bae   :  { %1989 = vmatpush.msrb.mxu2 %v1561_v3  ;;  %2059 = vmatpush.msrb.mxu3 %v1561_v3 }
0x1bcf   :  { %v1463_v9 = vpop.f32.mrf.mxu0  ;;  %v1486_v4 = vpop.f32.mrf.mxu1 }
0x1bd0   :  { %v1496_v23 = vadd.f32 %v1492_v21, %v1463_v9 }
0x1bd7   :  { %v1466_v26 = vpop.f32.mrf.mxu0  ;;  %v3288_v39 = vpop.f32.mrf.mxu1 }
0x1bd8   :  { %v3278_v63 = vadd.f32 %v1492_v21, %v1466_v26 }
0x1bdf   :  { %v1582_v12 = vpop.f32.mrf.mxu0 }
0x1c2a   :  { %v1530_v27 = vpop.f32.mrf.mxu2  ;;  %v1553_v62 = vpop.f32.mrf.mxu3 }
0x1c2b   :  { %v3280_v10 = vadd.f32 %v1530_v27, %v1496_v23 }
0x1c2d   :  { %v1585_v18 = vadd.f32 %v1582_v12, %v3280_v10 }
0x1c2f   :  { %2473 = vtanh.f32 %v1585_v18  ;;  %v2307_v37 = vmul.f32 -1.442695, %v1585_v18 }
0x1c31   :  { %2475 = vpow2.f32 %v2307_v37 }
0x1c35   :  { %v2474_v22 = vpop.eup %2473 }
0x1c36   :  { %1608 = vrot.lane.b32.xlu0 %v2474_v22, %s2811_s1 }
0x1c37   :  { %v2476_v11 = vpop.eup %2475 }
0x1c38   :  { %v1589_v14 = vadd.f32 1.0, %v2476_v11 }
0x1c3a   :  { %2477 = vrcp.f32 %v1589_v14  ;;  %v1601_v33 = vand.u32 2147483648, %v1589_v14  ;;  %vm1595_vm13 = vweird.f32 %v1589_v14  ;;  %v1599_v34 = vand.u32 2147483647, %v1589_v14 }
0x1c3c   :  { %v1602_v36 = vor.u32 1.1754944e-38, %v1601_v33  ;;  %vm1600_vm15 = vcmp.eq.f32.partialorder %v1599_v34, 8.507059e+37 }
0x1c40   :  { %v2478_v29 = vpop.eup %2477 }
0x1c41   :  { %v1591_v5 = vmul.f32 %v2478_v29, %v1589_v14  ;;  %vm1596_vm5 = vweird.f32 %v2478_v29 }
0x1c42   :  { %vm1597_vm14 = vmor %vm1595_vm13, %vm1596_vm5 }
0x1c43   :  { %v1592_v30 = vsub.f32 1.0, %v1591_v5 }
0x1c45   :  { %v1593_v31 = vmul.f32 %v2478_v29, %v1592_v30 }
0x1c47   :  { %v1594_v32 = vadd.f32 %v2478_v29, %v1593_v31 }
0x1c49   :  { %v1598_v61 = vsel %vm1597_vm14, %v2478_v29, %v1594_v32 }
0x1c4a   :  { %v1603_v38 = vsel %vm1600_vm15, %v1602_v36, %v1598_v61 }
0x1c4b   :  { %v1606_v42 = vmul.f32 0.0, %v1603_v38 }
0x1ca8   :  { %v1609_v2 = vpop.permute.xlu0 %1608 }
0x1ca9   :  { %v1611_v41 = vmul.f32 %v1609_v2, %v1603_v38 }
0x1cab   :  { %1613 = vrot.lane.b32.xlu1 %v1611_v41, %s2812_s2 }
0x1d1d   :  { %v1614_v25 = vpop.permute.xlu1 %1613 }
0x1d1e   :  { %v1616_v40 = vadd.f32 %v1614_v25, %v1606_v42 }
0x1d20   :  { %2479 = vtanh.f32 %v1616_v40  ;;  %v1673_v58 = vrot.slane %v1616_v40, 6 }
0x1d26   :  { %v2480_v43 = vpop.eup %2479 }
0x1d27   :  { %1619 = vrot.lane.b32.xlu2 %v2480_v43, %s2811_s1 }
0x1d81   :  { %v1620_v17 = vpop.permute.xlu2 %1619 }
0x1d82   :  { %v1622_v8 = vmul.f32 %v1620_v17, %v1603_v38 }
0x1d84   :  { %1624 = vrot.lane.b32.xlu0 %v1622_v8, %s2812_s2 }
0x1df6   :  { %v1625_v0 = vpop.permute.xlu0 %1624 }
0x1df7   :  { %2308 = vmatmul.msk.f32.vlgmr.msrb.gmra.mxu1 %vm202_vm0, %v1625_v0 }
0x1e74   :  { %v1645_v19 = vpop.f32.mrf.mxu1 }
0x1e75   :  { %v1649_v44 = vrot.slane %v1645_v19, 6 }
0x1e77   :  { %v1651_v15 = vadd.f32 %v1649_v44, %v3280_v10 }
0x1e79   :  { %2481 = vtanh.f32 %v1651_v15  ;;  %v2309_v45 = vmul.f32 -1.442695, %v1651_v15 }
0x1e7b   :  { %2483 = vpow2.f32 %v2309_v45 }
0x1e7f   :  { %v2482_v1 = vpop.eup %2481 }
0x1e80   :  { %1677 = vrot.lane.b32.xlu1 %v2482_v1, %s2811_s1 }
0x1e81   :  { %v2484_v46 = vpop.eup %2483 }
0x1e82   :  { %v1655_v47 = vadd.f32 1.0, %v2484_v46 }
0x1e84   :  { %2485 = vrcp.f32 %v1655_v47  ;;  %v1667_v52 = vand.u32 2147483648, %v1655_v47  ;;  %vm1661_vm2 = vweird.f32 %v1655_v47  ;;  %v1665_v53 = vand.u32 2147483647, %v1655_v47 }
0x1e86   :  { %v1668_v54 = vor.u32 1.1754944e-38, %v1667_v52  ;;  %vm1666_vm4 = vcmp.eq.f32.partialorder %v1665_v53, 8.507059e+37 }
0x1e88   :  { %913 = vrot.lane.b32.xlu1 %v3109_v20, %s2812_s2 }
0x1e8a   :  { %v2486_v48 = vpop.eup %2485 }
0x1e8b   :  { %v1657_v24 = vmul.f32 %v2486_v48, %v1655_v47  ;;  %vm1662_vm1 = vweird.f32 %v2486_v48 }
0x1e8c   :  { %vm1663_vm3 = vmor %vm1661_vm2, %vm1662_vm1 }
0x1e8d   :  { %v1658_v49 = vsub.f32 1.0, %v1657_v24 }
0x1e8f   :  { %v1659_v50 = vmul.f32 %v2486_v48, %v1658_v49 }
0x1e91   :  { %v1660_v51 = vadd.f32 %v2486_v48, %v1659_v50 }
0x1e93   :  { %v1664_v13 = vsel %vm1663_vm3, %v2486_v48, %v1660_v51 }
0x1e94   :  { %v1669_v20 = vsel %vm1666_vm4, %v1668_v54, %v1664_v13 }
0x1e95   :  { %v1675_v59 = vmul.f32 %v1673_v58, %v1669_v20 }
0x1ef2   :  { %v1678_v55 = vpop.permute.xlu1 %1677 }
0x1ef3   :  { %v1680_v56 = vmul.f32 %v1678_v55, %v1669_v20 }
0x1ef5   :  { %1682 = vrot.lane.b32.xlu2 %v1680_v56, %s2812_s2 }
0x1efa   :  { %v914_v57 = vpop.permute.xlu1 %913 }
0x1efb   :  { %917 = vst.msk [vmem:[#allocation2 + $0x18] sm:$0xc0] %vm559_vm12, %v914_v57 }
0x1efd   :  { %988 = vrot.lane.b32.xlu2 %v3140_v28, %s2812_s2 }
0x1f4f   :  { %v1683_v60 = vpop.permute.xlu2 %1682 }
0x1f50   :  { %v1685_v3 = vadd.f32 %v1683_v60, %v1675_v59 }
0x1f52   :  { %2487 = vtanh.f32 %v1685_v3  ;;  %v1743_v41 = vrot.slane %v1685_v3, 6 }
0x1f57   :  { %v989_v7 = vpop.permute.xlu2 %988 }
0x1f58   :  { %v2488_v16 = vpop.eup %2487  ;;  %991 = vst.msk [vmem:[#allocation2 + $0x18] sm:$0x30] %vm484_vm10, %v989_v7 }
0x1f59   :  { %1688 = vrot.lane.b32.xlu0 %v2488_v16, %s2811_s1 }
0x1f61   :  { %1062 = vrot.lane.b32.xlu0 %v3167_v35, %s2812_s2 }
0x1fcb   :  { %v1689_v9 = vpop.permute.xlu0 %1688 }
0x1fcc   :  { %v1691_v4 = vmul.f32 %v1689_v9, %v1669_v20 }
0x1fce   :  { %v1693_v21 = vrot.slane %v1691_v4, 2 }
0x1fd0   :  { %1694 = vrot.lane.b32.xlu1 %v1693_v21, %s2812_s2 }
0x1fd3   :  { %v1063_v28 = vpop.permute.xlu0 %1062 }
0x1fd4   :  { %1065 = vst.msk [vmem:[#allocation2 + $0x18] sm:$0xc] %vm409_vm11, %v1063_v28 }
0x1fdb   :  { %v1431_v26 = vld [vmem:[#allocation2 + $0x18] sm:$0xff] }
0x1fdc   :  { %2304 = vmatmul.msk.f32.gmra.mxu2 %vm202_vm0, %v1431_v26  ;;  %2306 = vmatmul.msk.f32.gmra.mxu3 %vm202_vm0, %v1431_v26 }
0x2042   :  { %v1695_v23 = vpop.permute.xlu1 %1694 }
0x2043   :  { %2310 = vmatmul.msk.f32.vlgmr.msra.gmra.mxu2 %vm202_vm0, %v1695_v23 }
0x205f   :  { %v3307_v12 = vpop.f32.mrf.mxu2  ;;  %v3315_v44 = vpop.f32.mrf.mxu3 }
0x2060   :  { %v3325_v28 = vadd.f32 %v3307_v12, %v3278_v63 }
0x20c6   :  { %v1715_v27 = vpop.f32.mrf.mxu2 }
0x20c7   :  { %v1719_v35 = vrot.slane %v1715_v27, 4 }
0x20c9   :  { %v1721_v62 = vadd.f32 %v1719_v35, %v3280_v10 }
0x20cb   :  { %2489 = vtanh.f32 %v1721_v62  ;;  %v2311_v22 = vmul.f32 -1.442695, %v1721_v62 }
0x20cd   :  { %2491 = vpow2.f32 %v2311_v22 }
0x20d1   :  { %v2490_v18 = vpop.eup %2489 }
0x20d2   :  { %1747 = vrot.lane.b32.xlu2 %v2490_v18, %s2811_s1 }
0x20d3   :  { %v2492_v37 = vpop.eup %2491 }
0x20d4   :  { %v1725_v11 = vadd.f32 1.0, %v2492_v37 }
0x20d6   :  { %2493 = vrcp.f32 %v1725_v11  ;;  %v1737_v32 = vand.u32 2147483648, %v1725_v11  ;;  %vm1731_vm7 = vweird.f32 %v1725_v11  ;;  %v1735_v33 = vand.u32 2147483647, %v1725_v11 }
0x20d8   :  { %v1738_v61 = vor.u32 1.1754944e-38, %v1737_v32  ;;  %vm1736_vm9 = vcmp.eq.f32.partialorder %v1735_v33, 8.507059e+37 }
0x20dc   :  { %v2494_v14 = vpop.eup %2493 }
0x20dd   :  { %v1727_v29 = vmul.f32 %v2494_v14, %v1725_v11  ;;  %vm1732_vm6 = vweird.f32 %v2494_v14 }
0x20de   :  { %vm1733_vm8 = vmor %vm1731_vm7, %vm1732_vm6 }
0x20df   :  { %v1728_v5 = vsub.f32 1.0, %v1727_v29 }
0x20e1   :  { %v1729_v30 = vmul.f32 %v2494_v14, %v1728_v5 }
0x20e3   :  { %v1730_v31 = vadd.f32 %v2494_v14, %v1729_v30 }
0x20e5   :  { %v1734_v34 = vsel %vm1733_vm8, %v2494_v14, %v1730_v31 }
0x20e6   :  { %v1739_v2 = vsel %vm1736_vm9, %v1738_v61, %v1734_v34 }
0x20e7   :  { %v1745_v42 = vmul.f32 %v1743_v41, %v1739_v2 }
0x212c   :  { %v1748_v36 = vpop.permute.xlu2 %1747 }
0x212d   :  { %v1750_v38 = vmul.f32 %v1748_v36, %v1739_v2 }
0x212f   :  { %1752 = vrot.lane.b32.xlu0 %v1750_v38, %s2812_s2 }
0x21a1   :  { %v1753_v25 = vpop.permute.xlu0 %1752 }
0x21a2   :  { %v1755_v40 = vadd.f32 %v1753_v25, %v1745_v42 }
0x21a4   :  { %2495 = vtanh.f32 %v1755_v40  ;;  %v1813_v58 = vrot.slane %v1755_v40, 6 }
0x21aa   :  { %v2496_v43 = vpop.eup %2495 }
0x21ab   :  { %1758 = vrot.lane.b32.xlu1 %v2496_v43, %s2811_s1 }
0x221d   :  { %v1759_v17 = vpop.permute.xlu1 %1758 }
0x221e   :  { %v1761_v8 = vmul.f32 %v1759_v17, %v1739_v2 }
0x2220   :  { %v1763_v0 = vrot.slane %v1761_v8, 4 }
0x2222   :  { %1764 = vrot.lane.b32.xlu2 %v1763_v0, %s2812_s2 }
0x227c   :  { %v1765_v19 = vpop.permute.xlu2 %1764 }
0x227d   :  { %2312 = vmatmul.msk.f32.vlgmr.msra.gmra.mxu3 %vm202_vm0, %v1765_v19 }
0x2300   :  { %v1785_v15 = vpop.f32.mrf.mxu3 }
0x2301   :  { %v1789_v1 = vrot.slane %v1785_v15, 2 }
0x2303   :  { %v1791_v45 = vadd.f32 %v1789_v1, %v3280_v10 }
0x2305   :  { %2497 = vtanh.f32 %v1791_v45  ;;  %v2313_v47 = vmul.f32 -1.442695, %v1791_v45 }
0x2307   :  { %2499 = vpow2.f32 %v2313_v47 }
0x230b   :  { %v2498_v46 = vpop.eup %2497 }
0x230c   :  { %1817 = vrot.lane.b32.xlu0 %v2498_v46, %s2811_s1 }
0x230d   :  { %v2500_v48 = vpop.eup %2499 }
0x230e   :  { %v1795_v24 = vadd.f32 1.0, %v2500_v48 }
0x2310   :  { %2501 = vrcp.f32 %v1795_v24  ;;  %v1807_v13 = vand.u32 2147483648, %v1795_v24  ;;  %vm1801_vm11 = vweird.f32 %v1795_v24  ;;  %v1805_v54 = vand.u32 2147483647, %v1795_v24 }
0x2312   :  { %v1808_v55 = vor.u32 1.1754944e-38, %v1807_v13  ;;  %vm1806_vm5 = vcmp.eq.f32.partialorder %v1805_v54, 8.507059e+37 }
0x2316   :  { %v2502_v49 = vpop.eup %2501 }
0x2317   :  { %v1797_v50 = vmul.f32 %v2502_v49, %v1795_v24  ;;  %vm1802_vm10 = vweird.f32 %v2502_v49 }
0x2318   :  { %vm1803_vm12 = vmor %vm1801_vm11, %vm1802_vm10 }
0x2319   :  { %v1798_v51 = vsub.f32 1.0, %v1797_v50 }
0x231b   :  { %v1799_v52 = vmul.f32 %v2502_v49, %v1798_v51 }
0x231d   :  { %v1800_v53 = vadd.f32 %v2502_v49, %v1799_v52 }
0x231f   :  { %v1804_v10 = vsel %vm1803_vm12, %v2502_v49, %v1800_v53 }
0x2320   :  { %v1809_v56 = vsel %vm1806_vm5, %v1808_v55, %v1804_v10 }
0x2321   :  { %v1815_v59 = vmul.f32 %v1813_v58, %v1809_v56 }
0x237e   :  { %v1818_v20 = vpop.permute.xlu0 %1817 }
0x237f   :  { %v1820_v57 = vmul.f32 %v1818_v20, %v1809_v56 }
0x2381   :  { %1822 = vrot.lane.b32.xlu1 %v1820_v57, %s2812_s2 }
0x23f3   :  { %v1823_v60 = vpop.permute.xlu1 %1822 }
0x23f4   :  { %v1825_v3 = vadd.f32 %v1823_v60, %v1815_v59 }
0x23f6   :  { %2503 = vtanh.f32 %v1825_v3  ;;  %v1880_v34 = vrot.slane %v1825_v3, 6 }
0x23fc   :  { %v2504_v7 = vpop.eup %2503 }
0x23fd   :  { %1828 = vrot.lane.b32.xlu2 %v2504_v7, %s2811_s1 }
0x2457   :  { %v1829_v16 = vpop.permute.xlu2 %1828 }
0x2458   :  { %v1831_v9 = vmul.f32 %v1829_v16, %v1809_v56 }
0x245a   :  { %v1833_v4 = vrot.slane %v1831_v9, 6 }
0x245c   :  { %1834 = vrot.lane.b32.xlu0 %v1833_v4, %s2812_s2 }
0x24ce   :  { %v1835_v21 = vpop.permute.xlu0 %1834 }
0x24cf   :  { %2314 = vmatmul.msk.f32.vlgmr.msra.gmra.mxu0 %vm202_vm0, %v1835_v21 }
0x254c   :  { %v1855_v26 = vpop.f32.mrf.mxu0 }
0x254d   :  { %v1858_v23 = vadd.f32 %v1855_v26, %v3325_v28 }
0x254f   :  { %2505 = vtanh.f32 %v1858_v23  ;;  %v2315_v35 = vmul.f32 -1.442695, %v1858_v23 }
0x2551   :  { %2507 = vpow2.f32 %v2315_v35 }
0x2555   :  { %v2506_v27 = vpop.eup %2505 }
0x2556   :  { %1884 = vrot.lane.b32.xlu1 %v2506_v27, %s2811_s1 }
0x2557   :  { %v2508_v62 = vpop.eup %2507 }
0x2558   :  { %v1862_v18 = vadd.f32 1.0, %v2508_v62 }
0x255a   :  { %2509 = vrcp.f32 %v1862_v18  ;;  %v1874_v63 = vand.u32 2147483648, %v1862_v18  ;;  %vm1868_vm14 = vweird.f32 %v1862_v18  ;;  %v1872_v12 = vand.u32 2147483647, %v1862_v18 }
0x255c   :  { %v1875_v30 = vor.u32 1.1754944e-38, %v1874_v63  ;;  %vm1873_vm1 = vcmp.eq.f32.partialorder %v1872_v12, 8.507059e+37 }
0x2560   :  { %v2510_v22 = vpop.eup %2509 }
0x2561   :  { %v1864_v37 = vmul.f32 %v2510_v22, %v1862_v18  ;;  %vm1869_vm13 = vweird.f32 %v2510_v22 }
0x2562   :  { %vm1870_vm15 = vmor %vm1868_vm14, %vm1869_vm13 }
0x2563   :  { %v1865_v11 = vsub.f32 1.0, %v1864_v37 }
0x2565   :  { %v1866_v14 = vmul.f32 %v2510_v22, %v1865_v11 }
0x2567   :  { %v1867_v29 = vadd.f32 %v2510_v22, %v1866_v14 }
0x2569   :  { %v1871_v5 = vsel %vm1870_vm15, %v2510_v22, %v1867_v29 }
0x256a   :  { %v1876_v32 = vsel %vm1873_vm1, %v1875_v30, %v1871_v5 }
0x256b   :  { %v1882_v61 = vmul.f32 %v1880_v34, %v1876_v32 }
0x25c8   :  { %v1885_v31 = vpop.permute.xlu1 %1884 }
0x25c9   :  { %v1887_v33 = vmul.f32 %v1885_v31, %v1876_v32 }
0x25cb   :  { %1889 = vrot.lane.b32.xlu2 %v1887_v33, %s2812_s2 }
0x2625   :  { %v1890_v36 = vpop.permute.xlu2 %1889 }
0x2626   :  { %v1892_v2 = vadd.f32 %v1890_v36, %v1882_v61 }
0x2628   :  { %2511 = vtanh.f32 %v1892_v2  ;;  %v1949_v54 = vrot.slane %v1892_v2, 6 }
0x262e   :  { %v2512_v38 = vpop.eup %2511 }
0x262f   :  { %1895 = vrot.lane.b32.xlu0 %v2512_v38, %s2811_s1 }
0x26a1   :  { %v1896_v41 = vpop.permute.xlu0 %1895 }
0x26a2   :  { %v1898_v42 = vmul.f32 %v1896_v41, %v1876_v32  ;;  %v1493_v32 = vperm.slane %v3275_v6, 1 }
0x26a4   :  { %1900 = vrot.lane.b32.xlu1 %v1898_v42, %s2812_s2  ;;  %v1498_v34 = vadd.f32 %v1493_v32, %v3288_v39  ;;  %v2147_v32 = vld [vmem:[#allocation14 + $0x10] sm:$0xff] }
0x26a6   :  { %v1560_v61 = vadd.f32 %v3315_v44, %v1498_v34  ;;  %v2145_v34 = vld [vmem:[#allocation14] sm:$0xff] }
0x2716   :  { %v1901_v25 = vpop.permute.xlu1 %1900 }
0x2717   :  { %2316 = vmatmul.msk.f32.vlgmr.msra.gmra.mxu1 %vm202_vm0, %v1901_v25  ;;  %v2322_v25 = vmul.f32 -1.442695, %v1560_v61 }
0x2794   :  { %v1921_v40 = vpop.f32.mrf.mxu1 }
0x2795   :  { %v1925_v43 = vrot.slane %v1921_v40, 6 }
0x2797   :  { %v1927_v17 = vadd.f32 %v1925_v43, %v3325_v28 }
0x2799   :  { %2513 = vtanh.f32 %v1927_v17  ;;  %v2317_v0 = vmul.f32 -1.442695, %v1927_v17 }
0x279b   :  { %2515 = vpow2.f32 %v2317_v0 }
0x279f   :  { %v2514_v8 = vpop.eup %2513 }
0x27a0   :  { %1953 = vrot.lane.b32.xlu2 %v2514_v8, %s2811_s1 }
0x27a1   :  { %v2516_v19 = vpop.eup %2515 }
0x27a2   :  { %v1931_v15 = vadd.f32 1.0, %v2516_v19 }
0x27a4   :  { %2517 = vrcp.f32 %v1931_v15  ;;  %v1943_v24 = vand.u32 2147483648, %v1931_v15  ;;  %vm1937_vm3 = vweird.f32 %v1931_v15  ;;  %v1941_v49 = vand.u32 2147483647, %v1931_v15 }
0x27a6   :  { %v1944_v51 = vor.u32 1.1754944e-38, %v1943_v24  ;;  %vm1942_vm6 = vcmp.eq.f32.partialorder %v1941_v49, 8.507059e+37 }
0x27aa   :  { %v2518_v1 = vpop.eup %2517 }
0x27ab   :  { %v1933_v45 = vmul.f32 %v2518_v1, %v1931_v15  ;;  %vm1938_vm2 = vweird.f32 %v2518_v1 }
0x27ac   :  { %vm1939_vm4 = vmor %vm1937_vm3, %vm1938_vm2 }
0x27ad   :  { %v1934_v46 = vsub.f32 1.0, %v1933_v45 }
0x27af   :  { %v1935_v47 = vmul.f32 %v2518_v1, %v1934_v46 }
0x27b1   :  { %v1936_v48 = vadd.f32 %v2518_v1, %v1935_v47 }
0x27b3   :  { %v1940_v50 = vsel %vm1939_vm4, %v2518_v1, %v1936_v48 }
0x27b4   :  { %v1945_v53 = vsel %vm1942_vm6, %v1944_v51, %v1940_v50 }
0x27b5   :  { %v1951_v10 = vmul.f32 %v1949_v54, %v1945_v53 }
0x27fa   :  { %v1954_v52 = vpop.permute.xlu2 %1953 }
0x27fb   :  { %v1956_v13 = vmul.f32 %v1954_v52, %v1945_v53 }
0x27fd   :  { %1958 = vrot.lane.b32.xlu0 %v1956_v13, %s2812_s2 }
0x286f   :  { %v1959_v55 = vpop.permute.xlu0 %1958 }
0x2870   :  { %v1961_v20 = vadd.f32 %v1959_v55, %v1951_v10 }
0x2872   :  { %2519 = vtanh.f32 %v1961_v20  ;;  %v2019_v5 = vrot.slane %v1961_v20, 6 }
0x2878   :  { %v2520_v56 = vpop.eup %2519 }
0x2879   :  { %1964 = vrot.lane.b32.xlu1 %v2520_v56, %s2811_s1 }
0x28eb   :  { %v1965_v57 = vpop.permute.xlu1 %1964 }
0x28ec   :  { %v1967_v58 = vmul.f32 %v1965_v57, %v1945_v53 }
0x28ee   :  { %v1969_v59 = vrot.slane %v1967_v58, 2 }
0x28f0   :  { %1970 = vrot.lane.b32.xlu2 %v1969_v59, %s2812_s2 }
0x294a   :  { %v1971_v60 = vpop.permute.xlu2 %1970 }
0x294b   :  { %2318 = vmatmul.msk.f32.vlgmr.msrb.gmra.mxu2 %vm202_vm0, %v1971_v60 }
0x29ce   :  { %v1991_v3 = vpop.f32.mrf.mxu2 }
0x29cf   :  { %v1995_v7 = vrot.slane %v1991_v3, 4 }
0x29d1   :  { %v1997_v16 = vadd.f32 %v1995_v7, %v3325_v28 }
0x29d3   :  { %2521 = vtanh.f32 %v1997_v16  ;;  %v2319_v4 = vmul.f32 -1.442695, %v1997_v16 }
0x29d5   :  { %2523 = vpow2.f32 %v2319_v4 }
0x29d9   :  { %v2522_v9 = vpop.eup %2521 }
0x29da   :  { %2023 = vrot.lane.b32.xlu0 %v2522_v9, %s2811_s1 }
0x29db   :  { %v2524_v21 = vpop.eup %2523 }
0x29dc   :  { %v2001_v26 = vadd.f32 1.0, %v2524_v21 }
0x29de   :  { %2525 = vrcp.f32 %v2001_v26  ;;  %v2013_v22 = vand.u32 2147483648, %v2001_v26  ;;  %vm2007_vm8 = vweird.f32 %v2001_v26  ;;  %v2011_v37 = vand.u32 2147483647, %v2001_v26 }
0x29e0   :  { %v2014_v14 = vor.u32 1.1754944e-38, %v2013_v22  ;;  %vm2012_vm10 = vcmp.eq.f32.partialorder %v2011_v37, 8.507059e+37 }
0x29e4   :  { %v2526_v23 = vpop.eup %2525 }
0x29e5   :  { %v2003_v27 = vmul.f32 %v2526_v23, %v2001_v26  ;;  %vm2008_vm7 = vweird.f32 %v2526_v23 }
0x29e6   :  { %vm2009_vm9 = vmor %vm2007_vm8, %vm2008_vm7 }
0x29e7   :  { %v2004_v35 = vsub.f32 1.0, %v2003_v27 }
0x29e9   :  { %v2005_v62 = vmul.f32 %v2526_v23, %v2004_v35 }
0x29eb   :  { %v2006_v18 = vadd.f32 %v2526_v23, %v2005_v62 }
0x29ed   :  { %v2010_v11 = vsel %vm2009_vm9, %v2526_v23, %v2006_v18 }
0x29ee   :  { %v2015_v63 = vsel %vm2012_vm10, %v2014_v14, %v2010_v11  ;;  %v2152_v11 = vld [vmem:[#allocation15 + $0x18] sm:$0xff]  ;;  %v2151_v14 = vld [vmem:[#allocation15 + $0x10] sm:$0xff] }
0x29ef   :  { %v2021_v30 = vmul.f32 %v2019_v5, %v2015_v63  ;;  %2171 = vmatpush.msrb.mxu0 %v2152_v11 }
0x29f1   :  { %2172 = vmatpush.msrb.mxu0 %v2151_v14 }
0x2a4c   :  { %v2024_v29 = vpop.permute.xlu0 %2023 }
0x2a4d   :  { %v2026_v12 = vmul.f32 %v2024_v29, %v2015_v63  ;;  %v2150_v29 = vld [vmem:[#allocation15 + $0x8] sm:$0xff] }
0x2a4e   :  { %2173 = vmatpush.msrb.mxu0 %v2150_v29 }
0x2a4f   :  { %2028 = vrot.lane.b32.xlu1 %v2026_v12, %s2812_s2 }
0x2ac1   :  { %v2029_v31 = vpop.permute.xlu1 %2028 }
0x2ac2   :  { %v3343_v33 = vadd.f32 %v2029_v31, %v2021_v30  ;;  %v2148_v31 = vld [vmem:[#allocation14 + $0x18] sm:$0xff] }
0x2ac3   :  { %2197 = vmatpush.msrb.mxu1 %v2148_v31 }
0x2ac4   :  { %2527 = vtanh.f32 %v3343_v33  ;;  %v2089_v26 = vrot.slane %v3343_v33, 6  ;;  %v2146_v33 = vld [vmem:[#allocation14 + $0x8] sm:$0xff] }
0x2ac5   :  { %2529 = vtanh.f32 %v1560_v61  ;;  %2198 = vmatpush.msrb.mxu1 %v2147_v32 }
0x2ac6   :  { %2531 = vpow2.f32 %v2322_v25 }
0x2ac7   :  { %2199 = vmatpush.msrb.mxu1 %v2146_v33 }
0x2ac9   :  { %2200 = vmatpush.msrb.mxu1 %v2145_v34 }
0x2aca   :  { %v2528_v36 = vpop.eup %2527 }
0x2acb   :  { %2034 = vrot.lane.b32.xlu2 %v2528_v36, %s2811_s1  ;;  %v2530_v2 = vpop.eup %2529 }
0x2acc   :  { %v2532_v39 = vpop.eup %2531 }
0x2acd   :  { %v2111_v40 = vadd.f32 1.0, %v2532_v39 }
0x2acf   :  { %2533 = vrcp.f32 %v2111_v40  ;;  %v2123_v46 = vand.u32 2147483648, %v2111_v40  ;;  %vm2117_vm12 = vweird.f32 %v2111_v40  ;;  %v2121_v47 = vand.u32 2147483647, %v2111_v40 }
0x2ad1   :  { %v2124_v24 = vor.u32 1.1754944e-38, %v2123_v46  ;;  %vm2122_vm13 = vcmp.eq.f32.partialorder %v2121_v47, 8.507059e+37 }
0x2ad3   :  { %2130 = vrot.lane.b32.xlu2 %v2530_v2, %s2811_s1  ;;  %v2215_v2 = vld [vmem:[#allocation17 + $0x18] sm:$0xff] }
0x2ad4   :  { %2235 = vmatpush.msra.mxu2 %v2215_v2 }
0x2ad5   :  { %v2534_v44 = vpop.eup %2533 }
0x2ad6   :  { %v2113_v43 = vmul.f32 %v2534_v44, %v2111_v40  ;;  %vm2118_vm11 = vweird.f32 %v2534_v44 }
0x2ad7   :  { %vm2119_vm5 = vmor %vm2117_vm12, %vm2118_vm11 }
0x2ad8   :  { %v2114_v0 = vsub.f32 1.0, %v2113_v43 }
0x2ada   :  { %v2115_v15 = vmul.f32 %v2534_v44, %v2114_v0 }
0x2adc   :  { %v2116_v1 = vadd.f32 %v2534_v44, %v2115_v15 }
0x2ade   :  { %v2120_v48 = vsel %vm2119_vm5, %v2534_v44, %v2116_v1  ;;  %v2210_v44 = vld [vmem:[%s3376_s0 + $0xe] sm:$0x3] }
0x2adf   :  { %v2125_v50 = vsel %vm2122_vm13, %v2124_v24, %v2120_v48 }
0x2ae0   :  { %v2128_v16 = vmul.f32 0.0, %v2125_v50 }
0x2b25   :  { %v2035_v38 = vpop.permute.xlu2 %2034 }
0x2b26   :  { %v2037_v41 = vmul.f32 %v2035_v38, %v2015_v63  ;;  %v2149_v63 = vld [vmem:[#allocation15] sm:$0xff]  ;;  %v2214_v38 = vld [vmem:[#allocation17 + $0x10] sm:$0xff] }
0x2b27   :  { %2174 = vmatpush.msrb.mxu0 %v2149_v63  ;;  %2236 = vmatpush.msra.mxu2 %v2214_v38 }
0x2b28   :  { %v2039_v42 = vrot.slane %v2037_v41, 4  ;;  %v2213_v41 = vld [vmem:[#allocation17 + $0x8] sm:$0xff] }
0x2b29   :  { %2237 = vmatpush.msra.mxu2 %v2213_v41 }
0x2b2a   :  { %2040 = vrot.lane.b32.xlu0 %v2039_v42, %s2812_s2  ;;  %v2212_v42 = vld [vmem:[#allocation17] sm:$0xff] }
0x2b2b   :  { %2238 = vmatpush.msra.mxu2 %v2212_v42 }
0x2b2d   :  { %v2131_v49 = vpop.permute.xlu2 %2130 }
0x2b2e   :  { %v2133_v51 = vmul.f32 %v2131_v49, %v2125_v50 }
0x2b9c   :  { %v2041_v6 = vpop.permute.xlu0 %2040 }
0x2b9d   :  { %2320 = vmatmul.msk.f32.vlgmr.msrb.gmra.mxu3 %vm202_vm0, %v2041_v6  ;;  %v2343_v6 = vld [vmem:[%s3388_s12] ss:$0 sm:$0xff]  ;;  %s2251_s12 = sshll.u32 %s3391_s15, 4  ;;  %s2252_s12 = int_to_ptr.hbm [resolvable:$true] %s2251_s12 }
0x2c20   :  { %v2061_v17 = vpop.f32.mrf.mxu3 }
0x2c21   :  { %v2065_v8 = vrot.slane %v2061_v17, 2 }
0x2c23   :  { %v2067_v19 = vadd.f32 %v2065_v8, %v3325_v28  ;;  %v2344_v8 = vld [vmem:[%s3390_s14] ss:$0 sm:$0xff] }
0x2c25   :  { %2535 = vtanh.f32 %v2067_v19  ;;  %v2321_v28 = vmul.f32 -1.442695, %v2067_v19 }
0x2c27   :  { %2537 = vpow2.f32 %v2321_v28 }
0x2c2b   :  { %v2536_v45 = vpop.eup %2535 }
0x2c2c   :  { %2093 = vrot.lane.b32.xlu1 %v2536_v45, %s2811_s1 }
0x2c2d   :  { %v2538_v52 = vpop.eup %2537 }
0x2c2e   :  { %v2071_v53 = vadd.f32 1.0, %v2538_v52 }
0x2c30   :  { %2539 = vrcp.f32 %v2071_v53  ;;  %v2083_v56 = vand.u32 2147483648, %v2071_v53  ;;  %vm2077_vm15 = vweird.f32 %v2071_v53  ;;  %v2081_v57 = vand.u32 2147483647, %v2071_v53 }
0x2c32   :  { %v2084_v59 = vor.u32 1.1754944e-38, %v2083_v56  ;;  %vm2082_vm2 = vcmp.eq.f32.partialorder %v2081_v57, 8.507059e+37 }
0x2c34   :  { %2135 = vrot.lane.b32.xlu1 %v2133_v51, %s2812_s2 }
0x2c36   :  { %v2540_v13 = vpop.eup %2539 }
0x2c37   :  { %v2073_v54 = vmul.f32 %v2540_v13, %v2071_v53  ;;  %vm2078_vm14 = vweird.f32 %v2540_v13 }
0x2c38   :  { %vm2079_vm1 = vmor %vm2077_vm15, %vm2078_vm14 }
0x2c39   :  { %v2074_v10 = vsub.f32 1.0, %v2073_v54 }
0x2c3b   :  { %v2075_v55 = vmul.f32 %v2540_v13, %v2074_v10 }
0x2c3d   :  { %v2076_v20 = vadd.f32 %v2540_v13, %v2075_v55 }
0x2c3f   :  { %v2080_v58 = vsel %vm2079_vm1, %v2540_v13, %v2076_v20 }
0x2c40   :  { %v2085_v3 = vsel %vm2082_vm2, %v2084_v59, %v2080_v58 }
0x2c41   :  { %v2091_v23 = vmul.f32 %v2089_v26, %v2085_v3 }
0x2c9e   :  { %v2094_v60 = vpop.permute.xlu1 %2093 }
0x2c9f   :  { %v2096_v7 = vmul.f32 %v2094_v60, %v2085_v3 }
0x2ca1   :  { %2098 = vrot.lane.b32.xlu0 %v2096_v7, %s2812_s2 }
0x2ca6   :  { %v2136_v9 = vpop.permute.xlu1 %2135 }
0x2ca7   :  { %v2138_v4 = vadd.f32 %v2136_v9, %v2128_v16 }
0x2ca9   :  { %2541 = vtanh.f32 %v2138_v4 }
0x2caf   :  { %v2542_v21 = vpop.eup %2541 }
0x2cb0   :  { %2141 = vrot.lane.b32.xlu0 %v2542_v21, %s2811_s1 }
0x2d13   :  { %v2099_v27 = vpop.permute.xlu0 %2098 }
0x2d14   :  { %v2101_v35 = vadd.f32 %v2099_v27, %v2091_v23 }
0x2d16   :  { %2543 = vtanh.f32 %v2101_v35 }
0x2d1c   :  { %v2544_v62 = vpop.eup %2543 }
0x2d1d   :  { %2104 = vrot.lane.b32.xlu2 %v2544_v62, %s2811_s1 }
0x2d22   :  { %v2142_v18 = vpop.permute.xlu0 %2141 }
0x2d23   :  { %v2144_v22 = vmul.f32 %v2142_v18, %v2125_v50 }
0x2d25   :  { %v2154_v37 = vrot.slane %v2144_v22, 6 }
0x2d27   :  { %2155 = vrot.lane.b32.xlu1 %v2154_v37, %s2812_s2 }
0x2d77   :  { %v2105_v12 = vpop.permute.xlu2 %2104 }
0x2d78   :  { %v2107_v5 = vmul.f32 %v2105_v12, %v2085_v3 }
0x2d7a   :  { %v2180_v30 = vrot.slane %v2107_v5, 6 }
0x2d7c   :  { %2181 = vrot.lane.b32.xlu2 %v2180_v30, %s2812_s2 }
0x2d99   :  { %v2156_v61 = vpop.permute.xlu1 %2155 }
0x2d9a   :  { %2323 = vmatmul.msk.f32.vlgmr.msrb.gmra.mxu0 %vm202_vm0, %v2156_v61 }
0x2dd6   :  { %v2182_v36 = vpop.permute.xlu2 %2181 }
0x2dd7   :  { %2324 = vmatmul.msk.f32.vlgmr.msrb.gmra.mxu1 %vm202_vm0, %v2182_v36 }
0x2e17   :  { %v2176_v25 = vpop.f32.mrf.mxu0 }
0x2e54   :  { %v2202_v39 = vpop.f32.mrf.mxu1 }
0x2e55   :  { %v2203_v40 = vadd.f32 %v2202_v39, %v2176_v25 }
0x2e57   :  { %v2209_v43 = vadd.f32 %v2343_v6, %v2203_v40 }
0x2e59   :  { %v2211_v17 = vadd.f32 %v2210_v44, %v2209_v43 }
0x2e5b   :  { %2325 = vmatmul.msk.f32.vlgmr.msra.gmra.mxu2 %vm202_vm0, %v2211_v17 }
0x2ede   :  { %v2240_v0 = vpop.f32.mrf.mxu2 }
0x2edf   :  { %v2241_v19 = vadd.f32 %v2344_v8, %v2240_v0 }
0x2ee1   :  { %2243 = vst [vmem:[#allocation18] sm:$0x3] %v2241_v19 }
0x2ee2   :  { %2254 = dma.vmem_to_hbm [thread:$0]  %s2250_s10, 32, %s2252_s12, [#allocation5]  }
0x2ee3   :  { %2795 = dma.done.wait [#allocation5], 32  }
0x2ee4   :  { %2796 = vsyncadd [#allocation5], 4294967264 }
0x2ee5   :  { %2259 = vsyncpa [#allocation4], 1 }
0x2ee6   :  { %2260 = vsyncpa [#allocation7], 1 }
0x2ee7   :  { %2261 = vsyncpa [#allocation10], 1 }
0x2ee8   :  { %2262 = vsyncpa [#allocation13], 1 }
0x2ee9   :  { %2263 = vsyncpa [#allocation16], 1 }
0x2eea   :  { %2264 = vsyncpa [#allocation5], 1 }

</bundles_post_ra>
